<compile_context>
chip_gen: v6e
topology: v6e:2x2x1
jax: 0.10.0
libtpu: 0.0.40
codegen_flags: <defaults>
</compile_context>

<pallas_src>
import functools

import jax
import jax.numpy as jnp
from jax.experimental import pallas as pl
from jax.experimental.pallas import tpu as pltpu


# ---------------------------- Pallas kernel ----------------------------

def _pad_into(pad_ref, src, H, W, padding_type):
    """Write src [H, W, C] into pad_ref [H+2, W+2, C] with 1-px padding."""
    C = src.shape[-1]
    pad_ref[1:H + 1, 1:W + 1, :] = src
    if padding_type == "zero":
        zrow = jnp.zeros((1, W, C), src.dtype)
        pad_ref[0:1, 1:W + 1, :] = zrow
        pad_ref[H + 1:H + 2, 1:W + 1, :] = zrow
        zcol = jnp.zeros((H + 2, 1, C), src.dtype)
        pad_ref[:, 0:1, :] = zcol
        pad_ref[:, W + 1:W + 2, :] = zcol
    else:
        # reflect (ReflectionPad2d) or replicate (ReplicationPad2d)
        t = 1 if padding_type == "reflect" else 0          # source row to mirror
        pad_ref[0:1, 1:W + 1, :] = src[t:t + 1]
        pad_ref[H + 1:H + 2, 1:W + 1, :] = src[H - 1 - t:H - t]
        c = 2 if padding_type == "reflect" else 1          # source column (padded coords)
        pad_ref[:, 0:1, :] = pad_ref[:, c:c + 1, :]
        pad_ref[:, W + 1:W + 2, :] = pad_ref[:, W + 1 - c:W + 2 - c, :]


def _conv3x3_from_pad(pad_ref, w_ref, b_ref, H, W, C):
    """3x3 'valid' conv over the padded VMEM map via 9 shifted MXU matmuls."""
    acc = jnp.zeros((H * W, C), jnp.float32)
    for kh in range(3):
        for kw in range(3):
            patch = pad_ref[kh:kh + H, kw:kw + W, :]        # [H, W, C] f32 (VMEM)
            patch = patch.reshape(H * W, C).astype(jnp.bfloat16)
            acc = acc + jnp.dot(patch, w_ref[kh * 3 + kw],  # bf16 x bf16 -> f32
                                preferred_element_type=jnp.float32)
    return acc + b_ref[...]                                 # [H*W, C] f32


def _instance_norm(v, eps=1e-5):
    """InstanceNorm2d(affine=False) over the flattened spatial axis."""
    mean = jnp.mean(v, axis=0, keepdims=True)
    var = jnp.mean((v - mean) * (v - mean), axis=0, keepdims=True)
    return (v - mean) * jax.lax.rsqrt(var + eps)


def _resnet_block_kernel(x_ref, w1_ref, b1_ref, w2_ref, b2_ref, out_ref,
                         pad_ref, *, padding_type):
    H, W, C = x_ref.shape
    x = x_ref[...]                                          # f32 [H, W, C] (VMEM)

    # --- conv1 + InstanceNorm + ReLU ---
    _pad_into(pad_ref, x, H, W, padding_type)
    h = _conv3x3_from_pad(pad_ref, w1_ref, b1_ref, H, W, C)
    h = jnp.maximum(_instance_norm(h), 0.0)
    # TODO(synk): training-mode Dropout(0.5) (use_dropout=True) not implemented;
    # at inference dropout is the identity.

    # --- conv2 + InstanceNorm ---
    _pad_into(pad_ref, h.reshape(H, W, C), H, W, padding_type)
    y = _conv3x3_from_pad(pad_ref, w2_ref, b2_ref, H, W, C)
    y = _instance_norm(y)

    # --- residual skip: x is already resident in VMEM ---
    out_ref[...] = (x + y.reshape(H, W, C)).astype(out_ref.dtype)


# ---------------------------- wrapper ----------------------------

def resnet_block(x_nchw, params, padding_type="reflect"):
    """ResnetBlock forward. x_nchw: [B, C, H, W] float32 (PyTorch layout)."""
    x = jnp.transpose(x_nchw, (0, 2, 3, 1)).astype(jnp.float32)   # -> NHWC
    B, H, W, C = x.shape

    w1 = params["w1"].astype(jnp.bfloat16)     # [9, Cin, Cout], idx = kh*3+kw
    w2 = params["w2"].astype(jnp.bfloat16)
    b1 = params["b1"].reshape(1, C).astype(jnp.float32)
    b2 = params["b2"].reshape(1, C).astype(jnp.float32)

    kernel = functools.partial(_resnet_block_kernel, padding_type=padding_type)
    out = pl.pallas_call(
        kernel,
        out_shape=jax.ShapeDtypeStruct((B, H, W, C), jnp.float32),
        grid=(B,),
        in_specs=[
            pl.BlockSpec((None, H, W, C), lambda b: (b, 0, 0, 0)),   # x (per sample)
            pl.BlockSpec((9, C, C), lambda b: (0, 0, 0)),            # w1
            pl.BlockSpec((1, C), lambda b: (0, 0)),                  # b1
            pl.BlockSpec((9, C, C), lambda b: (0, 0, 0)),            # w2
            pl.BlockSpec((1, C), lambda b: (0, 0)),                  # b2
        ],
        out_specs=pl.BlockSpec((None, H, W, C), lambda b: (b, 0, 0, 0)),
        scratch_shapes=[pltpu.VMEM((H + 2, W + 2, C), jnp.float32)], # padded map
        compiler_params=pltpu.CompilerParams(
            dimension_semantics=("parallel",)),                      # v7x: 2 TCs
    )(x, w1, b1, w2, b2)
    return jnp.transpose(out, (0, 3, 1, 2))                          # back to NCHW


# ---------------------------- parameters ----------------------------

def init_params(key, dim, use_bias=True):
    """Weights in [9, Cin, Cout] layout.  A torch Conv2d weight [Co, Ci, kh, kw]
    maps as w[kh*3 + kw, ci, co] = w_torch[co, ci, kh, kw]."""
    k1, k2, k3, k4 = jax.random.split(key, 4)
    w1 = jax.random.normal(k1, (9, dim, dim), jnp.float32) * 0.02
    w2 = jax.random.normal(k2, (9, dim, dim), jnp.float32) * 0.02
    if use_bias:
        b1 = jax.random.normal(k3, (dim,), jnp.float32) * 0.02
        b2 = jax.random.normal(k4, (dim,), jnp.float32) * 0.02
    else:
        b1 = jnp.zeros((dim,), jnp.float32)
        b2 = jnp.zeros((dim,), jnp.float32)
    return {"w1": w1, "b1": b1, "w2": w2, "b2": b2}


# ---------------------------- pure-JAX reference ----------------------------

def _reference(x_nchw, params, padding_type="reflect", eps=1e-5):
    x = jnp.transpose(x_nchw, (0, 2, 3, 1))
    mode = {"reflect": "reflect", "replicate": "edge", "zero": "constant"}[padding_type]

    def conv(z, w9, b):
        C = z.shape[-1]
        w = w9.reshape(3, 3, C, C)                                  # HWIO
        zp = jnp.pad(z, ((0, 0), (1, 1), (1, 1), (0, 0)), mode=mode)
        out = jax.lax.conv_general_dilated(
            zp, w, (1, 1), "VALID",
            dimension_numbers=("NHWC", "HWIO", "NHWC"),
            precision=jax.lax.Precision.HIGHEST)
        return out + b.reshape(1, 1, 1, C)

    def inorm(z):
        m = jnp.mean(z, axis=(1, 2), keepdims=True)
        v = jnp.mean((z - m) ** 2, axis=(1, 2), keepdims=True)
        return (z - m) * jax.lax.rsqrt(v + eps)

    h = jnp.maximum(inorm(conv(x, params["w1"], params["b1"])), 0.0)
    y = inorm(conv(h, params["w2"], params["b2"]))
    return jnp.transpose(x + y, (0, 3, 1, 2))


# ---------------------------- demo ----------------------------

if __name__ == "__main__":
    key = jax.random.PRNGKey(0)
    k_par, k_x = jax.random.split(key)

    B, dim, H, W = 2, 32, 16, 16
    params = init_params(k_par, dim, use_bias=True)
    x = jax.random.normal(k_x, (B, dim, H, W), jnp.float32)   # NCHW like PyTorch

    fwd = jax.jit(functools.partial(resnet_block, padding_type="reflect"))
    out = fwd(x, params)
    jax.block_until_ready(out)

    assert out.shape == (B, dim, H, W)
    ref = _reference(x, params, "reflect")
    err = float(jnp.max(jnp.abs(out - ref)))
    assert err < 0.1, f"max abs err vs f32 reference = {err}"
    print("KERNEL_OK")
</pallas_src>

<mosaic_0001>
module attributes {stable_mosaic.version = 11 : i64} {
  func.func @_resnet_block_kernel(%arg0: i32, %arg1: memref<1x16x16x32xf32, #tpu.memory_space<vmem>>, %arg2: memref<9x32x32xbf16, #tpu.memory_space<vmem>>, %arg3: memref<1x32xf32, #tpu.memory_space<vmem>>, %arg4: memref<9x32x32xbf16, #tpu.memory_space<vmem>>, %arg5: memref<1x32xf32, #tpu.memory_space<vmem>>, %arg6: memref<1x16x16x32xf32, #tpu.memory_space<vmem>>, %arg7: memref<18x18x32xf32, #tpu.memory_space<vmem>>) attributes {dimension_semantics = [#tpu.dimension_semantics<parallel>], iteration_bounds = array<i64: 2>, scalar_prefetch = 0 : i64, scratch_operands = 1 : i64, tpu.core_type = #tpu.core_type<tc>, window_params = [{transform_indices = @transform_0, window_bounds = array<i64: 1, 16, 16, 32>}, {pipeline_mode = #tpu.pipeline_mode<synchronous>, transform_indices = @transform_1, window_bounds = array<i64: 9, 32, 32>}, {pipeline_mode = #tpu.pipeline_mode<synchronous>, transform_indices = @transform_2, window_bounds = array<i64: 1, 32>}, {pipeline_mode = #tpu.pipeline_mode<synchronous>, transform_indices = @transform_3, window_bounds = array<i64: 9, 32, 32>}, {pipeline_mode = #tpu.pipeline_mode<synchronous>, transform_indices = @transform_4, window_bounds = array<i64: 1, 32>}, {transform_indices = @transform_5, window_bounds = array<i64: 1, 16, 16, 32>}]} {
    %c0 = arith.constant 0 : index
    %c0_0 = arith.constant 0 : index
    %c0_1 = arith.constant 0 : index
    %c0_2 = arith.constant 0 : index
    %0 = vector.load %arg1[%c0, %c0_0, %c0_1, %c0_2] : memref<1x16x16x32xf32, #tpu.memory_space<vmem>>, vector<1x16x16x32xf32>
    %1 = vector.shape_cast %0 : vector<1x16x16x32xf32> to vector<16x16x32xf32>
    %c1 = arith.constant 1 : index
    %c1_3 = arith.constant 1 : index
    %c0_4 = arith.constant 0 : index
    %2 = vector.load %arg7[%c1, %c1_3, %c0_4] : memref<18x18x32xf32, #tpu.memory_space<vmem>>, vector<16x16x32xf32>
    tpu.vector_store %arg7[%c1, %c1_3, %c0_4], %1 {strides = array<i32>} : memref<18x18x32xf32, #tpu.memory_space<vmem>>, vector<16x16x32xf32>,
    %3 = vector.extract_strided_slice %1 {offsets = [1, 0, 0], sizes = [1, 16, 32], strides = [1, 1, 1]} : vector<16x16x32xf32> to vector<1x16x32xf32>
    %c0_5 = arith.constant 0 : index
    %c1_6 = arith.constant 1 : index
    %c0_7 = arith.constant 0 : index
    %4 = vector.load %arg7[%c0_5, %c1_6, %c0_7] : memref<18x18x32xf32, #tpu.memory_space<vmem>>, vector<1x16x32xf32>
    tpu.vector_store %arg7[%c0_5, %c1_6, %c0_7], %3 {strides = array<i32>} : memref<18x18x32xf32, #tpu.memory_space<vmem>>, vector<1x16x32xf32>,
    %5 = vector.extract_strided_slice %1 {offsets = [14, 0, 0], sizes = [1, 16, 32], strides = [1, 1, 1]} : vector<16x16x32xf32> to vector<1x16x32xf32>
    %c17 = arith.constant 17 : index
    %c1_8 = arith.constant 1 : index
    %c0_9 = arith.constant 0 : index
    %6 = vector.load %arg7[%c17, %c1_8, %c0_9] : memref<18x18x32xf32, #tpu.memory_space<vmem>>, vector<1x16x32xf32>
    tpu.vector_store %arg7[%c17, %c1_8, %c0_9], %5 {strides = array<i32>} : memref<18x18x32xf32, #tpu.memory_space<vmem>>, vector<1x16x32xf32>,
    %c0_10 = arith.constant 0 : index
    %c2 = arith.constant 2 : index
    %c0_11 = arith.constant 0 : index
    %7 = vector.load %arg7[%c0_10, %c2, %c0_11] : memref<18x18x32xf32, #tpu.memory_space<vmem>>, vector<18x1x32xf32>
    %c0_12 = arith.constant 0 : index
    %c0_13 = arith.constant 0 : index
    %c0_14 = arith.constant 0 : index
    %8 = vector.load %arg7[%c0_12, %c0_13, %c0_14] : memref<18x18x32xf32, #tpu.memory_space<vmem>>, vector<18x1x32xf32>
    tpu.vector_store %arg7[%c0_12, %c0_13, %c0_14], %7 {strides = array<i32>} : memref<18x18x32xf32, #tpu.memory_space<vmem>>, vector<18x1x32xf32>,
    %c0_15 = arith.constant 0 : index
    %c15 = arith.constant 15 : index
    %c0_16 = arith.constant 0 : index
    %9 = vector.load %arg7[%c0_15, %c15, %c0_16] : memref<18x18x32xf32, #tpu.memory_space<vmem>>, vector<18x1x32xf32>
    %c0_17 = arith.constant 0 : index
    %c17_18 = arith.constant 17 : index
    %c0_19 = arith.constant 0 : index
    %10 = vector.load %arg7[%c0_17, %c17_18, %c0_19] : memref<18x18x32xf32, #tpu.memory_space<vmem>>, vector<18x1x32xf32>
    tpu.vector_store %arg7[%c0_17, %c17_18, %c0_19], %9 {strides = array<i32>} : memref<18x18x32xf32, #tpu.memory_space<vmem>>, vector<18x1x32xf32>,
    %cst = arith.constant 0.000000e+00 : f32
    %11 = vector.broadcast %cst : f32 to vector<256x32xf32>
    %c0_20 = arith.constant 0 : index
    %c0_21 = arith.constant 0 : index
    %c0_22 = arith.constant 0 : index
    %12 = vector.load %arg7[%c0_20, %c0_21, %c0_22] : memref<18x18x32xf32, #tpu.memory_space<vmem>>, vector<16x16x32xf32>
    %13 = vector.shape_cast %12 : vector<16x16x32xf32> to vector<256x32xf32>
    %14 = arith.truncf %13 : vector<256x32xf32> to vector<256x32xbf16>
    %c0_23 = arith.constant 0 : index
    %c0_24 = arith.constant 0 : index
    %c0_25 = arith.constant 0 : index
    %15 = vector.load %arg2[%c0_23, %c0_24, %c0_25] : memref<9x32x32xbf16, #tpu.memory_space<vmem>>, vector<1x32x32xbf16>
    %16 = vector.shape_cast %15 : vector<1x32x32xbf16> to vector<32x32xbf16>
    %cst_26 = arith.constant dense<0.000000e+00> : vector<256x32xf32>
    %17 = tpu.matmul %14, %16, %cst_26 {dimension_numbers = #tpu.dot_dimension_numbers<[1], [0], [0], [1], [0, 0, 1, 1], [], []>} : vector<256x32xbf16>, vector<32x32xbf16>, vector<256x32xf32> -> vector<256x32xf32>
    %18 = arith.addf %11, %17 : vector<256x32xf32>
    %c0_27 = arith.constant 0 : index
    %c1_28 = arith.constant 1 : index
    %c0_29 = arith.constant 0 : index
    %19 = vector.load %arg7[%c0_27, %c1_28, %c0_29] : memref<18x18x32xf32, #tpu.memory_space<vmem>>, vector<16x16x32xf32>
    %20 = vector.shape_cast %19 : vector<16x16x32xf32> to vector<256x32xf32>
    %21 = arith.truncf %20 : vector<256x32xf32> to vector<256x32xbf16>
    %c1_30 = arith.constant 1 : index
    %c0_31 = arith.constant 0 : index
    %c0_32 = arith.constant 0 : index
    %22 = vector.load %arg2[%c1_30, %c0_31, %c0_32] : memref<9x32x32xbf16, #tpu.memory_space<vmem>>, vector<1x32x32xbf16>
    %23 = vector.shape_cast %22 : vector<1x32x32xbf16> to vector<32x32xbf16>
    %cst_33 = arith.constant dense<0.000000e+00> : vector<256x32xf32>
    %24 = tpu.matmul %21, %23, %cst_33 {dimension_numbers = #tpu.dot_dimension_numbers<[1], [0], [0], [1], [0, 0, 1, 1], [], []>} : vector<256x32xbf16>, vector<32x32xbf16>, vector<256x32xf32> -> vector<256x32xf32>
    %25 = arith.addf %18, %24 : vector<256x32xf32>
    %c0_34 = arith.constant 0 : index
    %c2_35 = arith.constant 2 : index
    %c0_36 = arith.constant 0 : index
    %26 = vector.load %arg7[%c0_34, %c2_35, %c0_36] : memref<18x18x32xf32, #tpu.memory_space<vmem>>, vector<16x16x32xf32>
    %27 = vector.shape_cast %26 : vector<16x16x32xf32> to vector<256x32xf32>
    %28 = arith.truncf %27 : vector<256x32xf32> to vector<256x32xbf16>
    %c2_37 = arith.constant 2 : index
    %c0_38 = arith.constant 0 : index
    %c0_39 = arith.constant 0 : index
    %29 = vector.load %arg2[%c2_37, %c0_38, %c0_39] : memref<9x32x32xbf16, #tpu.memory_space<vmem>>, vector<1x32x32xbf16>
    %30 = vector.shape_cast %29 : vector<1x32x32xbf16> to vector<32x32xbf16>
    %cst_40 = arith.constant dense<0.000000e+00> : vector<256x32xf32>
    %31 = tpu.matmul %28, %30, %cst_40 {dimension_numbers = #tpu.dot_dimension_numbers<[1], [0], [0], [1], [0, 0, 1, 1], [], []>} : vector<256x32xbf16>, vector<32x32xbf16>, vector<256x32xf32> -> vector<256x32xf32>
    %32 = arith.addf %25, %31 : vector<256x32xf32>
    %c1_41 = arith.constant 1 : index
    %c0_42 = arith.constant 0 : index
    %c0_43 = arith.constant 0 : index
    %33 = vector.load %arg7[%c1_41, %c0_42, %c0_43] : memref<18x18x32xf32, #tpu.memory_space<vmem>>, vector<16x16x32xf32>
    %34 = vector.shape_cast %33 : vector<16x16x32xf32> to vector<256x32xf32>
    %35 = arith.truncf %34 : vector<256x32xf32> to vector<256x32xbf16>
    %c3 = arith.constant 3 : index
    %c0_44 = arith.constant 0 : index
    %c0_45 = arith.constant 0 : index
    %36 = vector.load %arg2[%c3, %c0_44, %c0_45] : memref<9x32x32xbf16, #tpu.memory_space<vmem>>, vector<1x32x32xbf16>
    %37 = vector.shape_cast %36 : vector<1x32x32xbf16> to vector<32x32xbf16>
    %cst_46 = arith.constant dense<0.000000e+00> : vector<256x32xf32>
    %38 = tpu.matmul %35, %37, %cst_46 {dimension_numbers = #tpu.dot_dimension_numbers<[1], [0], [0], [1], [0, 0, 1, 1], [], []>} : vector<256x32xbf16>, vector<32x32xbf16>, vector<256x32xf32> -> vector<256x32xf32>
    %39 = arith.addf %32, %38 : vector<256x32xf32>
    %c1_47 = arith.constant 1 : index
    %c1_48 = arith.constant 1 : index
    %c0_49 = arith.constant 0 : index
    %40 = vector.load %arg7[%c1_47, %c1_48, %c0_49] : memref<18x18x32xf32, #tpu.memory_space<vmem>>, vector<16x16x32xf32>
    %41 = vector.shape_cast %40 : vector<16x16x32xf32> to vector<256x32xf32>
    %42 = arith.truncf %41 : vector<256x32xf32> to vector<256x32xbf16>
    %c4 = arith.constant 4 : index
    %c0_50 = arith.constant 0 : index
    %c0_51 = arith.constant 0 : index
    %43 = vector.load %arg2[%c4, %c0_50, %c0_51] : memref<9x32x32xbf16, #tpu.memory_space<vmem>>, vector<1x32x32xbf16>
    %44 = vector.shape_cast %43 : vector<1x32x32xbf16> to vector<32x32xbf16>
    %cst_52 = arith.constant dense<0.000000e+00> : vector<256x32xf32>
    %45 = tpu.matmul %42, %44, %cst_52 {dimension_numbers = #tpu.dot_dimension_numbers<[1], [0], [0], [1], [0, 0, 1, 1], [], []>} : vector<256x32xbf16>, vector<32x32xbf16>, vector<256x32xf32> -> vector<256x32xf32>
    %46 = arith.addf %39, %45 : vector<256x32xf32>
    %c1_53 = arith.constant 1 : index
    %c2_54 = arith.constant 2 : index
    %c0_55 = arith.constant 0 : index
    %47 = vector.load %arg7[%c1_53, %c2_54, %c0_55] : memref<18x18x32xf32, #tpu.memory_space<vmem>>, vector<16x16x32xf32>
    %48 = vector.shape_cast %47 : vector<16x16x32xf32> to vector<256x32xf32>
    %49 = arith.truncf %48 : vector<256x32xf32> to vector<256x32xbf16>
    %c5 = arith.constant 5 : index
    %c0_56 = arith.constant 0 : index
    %c0_57 = arith.constant 0 : index
    %50 = vector.load %arg2[%c5, %c0_56, %c0_57] : memref<9x32x32xbf16, #tpu.memory_space<vmem>>, vector<1x32x32xbf16>
    %51 = vector.shape_cast %50 : vector<1x32x32xbf16> to vector<32x32xbf16>
    %cst_58 = arith.constant dense<0.000000e+00> : vector<256x32xf32>
    %52 = tpu.matmul %49, %51, %cst_58 {dimension_numbers = #tpu.dot_dimension_numbers<[1], [0], [0], [1], [0, 0, 1, 1], [], []>} : vector<256x32xbf16>, vector<32x32xbf16>, vector<256x32xf32> -> vector<256x32xf32>
    %53 = arith.addf %46, %52 : vector<256x32xf32>
    %c2_59 = arith.constant 2 : index
    %c0_60 = arith.constant 0 : index
    %c0_61 = arith.constant 0 : index
    %54 = vector.load %arg7[%c2_59, %c0_60, %c0_61] : memref<18x18x32xf32, #tpu.memory_space<vmem>>, vector<16x16x32xf32>
    %55 = vector.shape_cast %54 : vector<16x16x32xf32> to vector<256x32xf32>
    %56 = arith.truncf %55 : vector<256x32xf32> to vector<256x32xbf16>
    %c6 = arith.constant 6 : index
    %c0_62 = arith.constant 0 : index
    %c0_63 = arith.constant 0 : index
    %57 = vector.load %arg2[%c6, %c0_62, %c0_63] : memref<9x32x32xbf16, #tpu.memory_space<vmem>>, vector<1x32x32xbf16>
    %58 = vector.shape_cast %57 : vector<1x32x32xbf16> to vector<32x32xbf16>
    %cst_64 = arith.constant dense<0.000000e+00> : vector<256x32xf32>
    %59 = tpu.matmul %56, %58, %cst_64 {dimension_numbers = #tpu.dot_dimension_numbers<[1], [0], [0], [1], [0, 0, 1, 1], [], []>} : vector<256x32xbf16>, vector<32x32xbf16>, vector<256x32xf32> -> vector<256x32xf32>
    %60 = arith.addf %53, %59 : vector<256x32xf32>
    %c2_65 = arith.constant 2 : index
    %c1_66 = arith.constant 1 : index
    %c0_67 = arith.constant 0 : index
    %61 = vector.load %arg7[%c2_65, %c1_66, %c0_67] : memref<18x18x32xf32, #tpu.memory_space<vmem>>, vector<16x16x32xf32>
    %62 = vector.shape_cast %61 : vector<16x16x32xf32> to vector<256x32xf32>
    %63 = arith.truncf %62 : vector<256x32xf32> to vector<256x32xbf16>
    %c7 = arith.constant 7 : index
    %c0_68 = arith.constant 0 : index
    %c0_69 = arith.constant 0 : index
    %64 = vector.load %arg2[%c7, %c0_68, %c0_69] : memref<9x32x32xbf16, #tpu.memory_space<vmem>>, vector<1x32x32xbf16>
    %65 = vector.shape_cast %64 : vector<1x32x32xbf16> to vector<32x32xbf16>
    %cst_70 = arith.constant dense<0.000000e+00> : vector<256x32xf32>
    %66 = tpu.matmul %63, %65, %cst_70 {dimension_numbers = #tpu.dot_dimension_numbers<[1], [0], [0], [1], [0, 0, 1, 1], [], []>} : vector<256x32xbf16>, vector<32x32xbf16>, vector<256x32xf32> -> vector<256x32xf32>
    %67 = arith.addf %60, %66 : vector<256x32xf32>
    %c2_71 = arith.constant 2 : index
    %c2_72 = arith.constant 2 : index
    %c0_73 = arith.constant 0 : index
    %68 = vector.load %arg7[%c2_71, %c2_72, %c0_73] : memref<18x18x32xf32, #tpu.memory_space<vmem>>, vector<16x16x32xf32>
    %69 = vector.shape_cast %68 : vector<16x16x32xf32> to vector<256x32xf32>
    %70 = arith.truncf %69 : vector<256x32xf32> to vector<256x32xbf16>
    %c8 = arith.constant 8 : index
    %c0_74 = arith.constant 0 : index
    %c0_75 = arith.constant 0 : index
    %71 = vector.load %arg2[%c8, %c0_74, %c0_75] : memref<9x32x32xbf16, #tpu.memory_space<vmem>>, vector<1x32x32xbf16>
    %72 = vector.shape_cast %71 : vector<1x32x32xbf16> to vector<32x32xbf16>
    %cst_76 = arith.constant dense<0.000000e+00> : vector<256x32xf32>
    %73 = tpu.matmul %70, %72, %cst_76 {dimension_numbers = #tpu.dot_dimension_numbers<[1], [0], [0], [1], [0, 0, 1, 1], [], []>} : vector<256x32xbf16>, vector<32x32xbf16>, vector<256x32xf32> -> vector<256x32xf32>
    %74 = arith.addf %67, %73 : vector<256x32xf32>
    %c0_77 = arith.constant 0 : index
    %c0_78 = arith.constant 0 : index
    %75 = vector.load %arg3[%c0_77, %c0_78] : memref<1x32xf32, #tpu.memory_space<vmem>>, vector<1x32xf32>
    %76 = vector.broadcast %75 : vector<1x32xf32> to vector<256x32xf32>
    %77 = arith.addf %74, %76 : vector<256x32xf32>
    %cst_79 = arith.constant dense<0.000000e+00> : vector<32xf32>
    %78 = vector.multi_reduction <add>, %77, %cst_79 [0] : vector<256x32xf32> to vector<32xf32>
    %79 = vector.shape_cast %78 : vector<32xf32> to vector<1x32xf32>
    %cst_80 = arith.constant 2.560000e+02 : f32
    %80 = vector.broadcast %cst_80 : f32 to vector<1x32xf32>
    %81 = arith.divf %79, %80 : vector<1x32xf32>
    %82 = vector.broadcast %81 : vector<1x32xf32> to vector<256x32xf32>
    %83 = arith.subf %77, %82 : vector<256x32xf32>
    %84 = vector.broadcast %81 : vector<1x32xf32> to vector<256x32xf32>
    %85 = arith.subf %77, %84 : vector<256x32xf32>
    %86 = arith.mulf %83, %85 : vector<256x32xf32>
    %cst_81 = arith.constant dense<0.000000e+00> : vector<32xf32>
    %87 = vector.multi_reduction <add>, %86, %cst_81 [0] : vector<256x32xf32> to vector<32xf32>
    %88 = vector.shape_cast %87 : vector<32xf32> to vector<1x32xf32>
    %cst_82 = arith.constant 2.560000e+02 : f32
    %89 = vector.broadcast %cst_82 : f32 to vector<1x32xf32>
    %90 = arith.divf %88, %89 : vector<1x32xf32>
    %91 = vector.broadcast %81 : vector<1x32xf32> to vector<256x32xf32>
    %92 = arith.subf %77, %91 : vector<256x32xf32>
    %cst_83 = arith.constant 9.99999974E-6 : f32
    %93 = vector.broadcast %cst_83 : f32 to vector<1x32xf32>
    %94 = arith.addf %90, %93 : vector<1x32xf32>
    %95 = math.rsqrt %94 : vector<1x32xf32>
    %96 = vector.broadcast %95 : vector<1x32xf32> to vector<256x32xf32>
    %97 = arith.mulf %92, %96 : vector<256x32xf32>
    %cst_84 = arith.constant 0.000000e+00 : f32
    %98 = vector.broadcast %cst_84 : f32 to vector<256x32xf32>
    %99 = arith.maximumf %97, %98 : vector<256x32xf32>
    %100 = vector.shape_cast %99 : vector<256x32xf32> to vector<16x16x32xf32>
    %c1_85 = arith.constant 1 : index
    %c1_86 = arith.constant 1 : index
    %c0_87 = arith.constant 0 : index
    %101 = vector.load %arg7[%c1_85, %c1_86, %c0_87] : memref<18x18x32xf32, #tpu.memory_space<vmem>>, vector<16x16x32xf32>
    tpu.vector_store %arg7[%c1_85, %c1_86, %c0_87], %100 {strides = array<i32>} : memref<18x18x32xf32, #tpu.memory_space<vmem>>, vector<16x16x32xf32>,
    %102 = vector.extract_strided_slice %100 {offsets = [1, 0, 0], sizes = [1, 16, 32], strides = [1, 1, 1]} : vector<16x16x32xf32> to vector<1x16x32xf32>
    %c0_88 = arith.constant 0 : index
    %c1_89 = arith.constant 1 : index
    %c0_90 = arith.constant 0 : index
    %103 = vector.load %arg7[%c0_88, %c1_89, %c0_90] : memref<18x18x32xf32, #tpu.memory_space<vmem>>, vector<1x16x32xf32>
    tpu.vector_store %arg7[%c0_88, %c1_89, %c0_90], %102 {strides = array<i32>} : memref<18x18x32xf32, #tpu.memory_space<vmem>>, vector<1x16x32xf32>,
    %104 = vector.extract_strided_slice %100 {offsets = [14, 0, 0], sizes = [1, 16, 32], strides = [1, 1, 1]} : vector<16x16x32xf32> to vector<1x16x32xf32>
    %c17_91 = arith.constant 17 : index
    %c1_92 = arith.constant 1 : index
    %c0_93 = arith.constant 0 : index
    %105 = vector.load %arg7[%c17_91, %c1_92, %c0_93] : memref<18x18x32xf32, #tpu.memory_space<vmem>>, vector<1x16x32xf32>
    tpu.vector_store %arg7[%c17_91, %c1_92, %c0_93], %104 {strides = array<i32>} : memref<18x18x32xf32, #tpu.memory_space<vmem>>, vector<1x16x32xf32>,
    %c0_94 = arith.constant 0 : index
    %c2_95 = arith.constant 2 : index
    %c0_96 = arith.constant 0 : index
    %106 = vector.load %arg7[%c0_94, %c2_95, %c0_96] : memref<18x18x32xf32, #tpu.memory_space<vmem>>, vector<18x1x32xf32>
    %c0_97 = arith.constant 0 : index
    %c0_98 = arith.constant 0 : index
    %c0_99 = arith.constant 0 : index
    %107 = vector.load %arg7[%c0_97, %c0_98, %c0_99] : memref<18x18x32xf32, #tpu.memory_space<vmem>>, vector<18x1x32xf32>
    tpu.vector_store %arg7[%c0_97, %c0_98, %c0_99], %106 {strides = array<i32>} : memref<18x18x32xf32, #tpu.memory_space<vmem>>, vector<18x1x32xf32>,
    %c0_100 = arith.constant 0 : index
    %c15_101 = arith.constant 15 : index
    %c0_102 = arith.constant 0 : index
    %108 = vector.load %arg7[%c0_100, %c15_101, %c0_102] : memref<18x18x32xf32, #tpu.memory_space<vmem>>, vector<18x1x32xf32>
    %c0_103 = arith.constant 0 : index
    %c17_104 = arith.constant 17 : index
    %c0_105 = arith.constant 0 : index
    %109 = vector.load %arg7[%c0_103, %c17_104, %c0_105] : memref<18x18x32xf32, #tpu.memory_space<vmem>>, vector<18x1x32xf32>
    tpu.vector_store %arg7[%c0_103, %c17_104, %c0_105], %108 {strides = array<i32>} : memref<18x18x32xf32, #tpu.memory_space<vmem>>, vector<18x1x32xf32>,
    %cst_106 = arith.constant 0.000000e+00 : f32
    %110 = vector.broadcast %cst_106 : f32 to vector<256x32xf32>
    %c0_107 = arith.constant 0 : index
    %c0_108 = arith.constant 0 : index
    %c0_109 = arith.constant 0 : index
    %111 = vector.load %arg7[%c0_107, %c0_108, %c0_109] : memref<18x18x32xf32, #tpu.memory_space<vmem>>, vector<16x16x32xf32>
    %112 = vector.shape_cast %111 : vector<16x16x32xf32> to vector<256x32xf32>
    %113 = arith.truncf %112 : vector<256x32xf32> to vector<256x32xbf16>
    %c0_110 = arith.constant 0 : index
    %c0_111 = arith.constant 0 : index
    %c0_112 = arith.constant 0 : index
    %114 = vector.load %arg4[%c0_110, %c0_111, %c0_112] : memref<9x32x32xbf16, #tpu.memory_space<vmem>>, vector<1x32x32xbf16>
    %115 = vector.shape_cast %114 : vector<1x32x32xbf16> to vector<32x32xbf16>
    %cst_113 = arith.constant dense<0.000000e+00> : vector<256x32xf32>
    %116 = tpu.matmul %113, %115, %cst_113 {dimension_numbers = #tpu.dot_dimension_numbers<[1], [0], [0], [1], [0, 0, 1, 1], [], []>} : vector<256x32xbf16>, vector<32x32xbf16>, vector<256x32xf32> -> vector<256x32xf32>
    %117 = arith.addf %110, %116 : vector<256x32xf32>
    %c0_114 = arith.constant 0 : index
    %c1_115 = arith.constant 1 : index
    %c0_116 = arith.constant 0 : index
    %118 = vector.load %arg7[%c0_114, %c1_115, %c0_116] : memref<18x18x32xf32, #tpu.memory_space<vmem>>, vector<16x16x32xf32>
    %119 = vector.shape_cast %118 : vector<16x16x32xf32> to vector<256x32xf32>
    %120 = arith.truncf %119 : vector<256x32xf32> to vector<256x32xbf16>
    %c1_117 = arith.constant 1 : index
    %c0_118 = arith.constant 0 : index
    %c0_119 = arith.constant 0 : index
    %121 = vector.load %arg4[%c1_117, %c0_118, %c0_119] : memref<9x32x32xbf16, #tpu.memory_space<vmem>>, vector<1x32x32xbf16>
    %122 = vector.shape_cast %121 : vector<1x32x32xbf16> to vector<32x32xbf16>
    %cst_120 = arith.constant dense<0.000000e+00> : vector<256x32xf32>
    %123 = tpu.matmul %120, %122, %cst_120 {dimension_numbers = #tpu.dot_dimension_numbers<[1], [0], [0], [1], [0, 0, 1, 1], [], []>} : vector<256x32xbf16>, vector<32x32xbf16>, vector<256x32xf32> -> vector<256x32xf32>
    %124 = arith.addf %117, %123 : vector<256x32xf32>
    %c0_121 = arith.constant 0 : index
    %c2_122 = arith.constant 2 : index
    %c0_123 = arith.constant 0 : index
    %125 = vector.load %arg7[%c0_121, %c2_122, %c0_123] : memref<18x18x32xf32, #tpu.memory_space<vmem>>, vector<16x16x32xf32>
    %126 = vector.shape_cast %125 : vector<16x16x32xf32> to vector<256x32xf32>
    %127 = arith.truncf %126 : vector<256x32xf32> to vector<256x32xbf16>
    %c2_124 = arith.constant 2 : index
    %c0_125 = arith.constant 0 : index
    %c0_126 = arith.constant 0 : index
    %128 = vector.load %arg4[%c2_124, %c0_125, %c0_126] : memref<9x32x32xbf16, #tpu.memory_space<vmem>>, vector<1x32x32xbf16>
    %129 = vector.shape_cast %128 : vector<1x32x32xbf16> to vector<32x32xbf16>
    %cst_127 = arith.constant dense<0.000000e+00> : vector<256x32xf32>
    %130 = tpu.matmul %127, %129, %cst_127 {dimension_numbers = #tpu.dot_dimension_numbers<[1], [0], [0], [1], [0, 0, 1, 1], [], []>} : vector<256x32xbf16>, vector<32x32xbf16>, vector<256x32xf32> -> vector<256x32xf32>
    %131 = arith.addf %124, %130 : vector<256x32xf32>
    %c1_128 = arith.constant 1 : index
    %c0_129 = arith.constant 0 : index
    %c0_130 = arith.constant 0 : index
    %132 = vector.load %arg7[%c1_128, %c0_129, %c0_130] : memref<18x18x32xf32, #tpu.memory_space<vmem>>, vector<16x16x32xf32>
    %133 = vector.shape_cast %132 : vector<16x16x32xf32> to vector<256x32xf32>
    %134 = arith.truncf %133 : vector<256x32xf32> to vector<256x32xbf16>
    %c3_131 = arith.constant 3 : index
    %c0_132 = arith.constant 0 : index
    %c0_133 = arith.constant 0 : index
    %135 = vector.load %arg4[%c3_131, %c0_132, %c0_133] : memref<9x32x32xbf16, #tpu.memory_space<vmem>>, vector<1x32x32xbf16>
    %136 = vector.shape_cast %135 : vector<1x32x32xbf16> to vector<32x32xbf16>
    %cst_134 = arith.constant dense<0.000000e+00> : vector<256x32xf32>
    %137 = tpu.matmul %134, %136, %cst_134 {dimension_numbers = #tpu.dot_dimension_numbers<[1], [0], [0], [1], [0, 0, 1, 1], [], []>} : vector<256x32xbf16>, vector<32x32xbf16>, vector<256x32xf32> -> vector<256x32xf32>
    %138 = arith.addf %131, %137 : vector<256x32xf32>
    %c1_135 = arith.constant 1 : index
    %c1_136 = arith.constant 1 : index
    %c0_137 = arith.constant 0 : index
    %139 = vector.load %arg7[%c1_135, %c1_136, %c0_137] : memref<18x18x32xf32, #tpu.memory_space<vmem>>, vector<16x16x32xf32>
    %140 = vector.shape_cast %139 : vector<16x16x32xf32> to vector<256x32xf32>
    %141 = arith.truncf %140 : vector<256x32xf32> to vector<256x32xbf16>
    %c4_138 = arith.constant 4 : index
    %c0_139 = arith.constant 0 : index
    %c0_140 = arith.constant 0 : index
    %142 = vector.load %arg4[%c4_138, %c0_139, %c0_140] : memref<9x32x32xbf16, #tpu.memory_space<vmem>>, vector<1x32x32xbf16>
    %143 = vector.shape_cast %142 : vector<1x32x32xbf16> to vector<32x32xbf16>
    %cst_141 = arith.constant dense<0.000000e+00> : vector<256x32xf32>
    %144 = tpu.matmul %141, %143, %cst_141 {dimension_numbers = #tpu.dot_dimension_numbers<[1], [0], [0], [1], [0, 0, 1, 1], [], []>} : vector<256x32xbf16>, vector<32x32xbf16>, vector<256x32xf32> -> vector<256x32xf32>
    %145 = arith.addf %138, %144 : vector<256x32xf32>
    %c1_142 = arith.constant 1 : index
    %c2_143 = arith.constant 2 : index
    %c0_144 = arith.constant 0 : index
    %146 = vector.load %arg7[%c1_142, %c2_143, %c0_144] : memref<18x18x32xf32, #tpu.memory_space<vmem>>, vector<16x16x32xf32>
    %147 = vector.shape_cast %146 : vector<16x16x32xf32> to vector<256x32xf32>
    %148 = arith.truncf %147 : vector<256x32xf32> to vector<256x32xbf16>
    %c5_145 = arith.constant 5 : index
    %c0_146 = arith.constant 0 : index
    %c0_147 = arith.constant 0 : index
    %149 = vector.load %arg4[%c5_145, %c0_146, %c0_147] : memref<9x32x32xbf16, #tpu.memory_space<vmem>>, vector<1x32x32xbf16>
    %150 = vector.shape_cast %149 : vector<1x32x32xbf16> to vector<32x32xbf16>
    %cst_148 = arith.constant dense<0.000000e+00> : vector<256x32xf32>
    %151 = tpu.matmul %148, %150, %cst_148 {dimension_numbers = #tpu.dot_dimension_numbers<[1], [0], [0], [1], [0, 0, 1, 1], [], []>} : vector<256x32xbf16>, vector<32x32xbf16>, vector<256x32xf32> -> vector<256x32xf32>
    %152 = arith.addf %145, %151 : vector<256x32xf32>
    %c2_149 = arith.constant 2 : index
    %c0_150 = arith.constant 0 : index
    %c0_151 = arith.constant 0 : index
    %153 = vector.load %arg7[%c2_149, %c0_150, %c0_151] : memref<18x18x32xf32, #tpu.memory_space<vmem>>, vector<16x16x32xf32>
    %154 = vector.shape_cast %153 : vector<16x16x32xf32> to vector<256x32xf32>
    %155 = arith.truncf %154 : vector<256x32xf32> to vector<256x32xbf16>
    %c6_152 = arith.constant 6 : index
    %c0_153 = arith.constant 0 : index
    %c0_154 = arith.constant 0 : index
    %156 = vector.load %arg4[%c6_152, %c0_153, %c0_154] : memref<9x32x32xbf16, #tpu.memory_space<vmem>>, vector<1x32x32xbf16>
    %157 = vector.shape_cast %156 : vector<1x32x32xbf16> to vector<32x32xbf16>
    %cst_155 = arith.constant dense<0.000000e+00> : vector<256x32xf32>
    %158 = tpu.matmul %155, %157, %cst_155 {dimension_numbers = #tpu.dot_dimension_numbers<[1], [0], [0], [1], [0, 0, 1, 1], [], []>} : vector<256x32xbf16>, vector<32x32xbf16>, vector<256x32xf32> -> vector<256x32xf32>
    %159 = arith.addf %152, %158 : vector<256x32xf32>
    %c2_156 = arith.constant 2 : index
    %c1_157 = arith.constant 1 : index
    %c0_158 = arith.constant 0 : index
    %160 = vector.load %arg7[%c2_156, %c1_157, %c0_158] : memref<18x18x32xf32, #tpu.memory_space<vmem>>, vector<16x16x32xf32>
    %161 = vector.shape_cast %160 : vector<16x16x32xf32> to vector<256x32xf32>
    %162 = arith.truncf %161 : vector<256x32xf32> to vector<256x32xbf16>
    %c7_159 = arith.constant 7 : index
    %c0_160 = arith.constant 0 : index
    %c0_161 = arith.constant 0 : index
    %163 = vector.load %arg4[%c7_159, %c0_160, %c0_161] : memref<9x32x32xbf16, #tpu.memory_space<vmem>>, vector<1x32x32xbf16>
    %164 = vector.shape_cast %163 : vector<1x32x32xbf16> to vector<32x32xbf16>
    %cst_162 = arith.constant dense<0.000000e+00> : vector<256x32xf32>
    %165 = tpu.matmul %162, %164, %cst_162 {dimension_numbers = #tpu.dot_dimension_numbers<[1], [0], [0], [1], [0, 0, 1, 1], [], []>} : vector<256x32xbf16>, vector<32x32xbf16>, vector<256x32xf32> -> vector<256x32xf32>
    %166 = arith.addf %159, %165 : vector<256x32xf32>
    %c2_163 = arith.constant 2 : index
    %c2_164 = arith.constant 2 : index
    %c0_165 = arith.constant 0 : index
    %167 = vector.load %arg7[%c2_163, %c2_164, %c0_165] : memref<18x18x32xf32, #tpu.memory_space<vmem>>, vector<16x16x32xf32>
    %168 = vector.shape_cast %167 : vector<16x16x32xf32> to vector<256x32xf32>
    %169 = arith.truncf %168 : vector<256x32xf32> to vector<256x32xbf16>
    %c8_166 = arith.constant 8 : index
    %c0_167 = arith.constant 0 : index
    %c0_168 = arith.constant 0 : index
    %170 = vector.load %arg4[%c8_166, %c0_167, %c0_168] : memref<9x32x32xbf16, #tpu.memory_space<vmem>>, vector<1x32x32xbf16>
    %171 = vector.shape_cast %170 : vector<1x32x32xbf16> to vector<32x32xbf16>
    %cst_169 = arith.constant dense<0.000000e+00> : vector<256x32xf32>
    %172 = tpu.matmul %169, %171, %cst_169 {dimension_numbers = #tpu.dot_dimension_numbers<[1], [0], [0], [1], [0, 0, 1, 1], [], []>} : vector<256x32xbf16>, vector<32x32xbf16>, vector<256x32xf32> -> vector<256x32xf32>
    %173 = arith.addf %166, %172 : vector<256x32xf32>
    %c0_170 = arith.constant 0 : index
    %c0_171 = arith.constant 0 : index
    %174 = vector.load %arg5[%c0_170, %c0_171] : memref<1x32xf32, #tpu.memory_space<vmem>>, vector<1x32xf32>
    %175 = vector.broadcast %174 : vector<1x32xf32> to vector<256x32xf32>
    %176 = arith.addf %173, %175 : vector<256x32xf32>
    %cst_172 = arith.constant dense<0.000000e+00> : vector<32xf32>
    %177 = vector.multi_reduction <add>, %176, %cst_172 [0] : vector<256x32xf32> to vector<32xf32>
    %178 = vector.shape_cast %177 : vector<32xf32> to vector<1x32xf32>
    %cst_173 = arith.constant 2.560000e+02 : f32
    %179 = vector.broadcast %cst_173 : f32 to vector<1x32xf32>
    %180 = arith.divf %178, %179 : vector<1x32xf32>
    %181 = vector.broadcast %180 : vector<1x32xf32> to vector<256x32xf32>
    %182 = arith.subf %176, %181 : vector<256x32xf32>
    %183 = vector.broadcast %180 : vector<1x32xf32> to vector<256x32xf32>
    %184 = arith.subf %176, %183 : vector<256x32xf32>
    %185 = arith.mulf %182, %184 : vector<256x32xf32>
    %cst_174 = arith.constant dense<0.000000e+00> : vector<32xf32>
    %186 = vector.multi_reduction <add>, %185, %cst_174 [0] : vector<256x32xf32> to vector<32xf32>
    %187 = vector.shape_cast %186 : vector<32xf32> to vector<1x32xf32>
    %cst_175 = arith.constant 2.560000e+02 : f32
    %188 = vector.broadcast %cst_175 : f32 to vector<1x32xf32>
    %189 = arith.divf %187, %188 : vector<1x32xf32>
    %190 = vector.broadcast %180 : vector<1x32xf32> to vector<256x32xf32>
    %191 = arith.subf %176, %190 : vector<256x32xf32>
    %cst_176 = arith.constant 9.99999974E-6 : f32
    %192 = vector.broadcast %cst_176 : f32 to vector<1x32xf32>
    %193 = arith.addf %189, %192 : vector<1x32xf32>
    %194 = math.rsqrt %193 : vector<1x32xf32>
    %195 = vector.broadcast %194 : vector<1x32xf32> to vector<256x32xf32>
    %196 = arith.mulf %191, %195 : vector<256x32xf32>
    %197 = vector.shape_cast %196 : vector<256x32xf32> to vector<16x16x32xf32>
    %198 = arith.addf %1, %197 : vector<16x16x32xf32>
    %c0_177 = arith.constant 0 : index
    %c0_178 = arith.constant 0 : index
    %c0_179 = arith.constant 0 : index
    %c0_180 = arith.constant 0 : index
    %199 = vector.load %arg6[%c0_177, %c0_178, %c0_179, %c0_180] : memref<1x16x16x32xf32, #tpu.memory_space<vmem>>, vector<1x16x16x32xf32>
    %200 = vector.shape_cast %199 : vector<1x16x16x32xf32> to vector<16x16x32xf32>
    %201 = vector.shape_cast %198 : vector<16x16x32xf32> to vector<1x16x16x32xf32>
    tpu.vector_store %arg6[%c0_177, %c0_178, %c0_179, %c0_180], %201 {strides = array<i32>} : memref<1x16x16x32xf32, #tpu.memory_space<vmem>>, vector<1x16x16x32xf32>,
    return
  }
  func.func @transform_0(%arg0: i32) -> (i32, i32, i32, i32) {
    %c0_i32 = arith.constant 0 : i32
    %c0_i32_0 = arith.constant 0 : i32
    %c0_i32_1 = arith.constant 0 : i32
    %c0_i32_2 = arith.constant 0 : i32
    return %arg0, %c0_i32, %c0_i32_0, %c0_i32_1 : i32, i32, i32, i32
  }
  func.func @transform_1(%arg0: i32) -> (i32, i32, i32) {
    %c0_i32 = arith.constant 0 : i32
    %c0_i32_0 = arith.constant 0 : i32
    %c0_i32_1 = arith.constant 0 : i32
    %c0_i32_2 = arith.constant 0 : i32
    return %c0_i32, %c0_i32_0, %c0_i32_1 : i32, i32, i32
  }
  func.func @transform_2(%arg0: i32) -> (i32, i32) {
    %c0_i32 = arith.constant 0 : i32
    %c0_i32_0 = arith.constant 0 : i32
    %c0_i32_1 = arith.constant 0 : i32
    return %c0_i32, %c0_i32_0 : i32, i32
  }
  func.func @transform_3(%arg0: i32) -> (i32, i32, i32) {
    %c0_i32 = arith.constant 0 : i32
    %c0_i32_0 = arith.constant 0 : i32
    %c0_i32_1 = arith.constant 0 : i32
    %c0_i32_2 = arith.constant 0 : i32
    return %c0_i32, %c0_i32_0, %c0_i32_1 : i32, i32, i32
  }
  func.func @transform_4(%arg0: i32) -> (i32, i32) {
    %c0_i32 = arith.constant 0 : i32
    %c0_i32_0 = arith.constant 0 : i32
    %c0_i32_1 = arith.constant 0 : i32
    return %c0_i32, %c0_i32_0 : i32, i32
  }
  func.func @transform_5(%arg0: i32) -> (i32, i32, i32, i32) {
    %c0_i32 = arith.constant 0 : i32
    %c0_i32_0 = arith.constant 0 : i32
    %c0_i32_1 = arith.constant 0 : i32
    %c0_i32_2 = arith.constant 0 : i32
    return %arg0, %c0_i32, %c0_i32_0, %c0_i32_1 : i32, i32, i32, i32
  }
}

</mosaic_0001>

<bundles_post_ra>
// kernel: resnet_block.1
= control target key start
LH: loop header
LB: loop body
LE: loop exit
PB: predicated region body
PF: predicated region fallthrough
CT: control target
= control target key end

     0   :  { %10 = vsyncpa [#allocation4], 0  ;;  %s11267_s0 = inlined_call_operand.vmem [shape: f32[2,16,16,32], index: 0, kind: input, shape index: {}]   ;;  %s11268_s1 = inlined_call_operand.vmem [shape: bf16[9,32,32], index: 1, kind: input, shape index: {}]   ;;  %s11269_s2 = inlined_call_operand.vmem [shape: f32[1,32], index: 2, kind: input, shape index: {}]   ;;  %s11270_s3 = inlined_call_operand.vmem [shape: bf16[9,32,32], index: 3, kind: input, shape index: {}]   ;;  %s11271_s4 = inlined_call_operand.vmem [shape: f32[1,32], index: 4, kind: input, shape index: {}]   ;;  %s11272_s5 = inlined_call_operand.hbm [shape: f32[2,16,16,32], index: 5, kind: output, shape index: {}]  }
   0x1   :  { %12 = vsyncpa [#allocation4 + $0x1], 0  ;;  %s8134_s18 = smov 0   ;;  %s8136_s19 = smov 0  }
   0x2   :  { %s8138_s20 = smov 0   ;;  %s8140_s21 = smov 0  }
   0x3 LB: > { %s8155_s22 = sadd.s32 4294967295, %s8099_s21   ;;  %s6582_s23 = sadd.s32 4294967294, %s8099_s21   ;;  %s8099_s21 = sphi %s8140_s21, %s11528_s21   ;;  %s8095_s20 = sphi %s8138_s20, %s11527_s20   ;;  %s8091_s19 = sphi %s8136_s19, %s11526_s19   ;;  %s8087_s18 = sphi %s8134_s18, %s11525_s18  }
   0x4   : > { %s8159_s24 = sadd.s32 1, %s8099_s21   ;;  %s135_s25 = sadd.s32 1, %s8095_s20 }
   0x5   : > { %s132_s26 = ssub.s32 %s8099_s21, %s8159_s24  ;;  %p145_p0 = scmp.ne.s32.totalorder %s8095_s20, %s8091_s19 }
   0x6   : > { %p133_p1 = scmp.eq.s32.totalorder %s132_s26, 0  ;;  %p146_p2 = scmp.eq.s32.totalorder %s8155_s22, 1 }
   0x7   : > { %p151_p3 = scmp.ne.s32.totalorder %s8091_s19, %s8087_s18  ;;  %p152_p4 = scmp.eq.s32.totalorder %s6582_s23, 1 }
   0x8   : > { %s8170_s27 = scalar_select %p133_p1, %s8095_s20, %s135_s25  }
   0x9   : > { %p8172_p5 = por %p146_p2, %p145_p0  ;;  %p8176_p6 = por %p152_p4, %p151_p3 }
   0xa   : > { %p6585_p7 = scmp.ge.s32.totalorder %s8099_s21, 1  ;;  %p190_p8 = scmp.lt.s32.totalorder %s8099_s21, 3 }
   0xc   : > { %p191_p9 = pnand %p6585_p7, %p190_p8 }
   0xe   : > { %194 = sbr.rel (%p191_p9) target bundleno = 1388 (0x56c), region = 40 }
  0x13   : > { %v7999_v0 = vld [vmem:[%s11268_s1 + $0x18] sm:$0xff]   ;;  %p218_p10 = scmp.lt.s32.totalorder %s8155_s22, 1  ;;  %v8000_v1 = vld [vmem:[%s11268_s1 + $0x10] sm:$0xff]   ;;  %v8193_v2 = vld [vmem:[%s11268_s1 + $0x28] sm:$0xff]   ;;  %vm257_vm0 = vcmask 261120   ;;  %vm313_vm1 = vcmask 253952  }
  0x14   : > { %7310 = vmatprep.subr.bf16.mxu0 %v7999_v0  ;;  %v8002_v3 = vld [vmem:[%s11268_s1 + $0x8] sm:$0xff]   ;;  %v8003_v4 = vld [vmem:[%s11268_s1] sm:$0xff]   ;;  %s215_s6 = sand.u32 1, %s8091_s19   ;;  %s8101_s15 = smov [#allocation3]  }
  0x15   : > { %s219_s9 = scalar_select %p218_p10, %s8155_s22, 1  ;;  %7311 = vmatpush3.bf16.msra.mxu0 %v7999_v0  ;;  %7346 = vmatprep.subr.bf16.mxu1 %v8002_v3  ;;  %v8004_v39 = vld [vmem:[%s11268_s1 + $0x20] sm:$0xff]  }
  0x16   : > { %7312 = vmatprep.subr.bf16.mxu0 %v8000_v1  ;;  %7347 = vmatpush3.bf16.msra.mxu1 %v8002_v3  ;;  %s6586_s7 = sshll.u32 %s215_s6, 8  ;;  %s11227_s13 = scalar_lea.sflag [#allocation4], %s215_s6 }
  0x17   : > { %s6984_s14 = sshll.u32 %s219_s9, 8  ;;  %7348 = vmatprep.subr.bf16.mxu1 %v8003_v4  ;;  %s11102_s8 = scalar_lea.vmem [#allocation3], %s6586_s7 }
  0x18   : > { %s8204_s25 = scalar_lea.vmem %s11267_s0, %s6984_s14  ;;  %s6985_s9 = sshll.u32 %s8155_s22, 12 }
  0x19   : > { %v8207_v5 = vld [vmem:[%s8204_s25 + $0x10] sm:$0xff]  ;;  %v8210_v6 = vld [vmem:[%s8204_s25 + $0x18] sm:$0xff]  ;;  %v8213_v7 = vld [vmem:[%s8204_s25] sm:$0xff]  ;;  %7313 = vmatpush3.bf16.msra.mxu0 %v8000_v1  ;;  %s6520_s10 = sshll.u32 %s11102_s8, 4  ;;  %s11193_s12 = scalar_lea.hbm %s11272_s5, %s6985_s9  ;;  %s11195_s10 = int_to_ptr.vmem [resolvable:$true] %s6520_s10 }
  0x1a   : > { %11307 = vst [vmem:[#allocation6_spill] sm:$0xff] %v8207_v5  ;;  %11308 = vst [vmem:[#allocation7_spill] sm:$0xff] %v8210_v6  ;;  %v8224_v8 = vld [vmem:[%s8204_s25 + $0x8] sm:$0xff]  ;;  %v8229_v9 = vld [vmem:[%s8204_s25 + $0x20] sm:$0xff]  ;;  %7382 = vmatprep.subr.bf16.mxu0 %v8193_v2  ;;  %7349 = vmatpush3.bf16.msra.mxu1 %v8003_v4  ;;  %s8039_s14 = scalar_lea.vmem %s11195_s10, 4096  ;;  %s8043_s16 = sshll.u32 %s8101_s15, 4  ;;  %s8044_s16 = int_to_ptr.vmem [resolvable:$false] %s8043_s16 }
  0x1b   : > { %11309 = vst [vmem:[#allocation8_spill] sm:$0xff] %v8213_v7  ;;  %260 = vst.msk [vmem:[#allocation2 + $0x31] sm:$0xff] %vm257_vm0, %v8207_v5  ;;  %v8232_v10 = vld [vmem:[%s8204_s25 + $0x28] sm:$0xff]  ;;  %v8242_v11 = vld [vmem:[%s8204_s25 + $0x30] sm:$0xff]  ;;  %p8040_p11 = scmp.ne.s32.totalorder %s11195_s10, %s8039_s14  ;;  %s8045_s17 = scalar_lea.vmem %s8044_s16, 8192 }
  0x1c   : > { %261 = vst.msk [vmem:[#allocation2 + $0x39] sm:$0xff] %vm257_vm0, %v8210_v6  ;;  %290 = vst.msk [vmem:[#allocation2 + $0x1] sm:$0xff] %vm257_vm0, %v8207_v5  ;;  %v8245_v12 = vld [vmem:[%s8204_s25 + $0x38] sm:$0xff]  ;;  %v8248_v13 = vld [vmem:[%s8204_s25 + $0x40] sm:$0xff]  ;;  %p8046_p0 = scmp.lt.s32.totalorder %s11195_s10, %s8044_s16  ;;  %p8047_p1 = scmp.lt.s32.totalorder %s8045_s17, %s8039_s14 }
  0x1d   : > { %291 = vst.msk [vmem:[#allocation2 + $0x9] sm:$0xff] %vm257_vm0, %v8210_v6  ;;  %11310 = vst [vmem:[#allocation9_spill] sm:$0xff] %v8224_v8  ;;  %v8255_v14 = vld [vmem:[%s8204_s25 + $0x48] sm:$0xff]  ;;  %v8260_v15 = vld [vmem:[%s8204_s25 + $0x50] sm:$0xff]  ;;  %p8041_p12 = pnand %p8040_p11, %p8172_p5 }
  0x1e   : > { %258 = vst.msk [vmem:[#allocation2 + $0x19] sm:$0xff] %vm257_vm0, %v8213_v7  ;;  %11311 = vst [vmem:[#allocation10_spill] sm:$0xff] %v8229_v9  ;;  %v8263_v16 = vld [vmem:[%s8204_s25 + $0x58] sm:$0xff]  ;;  %v8272_v17 = vld [vmem:[%s8204_s25 + $0x60] sm:$0xff]  ;;  %p8048_p2 = por %p8047_p1, %p8046_p0 }
  0x1f   : > { %11312 = vst [vmem:[#allocation11_spill] sm:$0xff] %v8232_v10  ;;  %259 = vst.msk [vmem:[#allocation2 + $0x21] sm:$0xff] %vm257_vm0, %v8224_v8  ;;  %v8275_v18 = vld [vmem:[%s8204_s25 + $0x68] sm:$0xff]  ;;  %v8278_v19 = vld [vmem:[%s8204_s25 + $0x70] sm:$0xff]  ;;  %p8042_p13 = pneg %p8041_p12 }
  0x20   : > { %262 = vst.msk [vmem:[#allocation2 + $0x49] sm:$0xff] %vm257_vm0, %v8229_v9  ;;  %263 = vst.msk [vmem:[#allocation2 + $0x51] sm:$0xff] %vm257_vm0, %v8232_v10  ;;  %v8285_v20 = vld [vmem:[%s8204_s25 + $0x78] sm:$0xff]  ;;  %v8290_v21 = vld [vmem:[%s8204_s25 + $0x80] sm:$0xff] }
  0x21   : > { %11313 = vst [vmem:[#allocation12_spill] sm:$0xff] %v8242_v11  ;;  %11314 = vst [vmem:[#allocation13_spill] sm:$0xff] %v8245_v12  ;;  %v8293_v22 = vld [vmem:[%s8204_s25 + $0x88] sm:$0xff]  ;;  %v8302_v23 = vld [vmem:[%s8204_s25 + $0x90] sm:$0xff]  ;;  %p8049_p3 = pnand %p8048_p2, %p8042_p13 }
  0x22   : > { %11315 = vst [vmem:[#allocation14_spill] sm:$0xff] %v8248_v13  ;;  %264 = vst.msk [vmem:[#allocation2 + $0x61] sm:$0xff] %vm257_vm0, %v8242_v11  ;;  %v8305_v24 = vld [vmem:[%s8204_s25 + $0x98] sm:$0xff]  ;;  %v8308_v25 = vld [vmem:[%s8204_s25 + $0xa0] sm:$0xff] }
  0x23   : > { %265 = vst.msk [vmem:[#allocation2 + $0x69] sm:$0xff] %vm257_vm0, %v8245_v12  ;;  %11316 = vst [vmem:[#allocation15_spill] sm:$0xff] %v8255_v14  ;;  %v8315_v26 = vld [vmem:[%s8204_s25 + $0xa8] sm:$0xff]  ;;  %v8320_v27 = vld [vmem:[%s8204_s25 + $0xb0] sm:$0xff] }
  0x24   : > { %266 = vst.msk [vmem:[#allocation2 + $0x79] sm:$0xff] %vm257_vm0, %v8248_v13  ;;  %11317 = vst [vmem:[#allocation16_spill] sm:$0xff] %v8260_v15  ;;  %v8323_v28 = vld [vmem:[%s8204_s25 + $0xb8] sm:$0xff]  ;;  %v420_v29 = vld [vmem:[#allocation2 + $0x1] sm:$0xff] }
  0x25   : > { %11318 = vst [vmem:[#allocation17_spill] sm:$0xff] %v8263_v16  ;;  %267 = vst.msk [vmem:[#allocation2 + $0x81] sm:$0xff] %vm257_vm0, %v8255_v14  ;;  %v421_v30 = vld [vmem:[#allocation2 + $0x9] sm:$0xff]  ;;  %v422_v31 = vld [vmem:[#allocation2 + $0x19] sm:$0xff] }
  0x26   : > { %268 = vst.msk [vmem:[#allocation2 + $0x91] sm:$0xff] %vm257_vm0, %v8260_v15  ;;  %269 = vst.msk [vmem:[#allocation2 + $0x99] sm:$0xff] %vm257_vm0, %v8263_v16  ;;  %v452_v32 = vpack.c.bf16 %v421_v30, %v420_v29  ;;  %v423_v33 = vld [vmem:[#allocation2 + $0x21] sm:$0xff]  ;;  %v424_v34 = vld [vmem:[#allocation2 + $0x31] sm:$0xff] }
  0x27   : > { %11319 = vst [vmem:[#allocation18_spill] sm:$0xff] %v8272_v17  ;;  %11320 = vst [vmem:[#allocation19_spill] sm:$0xff] %v8275_v18  ;;  %v425_v35 = vld [vmem:[#allocation2 + $0x39] sm:$0xff]  ;;  %v8331_v36 = vpack.c.bf16 %v423_v33, %v422_v31  ;;  %v295_v38 = vld [vmem:[#allocation2 + $0x2] sm:$0x1] }
  0x28   : > { %11321 = vst [vmem:[#allocation20_spill] sm:$0xff] %v8278_v19  ;;  %270 = vst.msk [vmem:[#allocation2 + $0xa9] sm:$0xff] %vm257_vm0, %v8272_v17  ;;  %v8333_v37 = vpack.c.bf16 %v425_v35, %v424_v34  ;;  %7314 = vmatprep.mubr.msk.bf16.mxu0 %vm257_vm0, %v452_v32  ;;  %v296_v40 = vld [vmem:[#allocation2 + $0x1a] sm:$0x1]  ;;  %v297_v41 = vld [vmem:[#allocation2 + $0x32] sm:$0x1] }
  0x29   : > { %271 = vst.msk [vmem:[#allocation2 + $0xb1] sm:$0xff] %vm257_vm0, %v8275_v18  ;;  %11322 = vst [vmem:[#allocation21_spill] sm:$0xff] %v8285_v20  ;;  %7315 = vmatmul.mubr.msk.bf16.vlgmr.msra.gmra.mxu0 %vm257_vm0, %v8331_v36  ;;  %v426_v42 = vld [vmem:[#allocation2 + $0x49] sm:$0xff]  ;;  %v427_v43 = vld [vmem:[#allocation2 + $0x51] sm:$0xff] }
  0x2a   : > { %272 = vst.msk [vmem:[#allocation2 + $0xc1] sm:$0xff] %vm257_vm0, %v8278_v19  ;;  %11323 = vst [vmem:[#allocation22_spill] sm:$0xff] %v8290_v21  ;;  %7383 = vmatpush3.bf16.msra.mxu0 %v8193_v2  ;;  %7318 = vmatprep.mubr.msk.bf16.mxu0 %vm257_vm0, %v8333_v37  ;;  %v428_v44 = vld [vmem:[#allocation2 + $0x61] sm:$0xff]  ;;  %v429_v45 = vld [vmem:[#allocation2 + $0x69] sm:$0xff]  ;;  %v8348_v49 = vpack.c.bf16 %v427_v43, %v426_v42 }
  0x2b   : > { %11324 = vst [vmem:[#allocation23_spill] sm:$0xff] %v8293_v22  ;;  %273 = vst.msk [vmem:[#allocation2 + $0xc9] sm:$0xff] %vm257_vm0, %v8285_v20  ;;  %v298_v46 = vld [vmem:[#allocation2 + $0x4a] sm:$0x1]  ;;  %7384 = vmatprep.subr.bf16.mxu0 %v8004_v39  ;;  %v299_v47 = vld [vmem:[#allocation2 + $0x62] sm:$0x1]  ;;  %v8351_v52 = vpack.c.bf16 %v429_v45, %v428_v44 }
  0x2c   : > { %274 = vst.msk [vmem:[#allocation2 + $0xd9] sm:$0xff] %vm257_vm0, %v8290_v21  ;;  %275 = vst.msk [vmem:[#allocation2 + $0xe1] sm:$0xff] %vm257_vm0, %v8293_v22  ;;  %v369_v48 = vld [vmem:[#allocation2 + $0x8] sm:$0xff]  ;;  %v300_v50 = vld [vmem:[#allocation2 + $0x7a] sm:$0x1] }
  0x2d   : > { %11325 = vst [vmem:[#allocation24_spill] sm:$0xff] %v8302_v23  ;;  %11326 = vst [vmem:[#allocation25_spill] sm:$0xff] %v8305_v24  ;;  %v371_v51 = vld [vmem:[#allocation2 + $0x20] sm:$0xff]  ;;  %v373_v54 = vld [vmem:[#allocation2 + $0x38] sm:$0xff] }
  0x2e   : > { %11327 = vst [vmem:[#allocation26_spill] sm:$0xff] %v8308_v25  ;;  %276 = vst.msk [vmem:[#allocation2 + $0xf1] sm:$0xff] %vm257_vm0, %v8302_v23  ;;  %7385 = vmatpush3.bf16.msra.mxu0 %v8004_v39  ;;  %v301_v55 = vld [vmem:[#allocation2 + $0x92] sm:$0x1]  ;;  %v430_v62 = vld [vmem:[#allocation2 + $0x79] sm:$0xff] }
  0x2f   : > { %277 = vst.msk [vmem:[#allocation2 + $0xf9] sm:$0xff] %vm257_vm0, %v8305_v24  ;;  %11328 = vst [vmem:[#allocation27_spill] sm:$0xff] %v8315_v26  ;;  %v302_v60 = vld [vmem:[#allocation2 + $0xaa] sm:$0x1]  ;;  %v431_v63 = vld [vmem:[#allocation2 + $0x81] sm:$0xff] }
  0x30   : > { %278 = vst.msk [vmem:[#allocation2 + $0x109] sm:$0xff] %vm257_vm0, %v8308_v25  ;;  %11329 = vst [vmem:[#allocation28_spill] sm:$0xff] %v8320_v27  ;;  %v432_v1 = vld [vmem:[#allocation2 + $0x91] sm:$0xff]  ;;  %v433_v2 = vld [vmem:[#allocation2 + $0x99] sm:$0xff]  ;;  %v8370_v30 = vpack.c.bf16 %v431_v63, %v430_v62 }
  0x31   : > { %11330 = vst [vmem:[#allocation29_spill] sm:$0xff] %v8323_v28  ;;  %279 = vst.msk [vmem:[#allocation2 + $0x111] sm:$0xff] %vm257_vm0, %v8315_v26  ;;  %7319 = vmatmul.mubr.msk.bf16.gmra.mxu0 %vm257_vm0, %v8348_v49  ;;  %v303_v0 = vld [vmem:[#allocation2 + $0xc2] sm:$0x1]  ;;  %v375_v4 = vld [vmem:[#allocation2 + $0x50] sm:$0xff]  ;;  %v8373_v33 = vpack.c.bf16 %v433_v2, %v432_v1 }
  0x32   : > { %280 = vst.msk [vmem:[#allocation2 + $0x121] sm:$0xff] %vm257_vm0, %v8320_v27  ;;  %281 = vst.msk [vmem:[#allocation2 + $0x129] sm:$0xff] %vm257_vm0, %v8323_v28  ;;  %7322 = vmatprep.mubr.msk.bf16.mxu0 %vm257_vm0, %v8351_v52  ;;  %v377_v32 = vld [vmem:[#allocation2 + $0x68] sm:$0xff]  ;;  %v8391_v43 = vld [vmem:[%s8204_s25 + $0xd0] sm:$0xff] }
  0x33   : > { %314 = vst.msk [vmem:[#allocation2] sm:$0x1] %vm313_vm1, %v295_v38  ;;  %315 = vst.msk [vmem:[#allocation2 + $0x18] sm:$0x1] %vm313_vm1, %v296_v40  ;;  %v304_v29 = vld [vmem:[#allocation2 + $0xda] sm:$0x1] }
  0x34   : > { %316 = vst.msk [vmem:[#allocation2 + $0x30] sm:$0x1] %vm313_vm1, %v297_v41  ;;  %317 = vst.msk [vmem:[#allocation2 + $0x48] sm:$0x1] %vm313_vm1, %v298_v46  ;;  %v8379_v38 = vld [vmem:[%s8204_s25 + $0xc0] sm:$0xff]  ;;  %v8382_v39 = vld [vmem:[%s8204_s25 + $0xc8] sm:$0xff] }
  0x35   : > { %318 = vst.msk [vmem:[#allocation2 + $0x60] sm:$0x1] %vm313_vm1, %v299_v47  ;;  %319 = vst.msk [vmem:[#allocation2 + $0x78] sm:$0x1] %vm313_vm1, %v300_v50  ;;  %v305_v34 = vld [vmem:[#allocation2 + $0xf2] sm:$0x1] }
  0x36   : > { %320 = vst.msk [vmem:[#allocation2 + $0x90] sm:$0x1] %vm313_vm1, %v301_v55  ;;  %321 = vst.msk [vmem:[#allocation2 + $0xa8] sm:$0x1] %vm313_vm1, %v302_v60  ;;  %v434_v41 = vld [vmem:[#allocation2 + $0xa9] sm:$0xff]  ;;  %v435_v44 = vld [vmem:[#allocation2 + $0xb1] sm:$0xff] }
  0x37   : > { %322 = vst.msk [vmem:[#allocation2 + $0xc0] sm:$0x1] %vm313_vm1, %v303_v0  ;;  %323 = vst.msk [vmem:[#allocation2 + $0xd8] sm:$0x1] %vm313_vm1, %v304_v29  ;;  %v306_v42 = vld [vmem:[#allocation2 + $0x10a] sm:$0x1] }
  0x38   : > { %324 = vst.msk [vmem:[#allocation2 + $0xf0] sm:$0x1] %vm313_vm1, %v305_v34  ;;  %11331 = vst [vmem:[#allocation30_spill] sm:$0xff] %v8379_v38  ;;  %v8397_v45 = vld [vmem:[%s8204_s25 + $0xd8] sm:$0xff]  ;;  %v379_v47 = vld [vmem:[#allocation2 + $0x80] sm:$0xff] }
  0x39   : > { %11332 = vst [vmem:[#allocation31_spill] sm:$0xff] %v8382_v39  ;;  %282 = vst.msk [vmem:[#allocation2 + $0x139] sm:$0xff] %vm257_vm0, %v8379_v38  ;;  %7323 = vmatmul.mubr.msk.bf16.gmra.mxu0 %vm257_vm0, %v8370_v30  ;;  %v307_v46 = vld [vmem:[#allocation2 + $0x122] sm:$0x1]  ;;  %v437_v50 = vld [vmem:[#allocation2 + $0xc9] sm:$0xff] }
  0x3a   : > { %v368_v53 = vld [vmem:[#allocation2] sm:$0xff]  ;;  %v370_v57 = vld [vmem:[#allocation2 + $0x18] sm:$0xff]  ;;  %283 = vst.msk [vmem:[#allocation2 + $0x141] sm:$0xff] %vm257_vm0, %v8382_v39  ;;  %11333 = vst [vmem:[#allocation32_spill] sm:$0xff] %v8391_v43  ;;  %7326 = vmatprep.mubr.msk.bf16.mxu0 %vm257_vm0, %v8373_v33 }
  0x3b   : > { %v400_v56 = vpack.c.bf16 %v369_v48, %v368_v53  ;;  %v8357_v58 = vpack.c.bf16 %v371_v51, %v370_v57  ;;  %v372_v59 = vld [vmem:[#allocation2 + $0x30] sm:$0xff]  ;;  %v374_v3 = vld [vmem:[#allocation2 + $0x48] sm:$0xff]  ;;  %325 = vst.msk [vmem:[#allocation2 + $0x108] sm:$0x1] %vm313_vm1, %v306_v42  ;;  %11334 = vst [vmem:[#allocation33_spill] sm:$0xff] %v8397_v45 }
  0x3c   : > { %v8362_v61 = vpack.c.bf16 %v373_v54, %v372_v59  ;;  %v376_v31 = vld [vmem:[#allocation2 + $0x60] sm:$0xff]  ;;  %v8375_v35 = vpack.c.bf16 %v375_v4, %v374_v3  ;;  %284 = vst.msk [vmem:[#allocation2 + $0x151] sm:$0xff] %vm257_vm0, %v8391_v43  ;;  %285 = vst.msk [vmem:[#allocation2 + $0x159] sm:$0xff] %vm257_vm0, %v8397_v45  ;;  %v381_v53 = vld [vmem:[#allocation2 + $0x98] sm:$0xff]  ;;  %v8427_v59 = vpack.c.bf16 %v435_v44, %v434_v41 }
  0x3d   : > { %7350 = vmatprep.mubr.msk.bf16.mxu1 %vm257_vm0, %v400_v56  ;;  %v8384_v40 = vpack.c.bf16 %v377_v32, %v376_v31  ;;  %v436_v48 = vld [vmem:[#allocation2 + $0xc1] sm:$0xff]  ;;  %326 = vst.msk [vmem:[#allocation2 + $0x120] sm:$0x1] %vm313_vm1, %v307_v46  ;;  %v378_v55 = vld [vmem:[#allocation2 + $0x78] sm:$0xff]  ;;  %v332_v57 = vld [vmem:[#allocation2 + $0xf] sm:$0x1] }
  0x3e   : > { %7351 = vmatmul.mubr.msk.bf16.vlgmr.msra.gmra.mxu1 %vm257_vm0, %v8357_v58  ;;  %v8407_v51 = vld [vmem:[%s8204_s25 + $0xe0] sm:$0xff]  ;;  %v8412_v54 = vld [vmem:[%s8204_s25 + $0xe8] sm:$0xff]  ;;  %v8005_v56 = vld [vmem:[%s11268_s1 + $0x38] sm:$0xff]   ;;  %350 = vst.msk [vmem:[#allocation2 + $0x11] sm:$0x1] %vm313_vm1, %v332_v57  ;;  %v8430_v62 = vpack.c.bf16 %v437_v50, %v436_v48  ;;  %v8437_v1 = vpack.c.bf16 %v379_v47, %v378_v55 }
  0x3f   : > { %7354 = vmatprep.mubr.msk.bf16.mxu1 %vm257_vm0, %v8362_v61  ;;  %11335 = vst [vmem:[#allocation34_spill] sm:$0xff] %v8407_v51  ;;  %11336 = vst [vmem:[#allocation35_spill] sm:$0xff] %v8412_v54  ;;  %v380_v60 = vld [vmem:[#allocation2 + $0x90] sm:$0xff]  ;;  %7418 = vmatprep.subr.bf16.mxu1 %v8005_v56  ;;  %v8435_v63 = vld [vmem:[%s11268_s1 + $0x48] sm:$0xff]  }
  0x40   : > { %286 = vst.msk [vmem:[#allocation2 + $0x169] sm:$0xff] %vm257_vm0, %v8407_v51  ;;  %293 = vst.msk [vmem:[#allocation2 + $0x199] sm:$0xff] %vm257_vm0, %v8407_v51  ;;  %v333_v0 = vld [vmem:[#allocation2 + $0x27] sm:$0x1]  ;;  %v308_v2 = vld [vmem:[#allocation2 + $0x13a] sm:$0x1]  ;;  %7419 = vmatpush3.bf16.msra.mxu1 %v8005_v56  ;;  %v8440_v3 = vpack.c.bf16 %v381_v53, %v380_v60  ;;  %7454 = vmatprep.subr.bf16.mxu0 %v8435_v63 }
  0x41   : > { %287 = vst.msk [vmem:[#allocation2 + $0x171] sm:$0xff] %vm257_vm0, %v8412_v54  ;;  %294 = vst.msk [vmem:[#allocation2 + $0x1a1] sm:$0xff] %vm257_vm0, %v8412_v54  ;;  %7327 = vmatmul.mubr.msk.bf16.gmra.mxu0 %vm257_vm0, %v8427_v59  ;;  %v438_v4 = vld [vmem:[#allocation2 + $0xd9] sm:$0xff]  ;;  %v439_v31 = vld [vmem:[#allocation2 + $0xe1] sm:$0xff] }
  0x42   : > { %351 = vst.msk [vmem:[#allocation2 + $0x29] sm:$0x1] %vm313_vm1, %v333_v0  ;;  %327 = vst.msk [vmem:[#allocation2 + $0x138] sm:$0x1] %vm313_vm1, %v308_v2  ;;  %7330 = vmatprep.mubr.msk.bf16.mxu0 %vm257_vm0, %v8430_v62  ;;  %v383_v32 = vld [vmem:[#allocation2 + $0xb0] sm:$0xff]  ;;  %v441_v42 = vld [vmem:[#allocation2 + $0xf9] sm:$0xff]  ;;  %v8454_v47 = vpack.c.bf16 %v439_v31, %v438_v4 }
  0x43   : > { %v309_v29 = vld [vmem:[#allocation2 + $0x152] sm:$0x1]  ;;  %v385_v44 = vld [vmem:[#allocation2 + $0xc8] sm:$0xff]  ;;  %v384_v48 = vld [vmem:[#allocation2 + $0xc0] sm:$0xff] }
  0x44   : > { %328 = vst.msk [vmem:[#allocation2 + $0x150] sm:$0x1] %vm313_vm1, %v309_v29  ;;  %v440_v41 = vld [vmem:[#allocation2 + $0xf1] sm:$0xff]  ;;  %v382_v46 = vld [vmem:[#allocation2 + $0xa8] sm:$0xff]  ;;  %v334_v53 = vld [vmem:[#allocation2 + $0x3f] sm:$0x1]  ;;  %v8465_v0 = vpack.c.bf16 %v385_v44, %v384_v48 }
  0x45   : > { %v8007_v50 = vld [vmem:[%s11268_s1 + $0x30] sm:$0xff]   ;;  %v8459_v55 = vpack.c.bf16 %v441_v42, %v440_v41  ;;  %352 = vst.msk [vmem:[#allocation2 + $0x41] sm:$0x1] %vm313_vm1, %v334_v53  ;;  %v8462_v57 = vpack.c.bf16 %v383_v32, %v382_v46  ;;  %v336_v60 = vld [vmem:[#allocation2 + $0x6f] sm:$0x1]  ;;  %v386_v44 = vld [vmem:[#allocation2 + $0xd8] sm:$0xff] }
  0x46   : > { %7355 = vmatmul.mubr.msk.bf16.gmra.mxu1 %vm257_vm0, %v8375_v35  ;;  %v335_v56 = vld [vmem:[#allocation2 + $0x57] sm:$0x1]  ;;  %7420 = vmatprep.subr.bf16.mxu1 %v8007_v50  ;;  %354 = vst.msk [vmem:[#allocation2 + $0x71] sm:$0x1] %vm313_vm1, %v336_v60  ;;  %v337_v2 = vld [vmem:[#allocation2 + $0x87] sm:$0x1] }
  0x47   : > { %7358 = vmatprep.mubr.msk.bf16.mxu1 %vm257_vm0, %v8384_v40  ;;  %v310_v34 = vld [vmem:[#allocation2 + $0x16a] sm:$0x1]  ;;  %353 = vst.msk [vmem:[#allocation2 + $0x59] sm:$0x1] %vm313_vm1, %v335_v56  ;;  %7421 = vmatpush3.bf16.msra.mxu1 %v8007_v50  ;;  %v338_v4 = vld [vmem:[#allocation2 + $0x9f] sm:$0x1] }
  0x48   : > { %329 = vst.msk [vmem:[#allocation2 + $0x168] sm:$0x1] %vm313_vm1, %v310_v34  ;;  %v442_v29 = vld [vmem:[#allocation2 + $0x109] sm:$0xff]  ;;  %355 = vst.msk [vmem:[#allocation2 + $0x89] sm:$0x1] %vm313_vm1, %v337_v2  ;;  %v443_v32 = vld [vmem:[#allocation2 + $0x111] sm:$0xff] }
  0x49   : > { %7331 = vmatmul.mubr.msk.bf16.gmra.mxu0 %vm257_vm0, %v8454_v47  ;;  %356 = vst.msk [vmem:[#allocation2 + $0xa1] sm:$0x1] %vm313_vm1, %v338_v4  ;;  %v339_v31 = vld [vmem:[#allocation2 + $0xb7] sm:$0x1]  ;;  %v444_v34 = vld [vmem:[#allocation2 + $0x121] sm:$0xff]  ;;  %v445_v42 = vld [vmem:[#allocation2 + $0x129] sm:$0xff]  ;;  %v8480_v50 = vpack.c.bf16 %v443_v32, %v442_v29 }
  0x4a   : > { %7334 = vmatprep.mubr.msk.bf16.mxu0 %vm257_vm0, %v8459_v55  ;;  %357 = vst.msk [vmem:[#allocation2 + $0xb9] sm:$0x1] %vm313_vm1, %v339_v31  ;;  %v340_v41 = vld [vmem:[#allocation2 + $0xcf] sm:$0x1]  ;;  %v387_v46 = vld [vmem:[#allocation2 + $0xe0] sm:$0xff]  ;;  %v388_v53 = vld [vmem:[#allocation2 + $0xf0] sm:$0xff]  ;;  %v8483_v2 = vpack.c.bf16 %v445_v42, %v444_v34 }
  0x4b   : > { %358 = vst.msk [vmem:[#allocation2 + $0xd1] sm:$0x1] %vm313_vm1, %v340_v41  ;;  %v341_v48 = vld [vmem:[#allocation2 + $0xe7] sm:$0x1]  ;;  %v389_v56 = vld [vmem:[#allocation2 + $0xf8] sm:$0xff]  ;;  %v8486_v31 = vpack.c.bf16 %v387_v46, %v386_v44  ;;  %v391_v44 = vld [vmem:[#allocation2 + $0x110] sm:$0xff] }
  0x4c   : > { %359 = vst.msk [vmem:[#allocation2 + $0xe9] sm:$0x1] %vm313_vm1, %v341_v48  ;;  %v342_v60 = vld [vmem:[#allocation2 + $0xff] sm:$0x1]  ;;  %v343_v4 = vld [vmem:[#allocation2 + $0x117] sm:$0x1]  ;;  %v8489_v51 = vpack.c.bf16 %v389_v56, %v388_v53 }
  0x4d   : > { %360 = vst.msk [vmem:[#allocation2 + $0x101] sm:$0x1] %vm313_vm1, %v342_v60  ;;  %361 = vst.msk [vmem:[#allocation2 + $0x119] sm:$0x1] %vm313_vm1, %v343_v4  ;;  %v344_v41 = vld [vmem:[#allocation2 + $0x12f] sm:$0x1] }
  0x4e   : > { %7359 = vmatmul.mubr.msk.bf16.gmra.mxu1 %vm257_vm0, %v8437_v1  ;;  %362 = vst.msk [vmem:[#allocation2 + $0x131] sm:$0x1] %vm313_vm1, %v344_v41  ;;  %v345_v29 = vld [vmem:[#allocation2 + $0x147] sm:$0x1]  ;;  %v446_v32 = vld [vmem:[#allocation2 + $0x139] sm:$0xff]  ;;  %v448_v46 = vld [vmem:[#allocation2 + $0x151] sm:$0xff] }
  0x4f   : > { %7362 = vmatprep.mubr.msk.bf16.mxu1 %vm257_vm0, %v8440_v3  ;;  %363 = vst.msk [vmem:[#allocation2 + $0x149] sm:$0x1] %vm313_vm1, %v345_v29  ;;  %v346_v34 = vld [vmem:[#allocation2 + $0x15f] sm:$0x1]  ;;  %v447_v42 = vld [vmem:[#allocation2 + $0x141] sm:$0xff]  ;;  %v8514_v45 = vld [vmem:[%s8204_s25 + $0xf0] sm:$0xff] }
  0x50   : > { %364 = vst.msk [vmem:[#allocation2 + $0x161] sm:$0x1] %vm313_vm1, %v346_v34  ;;  %v347_v48 = vld [vmem:[#allocation2 + $0x177] sm:$0x1]  ;;  %v449_v53 = vld [vmem:[#allocation2 + $0x159] sm:$0xff]  ;;  %v390_v56 = vld [vmem:[#allocation2 + $0x108] sm:$0xff]  ;;  %v8508_v4 = vpack.c.bf16 %v447_v42, %v446_v32 }
  0x51   : > { %7335 = vmatmul.mubr.msk.bf16.gmra.mxu0 %vm257_vm0, %v8480_v50  ;;  %365 = vst.msk [vmem:[#allocation2 + $0x179] sm:$0x1] %vm313_vm1, %v347_v48  ;;  %v8506_v60 = vld [vmem:[%s11268_s1 + $0x58] sm:$0xff]   ;;  %v392_v41 = vld [vmem:[#allocation2 + $0x120] sm:$0xff]  ;;  %v393_v29 = vld [vmem:[#allocation2 + $0x128] sm:$0xff]  ;;  %v8510_v34 = vpack.c.bf16 %v449_v53, %v448_v46  ;;  %v8519_v43 = vpack.c.bf16 %v391_v44, %v390_v56 }
  0x52   : > { %7338 = vmatprep.mubr.msk.bf16.mxu0 %vm257_vm0, %v8483_v2  ;;  %7490 = vmatprep.subr.bf16.mxu1 %v8506_v60  ;;  %11337 = vst [vmem:[#allocation36_spill] sm:$0xff] %v8514_v45  ;;  %v8517_v48 = vld [vmem:[%s8204_s25 + $0xf8] sm:$0xff]  ;;  %288 = vst.msk [vmem:[#allocation2 + $0x181] sm:$0xff] %vm257_vm0, %v8514_v45  ;;  %v8525_v32 = vpack.c.bf16 %v393_v29, %v392_v41  ;;  %v450_v42 = vld [vmem:[#allocation2 + $0x169] sm:$0xff] }
  0x53   : > { %11338 = vst [vmem:[#allocation37_spill] sm:$0xff] %v8517_v48  ;;  %289 = vst.msk [vmem:[#allocation2 + $0x189] sm:$0xff] %vm257_vm0, %v8517_v48  ;;  %v451_v46 = vld [vmem:[#allocation2 + $0x171] sm:$0xff]  ;;  %v915_v53 = vld [vmem:[#allocation2 + $0x2] sm:$0xff] }
  0x54   : > { %v916_v39 = vld [vmem:[#allocation2 + $0xa] sm:$0xff]  ;;  %v394_v44 = vld [vmem:[#allocation2 + $0x138] sm:$0xff]  ;;  %v395_v56 = vld [vmem:[#allocation2 + $0x140] sm:$0xff]  ;;  %v8535_v41 = vpack.c.bf16 %v451_v46, %v450_v42 }
  0x55   : > { %v396_v45 = vld [vmem:[#allocation2 + $0x150] sm:$0xff]  ;;  %v397_v38 = vld [vmem:[#allocation2 + $0x158] sm:$0xff]  ;;  %v947_v29 = vpack.c.bf16 %v916_v39, %v915_v53  ;;  %v8537_v28 = vpack.c.bf16 %v395_v56, %v394_v44  ;;  %v918_v25 = vld [vmem:[#allocation2 + $0x22] sm:$0xff] }
  0x56   : > { %7363 = vmatmul.mubr.msk.bf16.gmra.mxu1 %vm257_vm0, %v8462_v57  ;;  %v8540_v27 = vpack.c.bf16 %v397_v38, %v396_v45  ;;  %v917_v26 = vld [vmem:[#allocation2 + $0x1a] sm:$0xff]  ;;  %v919_v23 = vld [vmem:[#allocation2 + $0x32] sm:$0xff]  ;;  %v398_v38 = vld [vmem:[#allocation2 + $0x168] sm:$0xff] }
  0x57   : > { %7366 = vmatprep.mubr.msk.bf16.mxu1 %vm257_vm0, %v8465_v0  ;;  %v399_v42 = vld [vmem:[#allocation2 + $0x170] sm:$0xff]  ;;  %v920_v39 = vld [vmem:[#allocation2 + $0x3a] sm:$0xff]  ;;  %v8550_v45 = vpack.c.bf16 %v918_v25, %v917_v26  ;;  %v923_v56 = vld [vmem:[#allocation2 + $0x62] sm:$0xff] }
  0x58   : > { %v8008_v46 = vld [vmem:[%s11268_s1 + $0x40] sm:$0xff]   ;;  %v921_v53 = vld [vmem:[#allocation2 + $0x4a] sm:$0xff]  ;;  %v922_v44 = vld [vmem:[#allocation2 + $0x52] sm:$0xff] }
  0x59   : > { %7339 = vmatmul.mubr.msk.bf16.gmra.mxu0 %vm257_vm0, %v8508_v4  ;;  %v311_v48 = vld [vmem:[#allocation2 + $0x182] sm:$0x1]  ;;  %v8564_v25 = vld [vmem:[%s11268_s1 + $0x68] sm:$0xff]   ;;  %v936_v22 = vld [vmem:[#allocation2 + $0xfa] sm:$0xff] }
  0x5a   : > { %7342 = vmatprep.mubr.msk.bf16.mxu0 %vm257_vm0, %v8510_v34  ;;  %330 = vst.msk [vmem:[#allocation2 + $0x180] sm:$0x1] %vm313_vm1, %v311_v48  ;;  %v348_v24 = vld [vmem:[#allocation2 + $0x18f] sm:$0x1]  ;;  %v8552_v48 = vpack.c.bf16 %v920_v39, %v919_v23  ;;  %v8573_v23 = vpack.c.bf16 %v922_v44, %v921_v53  ;;  %v926_v39 = vld [vmem:[#allocation2 + $0x82] sm:$0xff]  ;;  %v8595_v53 = vld [vmem:[%s11268_s1 + $0x78] sm:$0xff]  }
  0x5b   : > { %366 = vst.msk [vmem:[#allocation2 + $0x191] sm:$0x1] %vm313_vm1, %v348_v24  ;;  %v8557_v24 = vpack.c.bf16 %v399_v42, %v398_v38  ;;  %v925_v42 = vld [vmem:[#allocation2 + $0x7a] sm:$0xff]  ;;  %v939_v21 = vld [vmem:[#allocation2 + $0x122] sm:$0xff]  ;;  %v940_v20 = vld [vmem:[#allocation2 + $0x12a] sm:$0xff] }
  0x5c   : > { %v928_v38 = vld [vmem:[#allocation2 + $0x9a] sm:$0xff]  ;;  %v943_v19 = vld [vmem:[#allocation2 + $0x152] sm:$0xff] }
  0x5d   : > { %v944_v18 = vld [vmem:[#allocation2 + $0x15a] sm:$0xff] }
  0x5e   : > { %7367 = vmatmul.mubr.msk.bf16.gmra.mxu1 %vm257_vm0, %v8486_v31  ;;  %v8641_v16 = vpack.c.bf16 %v944_v18, %v943_v19  ;;  %v1252_v19 = vld [vmem:[#allocation2 + $0x188] sm:$0xff] }
  0x5f   : > { %7370 = vmatprep.mubr.msk.bf16.mxu1 %vm257_vm0, %v8489_v51 }
  0x61   : > { %7343 = vmatmul.mubr.msk.bf16.gmra.mxu0 %vm257_vm0, %v8535_v41  ;;  %v1251_v18 = vld [vmem:[#allocation2 + $0x180] sm:$0xff] }
  0x62   : > { %7386 = vmatprep.mubr.msk.bf16.mxu0 %vm257_vm0, %v947_v29  ;;  %v924_v29 = vld [vmem:[#allocation2 + $0x6a] sm:$0xff] }
  0x63   : > { %v8575_v26 = vpack.c.bf16 %v924_v29, %v923_v56  ;;  %v931_v56 = vld [vmem:[#allocation2 + $0xc2] sm:$0xff]  ;;  %v932_v29 = vld [vmem:[#allocation2 + $0xca] sm:$0xff] }
  0x66   : > { %7371 = vmatmul.mubr.msk.bf16.gmra.mxu1 %vm257_vm0, %v8519_v43 }
  0x67   : > { %7374 = vmatprep.mubr.msk.bf16.mxu1 %vm257_vm0, %v8525_v32 }
  0x69   : > { %7387 = vmatmul.mubr.msk.bf16.vlgmr.msra.gmra.mxu0 %vm257_vm0, %v8550_v45 }
  0x6a   : > { %7455 = vmatpush3.bf16.msra.mxu0 %v8435_v63  ;;  %7390 = vmatprep.mubr.msk.bf16.mxu0 %vm257_vm0, %v8552_v48  ;;  %v8011_v63 = vld [vmem:[%s11268_s1 + $0x50] sm:$0xff]  }
  0x6b   : > { %7456 = vmatprep.subr.bf16.mxu0 %v8008_v46 }
  0x6e   : > { %7375 = vmatmul.mubr.msk.bf16.gmra.mxu1 %vm257_vm0, %v8537_v28  ;;  %7457 = vmatpush3.bf16.msra.mxu0 %v8008_v46  ;;  %v8590_v46 = vpack.c.bf16 %v926_v39, %v925_v42  ;;  %v933_v39 = vld [vmem:[#allocation2 + $0xda] sm:$0xff] }
  0x6f   : > { %7378 = vmatprep.mubr.msk.bf16.mxu1 %vm257_vm0, %v8540_v27  ;;  %7526 = vmatprep.subr.bf16.mxu0 %v8564_v25 }
  0x71   : > { %7391 = vmatmul.mubr.msk.bf16.gmra.mxu0 %vm257_vm0, %v8573_v23 }
  0x72   : > { %7394 = vmatprep.mubr.msk.bf16.mxu0 %vm257_vm0, %v8575_v26 }
  0x76   : > { %7379 = vmatmul.mubr.msk.bf16.gmra.mxu1 %vm257_vm0, %v8557_v24 }
  0x77   : > { %7422 = vmatprep.mubr.msk.bf16.mxu1 %vm257_vm0, %v8357_v58  ;;  %v927_v58 = vld [vmem:[#allocation2 + $0x92] sm:$0xff] }
  0x78   : > { %v8597_v44 = vpack.c.bf16 %v928_v38, %v927_v58  ;;  %v934_v58 = vld [vmem:[#allocation2 + $0xe2] sm:$0xff]  ;;  %v935_v38 = vld [vmem:[#allocation2 + $0xf2] sm:$0xff] }
  0x79   : > { %7395 = vmatmul.mubr.msk.bf16.gmra.mxu0 %vm257_vm0, %v8590_v46 }
  0x7a   : > { %7398 = vmatprep.mubr.msk.bf16.mxu0 %vm257_vm0, %v8597_v44 }
  0x7e   : > { %7423 = vmatmul.mubr.msk.bf16.vlgmr.msra.gmra.mxu1 %vm257_vm0, %v8362_v61 }
  0x7f   : > { %7426 = vmatprep.mubr.msk.bf16.mxu1 %vm257_vm0, %v8375_v35  ;;  %7491 = vmatpush3.bf16.msra.mxu1 %v8506_v60  ;;  %v929_v35 = vld [vmem:[#allocation2 + $0xaa] sm:$0xff]  ;;  %v930_v60 = vld [vmem:[#allocation2 + $0xb2] sm:$0xff] }
  0x80   : > { %7492 = vmatprep.subr.bf16.mxu1 %v8011_v63  ;;  %v8608_v42 = vpack.c.bf16 %v930_v60, %v929_v35  ;;  %v8620_v35 = vpack.c.bf16 %v934_v58, %v933_v39  ;;  %v8622_v60 = vpack.c.bf16 %v936_v22, %v935_v38  ;;  %v8632_v58 = vpack.c.bf16 %v940_v20, %v939_v21  ;;  %v941_v22 = vld [vmem:[#allocation2 + $0x13a] sm:$0xff]  ;;  %v942_v38 = vld [vmem:[#allocation2 + $0x142] sm:$0xff]  ;;  %v945_v21 = vld [vmem:[#allocation2 + $0x16a] sm:$0xff] }
  0x81   : > { %v960_v17 = vpack.c.bf16 %v942_v38, %v941_v22  ;;  %v312_v20 = vld [vmem:[#allocation2 + $0x19a] sm:$0x1]  ;;  %v8658_v22 = vpack.c.bf16 %v1252_v19, %v1251_v18  ;;  %v8012_v38 = vld [vmem:[%s11268_s1 + $0x60] sm:$0xff]  }
  0x82   : > { %7399 = vmatmul.mubr.msk.bf16.gmra.mxu0 %vm257_vm0, %v8608_v42  ;;  %331 = vst.msk [vmem:[#allocation2 + $0x198] sm:$0x1] %vm313_vm1, %v312_v20  ;;  %v2454_v20 = vld [vmem:[#allocation2 + $0x91] sm:$0xff] }
  0x83   : > { %7493 = vmatpush3.bf16.msra.mxu1 %v8011_v63  ;;  %v8610_v63 = vpack.c.bf16 %v932_v29, %v931_v56  ;;  %v937_v56 = vld [vmem:[#allocation2 + $0x10a] sm:$0xff]  ;;  %v938_v29 = vld [vmem:[#allocation2 + $0x112] sm:$0xff] }
  0x84   : > { %7562 = vmatprep.subr.bf16.mxu1 %v8595_v53  ;;  %v958_v39 = vpack.c.bf16 %v938_v29, %v937_v56  ;;  %v946_v56 = vld [vmem:[#allocation2 + $0x172] sm:$0xff] }
  0x85   : > { %7402 = vmatprep.mubr.msk.bf16.mxu0 %vm257_vm0, %v8610_v63  ;;  %v962_v29 = vpack.c.bf16 %v946_v56, %v945_v21  ;;  %v2455_v21 = vld [vmem:[#allocation2 + $0x99] sm:$0xff] }
  0x86   : > { %7427 = vmatmul.mubr.msk.bf16.gmra.mxu1 %vm257_vm0, %v8384_v40  ;;  %v2482_v19 = vpack.c.bf16 %v2455_v21, %v2454_v20 }
  0x87   : > { %7430 = vmatprep.mubr.msk.bf16.mxu1 %vm257_vm0, %v8437_v1 }
  0x8a   : > { %7403 = vmatmul.mubr.msk.bf16.gmra.mxu0 %vm257_vm0, %v8620_v35 }
  0x8b   : > { %7406 = vmatprep.mubr.msk.bf16.mxu0 %vm257_vm0, %v8622_v60 }
  0x8e   : > { %7431 = vmatmul.mubr.msk.bf16.gmra.mxu1 %vm257_vm0, %v8440_v3 }
  0x8f   : > { %7434 = vmatprep.mubr.msk.bf16.mxu1 %vm257_vm0, %v8462_v57 }
  0x92   : > { %7407 = vmatmul.mubr.msk.bf16.gmra.mxu0 %vm257_vm0, %v958_v39 }
  0x93   : > { %7410 = vmatprep.mubr.msk.bf16.mxu0 %vm257_vm0, %v8632_v58 }
  0x96   : > { %7435 = vmatmul.mubr.msk.bf16.gmra.mxu1 %vm257_vm0, %v8465_v0 }
  0x97   : > { %7438 = vmatprep.mubr.msk.bf16.mxu1 %vm257_vm0, %v8486_v31 }
  0x9a   : > { %7411 = vmatmul.mubr.msk.bf16.gmra.mxu0 %vm257_vm0, %v960_v17 }
  0x9b   : > { %7414 = vmatprep.mubr.msk.bf16.mxu0 %vm257_vm0, %v8641_v16 }
  0x9e   : > { %7439 = vmatmul.mubr.msk.bf16.gmra.mxu1 %vm257_vm0, %v8489_v51 }
  0x9f   : > { %7442 = vmatprep.mubr.msk.bf16.mxu1 %vm257_vm0, %v8519_v43 }
  0xa2   : > { %7415 = vmatmul.mubr.msk.bf16.gmra.mxu0 %vm257_vm0, %v962_v29 }
  0xa3   : > { %7458 = vmatprep.mubr.msk.bf16.mxu0 %vm257_vm0, %v8331_v36  ;;  %v8015_v36 = vld [vmem:[%s11268_s1 + $0x70] sm:$0xff]  }
  0xa6   : > { %7443 = vmatmul.mubr.msk.bf16.gmra.mxu1 %vm257_vm0, %v8525_v32 }
  0xa7   : > { %7446 = vmatprep.mubr.msk.bf16.mxu1 %vm257_vm0, %v8537_v28 }
  0xaa   : > { %7459 = vmatmul.mubr.msk.bf16.vlgmr.msra.gmra.mxu0 %vm257_vm0, %v8333_v37  ;;  %v349_v37 = vld [vmem:[#allocation2 + $0x1a7] sm:$0x1] }
  0xab   : > { %7527 = vmatpush3.bf16.msra.mxu0 %v8564_v25  ;;  %7462 = vmatprep.mubr.msk.bf16.mxu0 %vm257_vm0, %v8348_v49  ;;  %367 = vst.msk [vmem:[#allocation2 + $0x1a9] sm:$0x1] %vm313_vm1, %v349_v37  ;;  %v1557_v49 = vld [vmem:[#allocation2 + $0x181] sm:$0xff] }
  0xac   : > { %7528 = vmatprep.subr.bf16.mxu0 %v8012_v38  ;;  %v2450_v25 = vld [vmem:[#allocation2 + $0x61] sm:$0xff] }
  0xae   : > { %7447 = vmatmul.mubr.msk.bf16.gmra.mxu1 %vm257_vm0, %v8540_v27  ;;  %v8014_v27 = vld [vmem:[%s11268_s1 + $0x88] sm:$0xff]  }
  0xaf   : > { %7450 = vmatprep.mubr.msk.bf16.mxu1 %vm257_vm0, %v8557_v24  ;;  %7529 = vmatpush3.bf16.msra.mxu0 %v8012_v38 }
  0xb0   : > { %7598 = vmatprep.subr.bf16.mxu0 %v8014_v27 }
  0xb2   : > { %7463 = vmatmul.mubr.msk.bf16.gmra.mxu0 %vm257_vm0, %v8351_v52  ;;  %v1558_v52 = vld [vmem:[#allocation2 + $0x189] sm:$0xff] }
  0xb3   : > { %7466 = vmatprep.mubr.msk.bf16.mxu0 %vm257_vm0, %v8370_v30  ;;  %v8726_v30 = vpack.c.bf16 %v1558_v52, %v1557_v49 }
  0xb6   : > { %7451 = vmatmul.mubr.msk.bf16.gmra.mxu1 %vm257_vm0, %v8658_v22 }
  0xb7   : > { %7494 = vmatprep.mubr.msk.bf16.mxu1 %vm257_vm0, %v8550_v45  ;;  %v2449_v45 = vld [vmem:[#allocation2 + $0x51] sm:$0xff] }
  0xba   : > { %7467 = vmatmul.mubr.msk.bf16.gmra.mxu0 %vm257_vm0, %v8373_v33  ;;  %v2142_v33 = vld [vmem:[#allocation2 + $0x48] sm:$0xff] }
  0xbb   : > { %7470 = vmatprep.mubr.msk.bf16.mxu0 %vm257_vm0, %v8427_v59  ;;  %v2143_v59 = vld [vmem:[#allocation2 + $0x50] sm:$0xff] }
  0xbe   : > { %7495 = vmatmul.mubr.msk.bf16.vlgmr.msra.gmra.mxu1 %vm257_vm0, %v8552_v48 }
  0xbf   : > { %7498 = vmatprep.mubr.msk.bf16.mxu1 %vm257_vm0, %v8573_v23  ;;  %7563 = vmatpush3.bf16.msra.mxu1 %v8595_v53  ;;  %v2451_v23 = vld [vmem:[#allocation2 + $0x69] sm:$0xff] }
  0xc0   : > { %7564 = vmatprep.subr.bf16.mxu1 %v8015_v36  ;;  %v2480_v53 = vpack.c.bf16 %v2451_v23, %v2450_v25 }
  0xc2   : > { %7471 = vmatmul.mubr.msk.bf16.gmra.mxu0 %vm257_vm0, %v8430_v62  ;;  %v1863_v62 = vld [vmem:[#allocation2 + $0x182] sm:$0xff] }
  0xc3   : > { %7565 = vmatpush3.bf16.msra.mxu1 %v8015_v36  ;;  %7474 = vmatprep.mubr.msk.bf16.mxu0 %vm257_vm0, %v8454_v47  ;;  %v1864_v47 = vld [vmem:[#allocation2 + $0x18a] sm:$0xff] }
  0xc6   : > { %7499 = vmatmul.mubr.msk.bf16.gmra.mxu1 %vm257_vm0, %v8575_v26 }
  0xc7   : > { %7502 = vmatprep.mubr.msk.bf16.mxu1 %vm257_vm0, %v8590_v46 }
  0xca   : > { %7475 = vmatmul.mubr.msk.bf16.gmra.mxu0 %vm257_vm0, %v8459_v55  ;;  %v2173_v55 = vpack.c.bf16 %v2143_v59, %v2142_v33  ;;  %v2456_v33 = vld [vmem:[#allocation2 + $0xa9] sm:$0xff]  ;;  %v2457_v59 = vld [vmem:[#allocation2 + $0xb1] sm:$0xff] }
  0xcb   : > { %7478 = vmatprep.mubr.msk.bf16.mxu0 %vm257_vm0, %v8480_v50  ;;  %v2446_v50 = vld [vmem:[#allocation2 + $0x31] sm:$0xff] }
  0xce   : > { %7503 = vmatmul.mubr.msk.bf16.gmra.mxu1 %vm257_vm0, %v8597_v44 }
  0xcf   : > { %7506 = vmatprep.mubr.msk.bf16.mxu1 %vm257_vm0, %v8608_v42 }
  0xd2   : > { %7479 = vmatmul.mubr.msk.bf16.gmra.mxu0 %vm257_vm0, %v8483_v2  ;;  %v8735_v2 = vpack.c.bf16 %v1864_v47, %v1863_v62 }
  0xd3   : > { %7482 = vmatprep.mubr.msk.bf16.mxu0 %vm257_vm0, %v8508_v4  ;;  %v8016_v4 = vld [vmem:[%s11268_s1 + $0x80] sm:$0xff]  }
  0xd6   : > { %7507 = vmatmul.mubr.msk.bf16.gmra.mxu1 %vm257_vm0, %v8610_v63 }
  0xd7   : > { %7510 = vmatprep.mubr.msk.bf16.mxu1 %vm257_vm0, %v8620_v35  ;;  %v2452_v35 = vld [vmem:[#allocation2 + $0x79] sm:$0xff] }
  0xda   : > { %7483 = vmatmul.mubr.msk.bf16.gmra.mxu0 %vm257_vm0, %v8510_v34 }
  0xdb   : > { %7486 = vmatprep.mubr.msk.bf16.mxu0 %vm257_vm0, %v8535_v41  ;;  %v2448_v41 = vld [vmem:[#allocation2 + $0x49] sm:$0xff] }
  0xdc   : > { %v2479_v46 = vpack.c.bf16 %v2449_v45, %v2448_v41 }
  0xde   : > { %7511 = vmatmul.mubr.msk.bf16.gmra.mxu1 %vm257_vm0, %v8622_v60  ;;  %v2453_v60 = vld [vmem:[#allocation2 + $0x81] sm:$0xff] }
  0xdf   : > { %7514 = vmatprep.mubr.msk.bf16.mxu1 %vm257_vm0, %v958_v39  ;;  %v2481_v18 = vpack.c.bf16 %v2453_v60, %v2452_v35 }
  0xe2   : > { %7487 = vmatmul.mubr.msk.bf16.gmra.mxu0 %vm257_vm0, %v8726_v30 }
  0xe3   : > { %7530 = vmatprep.mubr.msk.bf16.mxu0 %vm257_vm0, %v8362_v61 }
  0xe6   : > { %7515 = vmatmul.mubr.msk.bf16.gmra.mxu1 %vm257_vm0, %v8632_v58 }
  0xe7   : > { %7518 = vmatprep.mubr.msk.bf16.mxu1 %vm257_vm0, %v960_v17  ;;  %v2447_v17 = vld [vmem:[#allocation2 + $0x39] sm:$0xff] }
  0xe8   : > { %v2478_v34 = vpack.c.bf16 %v2447_v17, %v2446_v50  ;;  %v2459_v50 = vld [vmem:[#allocation2 + $0xc9] sm:$0xff] }
  0xe9   : > { %v7316_v61 = vpop.f32.mrf.mxu0 }
  0xea   : > { %7531 = vmatmul.mubr.msk.bf16.vlgmr.msra.gmra.mxu0 %vm257_vm0, %v2173_v55  ;;  %v2458_v55 = vld [vmem:[#allocation2 + $0xc1] sm:$0xff] }
  0xeb   : > { %7599 = vmatpush3.bf16.msra.mxu0 %v8014_v27  ;;  %7534 = vmatprep.mubr.msk.bf16.mxu0 %vm257_vm0, %v8384_v40 }
  0xec   : > { %7600 = vmatprep.subr.bf16.mxu0 %v8016_v4 }
  0xee   : > { %7519 = vmatmul.mubr.msk.bf16.gmra.mxu1 %vm257_vm0, %v8641_v16  ;;  %v567_v16 = vpop.f32.mrf.mxu0 }
  0xef   : > { %7522 = vmatprep.mubr.msk.bf16.mxu1 %vm257_vm0, %v962_v29  ;;  %7601 = vmatpush3.bf16.msra.mxu0 %v8016_v4 }
  0xf0   : > { %v7317_v48 = vpop.f32.mrf.mxu0 }
  0xf2   : > { %v570_v26 = vpop.f32.mrf.mxu0  ;;  %7535 = vmatmul.mubr.msk.bf16.gmra.mxu0 %vm257_vm0, %v8437_v1 }
  0xf3   : > { %7538 = vmatprep.mubr.msk.bf16.mxu0 %vm257_vm0, %v8440_v3 }
  0xf4   : > { %v7320_v44 = vpop.f32.mrf.mxu0 }
  0xf6   : > { %7523 = vmatmul.mubr.msk.bf16.gmra.mxu1 %vm257_vm0, %v8735_v2  ;;  %v583_v42 = vpop.f32.mrf.mxu0 }
  0xf7   : > { %7566 = vmatprep.mubr.msk.bf16.mxu1 %vm257_vm0, %v2478_v34  ;;  %v2483_v34 = vpack.c.bf16 %v2457_v59, %v2456_v33 }
  0xf8   : > { %v7321_v58 = vpop.f32.mrf.mxu0 }
  0xfa   : > { %v586_v29 = vpop.f32.mrf.mxu0  ;;  %7539 = vmatmul.mubr.msk.bf16.gmra.mxu0 %vm257_vm0, %v8462_v57 }
  0xfb   : > { %7542 = vmatprep.mubr.msk.bf16.mxu0 %vm257_vm0, %v8465_v0 }
  0xfc   : > { %v7324_v27 = vpop.f32.mrf.mxu0 }
  0xfe   : > { %v7352_v40 = vpop.f32.mrf.mxu1  ;;  %7567 = vmatmul.mubr.msk.bf16.vlgmr.msra.gmra.mxu1 %vm257_vm0, %v2479_v46  ;;  %v599_v49 = vpop.f32.mrf.mxu0  ;;  %v2461_v46 = vld [vmem:[#allocation2 + $0xe1] sm:$0xff] }
  0xff   : > { %v8751_v63 = vadd.f32 %v7352_v40, %v7316_v61  ;;  %7570 = vmatprep.mubr.msk.bf16.mxu1 %vm257_vm0, %v2480_v53  ;;  %v2484_v61 = vpack.c.bf16 %v2459_v50, %v2458_v55  ;;  %v2462_v40 = vld [vmem:[#allocation2 + $0xf1] sm:$0xff] }
 0x100   : > { %v788_v39 = vpop.f32.mrf.mxu1  ;;  %v7325_v47 = vpop.f32.mrf.mxu0 }
 0x101   : > { %v8754_v56 = vadd.f32 %v788_v39, %v567_v16 }
 0x102   : > { %v7353_v1 = vpop.f32.mrf.mxu1  ;;  %v602_v4 = vpop.f32.mrf.mxu0  ;;  %7543 = vmatmul.mubr.msk.bf16.gmra.mxu0 %vm257_vm0, %v8486_v31 }
 0x103   : > { %v8756_v3 = vadd.f32 %v7353_v1, %v7317_v48  ;;  %7546 = vmatprep.mubr.msk.bf16.mxu0 %vm257_vm0, %v8489_v51 }
 0x104   : > { %v791_v38 = vpop.f32.mrf.mxu1  ;;  %v7328_v41 = vpop.f32.mrf.mxu0 }
 0x105   : > { %v8760_v36 = vadd.f32 %v791_v38, %v570_v26  ;;  %v2460_v26 = vld [vmem:[#allocation2 + $0xd9] sm:$0xff] }
 0x106   : > { %v7356_v37 = vpop.f32.mrf.mxu1  ;;  %7571 = vmatmul.mubr.msk.bf16.gmra.mxu1 %vm257_vm0, %v2481_v18  ;;  %v615_v25 = vpop.f32.mrf.mxu0  ;;  %v2485_v39 = vpack.c.bf16 %v2461_v46, %v2460_v26  ;;  %v2165_v38 = vld [vmem:[#allocation2 + $0x158] sm:$0xff] }
 0x107   : > { %v8765_v52 = vadd.f32 %v7356_v37, %v7320_v44  ;;  %7574 = vmatprep.mubr.msk.bf16.mxu1 %vm257_vm0, %v2482_v19  ;;  %v2164_v19 = vld [vmem:[#allocation2 + $0x150] sm:$0xff]  ;;  %v2468_v46 = vld [vmem:[#allocation2 + $0x139] sm:$0xff] }
 0x108   : > { %v804_v62 = vpop.f32.mrf.mxu1  ;;  %v7329_v44 = vpop.f32.mrf.mxu0  ;;  %v2464_v37 = vld [vmem:[#allocation2 + $0x109] sm:$0xff]  ;;  %v2184_v55 = vpack.c.bf16 %v2165_v38, %v2164_v19  ;;  %v2170_v38 = vld [vmem:[#allocation2 + $0x198] sm:$0xff] }
 0x109   : > { %v8768_v57 = vadd.f32 %v804_v62, %v583_v42  ;;  %v2463_v42 = vld [vmem:[#allocation2 + $0xf9] sm:$0xff]  ;;  %v2467_v62 = vld [vmem:[#allocation2 + $0x129] sm:$0xff] }
 0x10a   : > { %v7357_v17 = vpop.f32.mrf.mxu1  ;;  %v618_v60 = vpop.f32.mrf.mxu0  ;;  %7547 = vmatmul.mubr.msk.bf16.gmra.mxu0 %vm257_vm0, %v8519_v43  ;;  %v2466_v43 = vld [vmem:[#allocation2 + $0x121] sm:$0xff] }
 0x10b   : > { %v8770_v0 = vadd.f32 %v7357_v17, %v7321_v58  ;;  %v2486_v58 = vpack.c.bf16 %v2463_v42, %v2462_v40  ;;  %7550 = vmatprep.mubr.msk.bf16.mxu0 %vm257_vm0, %v8525_v32  ;;  %v2470_v42 = vld [vmem:[#allocation2 + $0x151] sm:$0xff] }
 0x10c   : > { %v807_v16 = vpop.f32.mrf.mxu1  ;;  %v7332_v21 = vpop.f32.mrf.mxu0 }
 0x10d   : > { %v8774_v45 = vadd.f32 %v807_v16, %v586_v29 }
 0x10e   : > { %v7360_v48 = vpop.f32.mrf.mxu1  ;;  %7575 = vmatmul.mubr.msk.bf16.gmra.mxu1 %vm257_vm0, %v2483_v34  ;;  %v631_v18 = vpop.f32.mrf.mxu0  ;;  %v2488_v34 = vpack.c.bf16 %v2467_v62, %v2466_v43  ;;  %v2753_v43 = vld [vmem:[#allocation2 + $0x3a] sm:$0xff]  ;;  %v2472_v62 = vld [vmem:[#allocation2 + $0x169] sm:$0xff] }
 0x10f   : > { %v8779_v23 = vadd.f32 %v7360_v48, %v7324_v27  ;;  %7578 = vmatprep.mubr.msk.bf16.mxu1 %vm257_vm0, %v2484_v61 }
 0x110   : > { %v820_v53 = vpop.f32.mrf.mxu1  ;;  %v7333_v59 = vpop.f32.mrf.mxu0 }
 0x111   : > { %v8782_v31 = vadd.f32 %v820_v53, %v599_v49  ;;  %v2465_v49 = vld [vmem:[#allocation2 + $0x111] sm:$0xff]  ;;  %v2469_v53 = vld [vmem:[#allocation2 + $0x141] sm:$0xff] }
 0x112   : > { %v7361_v35 = vpop.f32.mrf.mxu1  ;;  %v8798_v50 = vpop.f32.mrf.mxu0  ;;  %v2487_v17 = vpack.c.bf16 %v2465_v49, %v2464_v37  ;;  %7551 = vmatmul.mubr.msk.bf16.gmra.mxu0 %vm257_vm0, %v8537_v28  ;;  %v2171_v37 = vld [vmem:[#allocation2 + $0x1a0] sm:$0xff] }
 0x113   : > { %v8784_v51 = vadd.f32 %v7361_v35, %v7325_v47  ;;  %7554 = vmatprep.mubr.msk.bf16.mxu0 %vm257_vm0, %v2184_v55  ;;  %v2471_v35 = vld [vmem:[#allocation2 + $0x159] sm:$0xff]  ;;  %v2473_v55 = vld [vmem:[#allocation2 + $0x171] sm:$0xff] }
 0x114   : > { %v823_v20 = vpop.f32.mrf.mxu1  ;;  %v7336_v16 = vpop.f32.mrf.mxu0 }
 0x115   : > { %v8788_v1 = vadd.f32 %v823_v20, %v602_v4 }
 0x116   : > { %v7364_v29 = vpop.f32.mrf.mxu1  ;;  %7579 = vmatmul.mubr.msk.bf16.gmra.mxu1 %vm257_vm0, %v2485_v39 }
 0x117   : > { %v8793_v27 = vadd.f32 %v7364_v29, %v7328_v41  ;;  %7582 = vmatprep.mubr.msk.bf16.mxu1 %vm257_vm0, %v2486_v58  ;;  %v2489_v58 = vpack.c.bf16 %v2469_v53, %v2468_v46  ;;  %v2490_v29 = vpack.c.bf16 %v2471_v35, %v2470_v42  ;;  %v2491_v46 = vpack.c.bf16 %v2473_v55, %v2472_v62  ;;  %v2754_v42 = vld [vmem:[#allocation2 + $0x4a] sm:$0xff]  ;;  %v2755_v35 = vld [vmem:[#allocation2 + $0x52] sm:$0xff] }
 0x118   : > { %v836_v33 = vpop.f32.mrf.mxu1 }
 0x119   : > { %v8796_v47 = vadd.f32 %v836_v33, %v615_v25  ;;  %v647_v25 = vpop.f32.mrf.mxu0  ;;  %v2752_v33 = vld [vmem:[#allocation2 + $0x32] sm:$0xff] }
 0x11a   : > { %v7365_v32 = vpop.f32.mrf.mxu1  ;;  %7555 = vmatmul.mubr.msk.bf16.gmra.mxu0 %vm257_vm0, %v8557_v24  ;;  %v2187_v24 = vpack.c.bf16 %v2171_v37, %v2170_v38  ;;  %v2477_v37 = vld [vmem:[#allocation2 + $0x1a1] sm:$0xff] }
 0x11b   : > { %v8800_v4 = vadd.f32 %v7365_v32, %v7329_v44  ;;  %v7337_v40 = vpop.f32.mrf.mxu0  ;;  %7558 = vmatprep.mubr.msk.bf16.mxu0 %vm257_vm0, %v8658_v22  ;;  %v2784_v22 = vpack.c.bf16 %v2753_v43, %v2752_v33  ;;  %v2785_v43 = vpack.c.bf16 %v2755_v35, %v2754_v42  ;;  %v2759_v42 = vld [vmem:[#allocation2 + $0x82] sm:$0xff] }
 0x11c   : > { %v839_v61 = vpop.f32.mrf.mxu1 }
 0x11d   : > { %v8804_v41 = vadd.f32 %v839_v61, %v618_v60  ;;  %v8813_v60 = vpop.f32.mrf.mxu0 }
 0x11e   : > { %v7368_v48 = vpop.f32.mrf.mxu1  ;;  %7583 = vmatmul.mubr.msk.bf16.gmra.mxu1 %vm257_vm0, %v2487_v17  ;;  %11339 = vst [vmem:[#allocation38_spill] sm:$0xff] %v8813_v60 }
 0x11f   : > { %v8808_v26 = vadd.f32 %v7368_v48, %v7332_v21  ;;  %7586 = vmatprep.mubr.msk.bf16.mxu1 %vm257_vm0, %v2488_v34  ;;  %v7340_v21 = vpop.f32.mrf.mxu0 }
 0x120   : > { %v852_v44 = vpop.f32.mrf.mxu1 }
 0x121   : > { %v8811_v39 = vadd.f32 %v852_v44, %v631_v18  ;;  %v663_v49 = vpop.f32.mrf.mxu0 }
 0x122   : > { %v7369_v28 = vpop.f32.mrf.mxu1  ;;  %7559 = vmatmul.mubr.msk.bf16.gmra.mxu0 %vm257_vm0, %v2187_v24 }
 0x123   : > { %v8815_v20 = vadd.f32 %v7369_v28, %v7333_v59  ;;  %v7341_v17 = vpop.f32.mrf.mxu0  ;;  %7602 = vmatprep.mubr.msk.bf16.mxu0 %vm257_vm0, %v2784_v22 }
 0x124   : > { %v8817_v19 = vpop.f32.mrf.mxu1 }
 0x125   : > { %v8829_v48 = vpop.f32.mrf.mxu0 }
 0x126   : > { %v7372_v18 = vpop.f32.mrf.mxu1  ;;  %7587 = vmatmul.mubr.msk.bf16.gmra.mxu1 %vm257_vm0, %v2489_v58  ;;  %11340 = vst [vmem:[#allocation39_spill] sm:$0xff] %v8829_v48  ;;  %v2756_v58 = vld [vmem:[#allocation2 + $0x62] sm:$0xff] }
 0x127   : > { %v8824_v59 = vadd.f32 %v7372_v18, %v7336_v16  ;;  %7590 = vmatprep.mubr.msk.bf16.mxu1 %vm257_vm0, %v2490_v29  ;;  %v7344_v16 = vpop.f32.mrf.mxu0  ;;  %v2757_v29 = vld [vmem:[#allocation2 + $0x6a] sm:$0xff] }
 0x128   : > { %v868_v32 = vpop.f32.mrf.mxu1  ;;  %v2786_v55 = vpack.c.bf16 %v2757_v29, %v2756_v58  ;;  %v2760_v58 = vld [vmem:[#allocation2 + $0x92] sm:$0xff]  ;;  %v2761_v29 = vld [vmem:[#allocation2 + $0x9a] sm:$0xff] }
 0x129   : > { %v8827_v34 = vadd.f32 %v868_v32, %v647_v25  ;;  %v679_v25 = vpop.f32.mrf.mxu0 }
 0x12a   : > { %v7373_v61 = vpop.f32.mrf.mxu1  ;;  %7603 = vmatmul.mubr.msk.bf16.vlgmr.msra.gmra.mxu0 %vm257_vm0, %v2785_v43 }
 0x12b   : > { %v8831_v53 = vadd.f32 %v7373_v61, %v7337_v40  ;;  %v2476_v40 = vld [vmem:[#allocation2 + $0x199] sm:$0xff]  ;;  %v7345_v33 = vpop.f32.mrf.mxu0  ;;  %7606 = vmatprep.mubr.msk.bf16.mxu0 %vm257_vm0, %v2786_v55  ;;  %v2788_v55 = vpack.c.bf16 %v2761_v29, %v2760_v58 }
 0x12c   : > { %v8833_v44 = vpop.f32.mrf.mxu1  ;;  %v2493_v22 = vpack.c.bf16 %v2477_v37, %v2476_v40 }
 0x12d   : > { %11341 = vst [vmem:[#allocation40_spill] sm:$0xff] %v8833_v44  ;;  %v8844_v24 = vpop.f32.mrf.mxu0 }
 0x12e   : > { %v7376_v28 = vpop.f32.mrf.mxu1  ;;  %7591 = vmatmul.mubr.msk.bf16.gmra.mxu1 %vm257_vm0, %v2491_v46  ;;  %11342 = vst [vmem:[#allocation41_spill] sm:$0xff] %v8844_v24 }
 0x12f   : > { %v8838_v38 = vadd.f32 %v7376_v28, %v7340_v21  ;;  %7594 = vmatprep.mubr.msk.bf16.mxu1 %vm257_vm0, %v8726_v30  ;;  %v7388_v21 = vpop.f32.mrf.mxu0  ;;  %v2758_v28 = vld [vmem:[#allocation2 + $0x7a] sm:$0xff] }
 0x130   : > { %v884_v18 = vpop.f32.mrf.mxu1  ;;  %v1191_v30 = vadd.f32 %v7388_v21, %v8751_v63 }
 0x131   : > { %v8842_v62 = vadd.f32 %v884_v18, %v663_v49  ;;  %v1062_v35 = vpop.f32.mrf.mxu0 }
 0x132   : > { %v7377_v32 = vpop.f32.mrf.mxu1 }
 0x133   : > { %v8846_v61 = vadd.f32 %v7377_v32, %v7341_v17  ;;  %v1189_v17 = vadd.f32 %v1062_v35, %v8754_v56  ;;  %v7389_v18 = vpop.f32.mrf.mxu0  ;;  %v2787_v32 = vpack.c.bf16 %v2759_v42, %v2758_v28  ;;  %v2763_v28 = vld [vmem:[#allocation2 + $0xb2] sm:$0xff]  ;;  %v2765_v35 = vld [vmem:[#allocation2 + $0xca] sm:$0xff] }
 0x134   : > { %v8848_v46 = vpop.f32.mrf.mxu1  ;;  %v1192_v63 = vadd.f32 %v7389_v18, %v8756_v3 }
 0x135   : > { %11343 = vst [vmem:[#allocation42_spill] sm:$0xff] %v8848_v46  ;;  %v1065_v15 = vpop.f32.mrf.mxu0  ;;  %7607 = vmatmul.mubr.msk.bf16.gmra.mxu0 %vm257_vm0, %v2787_v32 }
 0x136   : > { %v7380_v49 = vpop.f32.mrf.mxu1  ;;  %7595 = vmatmul.mubr.msk.bf16.gmra.mxu1 %vm257_vm0, %v2493_v22  ;;  %v8863_v22 = vadd.f32 %v1065_v15, %v8760_v36  ;;  %7610 = vmatprep.mubr.msk.bf16.mxu0 %vm257_vm0, %v2788_v55 }
 0x137   : > { %v8854_v40 = vadd.f32 %v7380_v49, %v7344_v16  ;;  %v7392_v16 = vpop.f32.mrf.mxu0  ;;  %v2764_v49 = vld [vmem:[#allocation2 + $0xc2] sm:$0xff] }
 0x138   : > { %v900_v37 = vpop.f32.mrf.mxu1  ;;  %v1195_v56 = vadd.f32 %v7392_v16, %v8765_v52  ;;  %v2790_v52 = vpack.c.bf16 %v2765_v35, %v2764_v49 }
 0x139   : > { %v8857_v43 = vadd.f32 %v900_v37, %v679_v25  ;;  %v2762_v25 = vld [vmem:[#allocation2 + $0xaa] sm:$0xff]  ;;  %v1078_v42 = vpop.f32.mrf.mxu0 }
 0x13a   : > { %v7381_v21 = vpop.f32.mrf.mxu1  ;;  %v1193_v15 = vadd.f32 %v1078_v42, %v8768_v57  ;;  %v2789_v29 = vpack.c.bf16 %v2763_v28, %v2762_v25  ;;  %v2767_v25 = vld [vmem:[#allocation2 + $0xe2] sm:$0xff]  ;;  %v2769_v42 = vld [vmem:[#allocation2 + $0xfa] sm:$0xff] }
 0x13b   : > { %v8860_v14 = vadd.f32 %v7381_v21, %v7345_v33  ;;  %v7393_v58 = vpop.f32.mrf.mxu0 }
 0x13c   : > { %v8865_v13 = vpop.f32.mrf.mxu1  ;;  %v1196_v18 = vadd.f32 %v7393_v58, %v8770_v0 }
 0x13d   : > { %11344 = vst [vmem:[#allocation43_spill] sm:$0xff] %v8865_v13  ;;  %v1081_v55 = vpop.f32.mrf.mxu0  ;;  %7611 = vmatmul.mubr.msk.bf16.gmra.mxu0 %vm257_vm0, %v2789_v29 }
 0x13e   : > { %v7424_v3 = vpop.f32.mrf.mxu1  ;;  %v8879_v16 = vadd.f32 %v1081_v55, %v8774_v45  ;;  %7614 = vmatprep.mubr.msk.bf16.mxu0 %vm257_vm0, %v2790_v52 }
 0x13f   : > { %v8870_v33 = vadd.f32 %v7424_v3, %v1191_v30  ;;  %v7396_v30 = vpop.f32.mrf.mxu0  ;;  %v2768_v3 = vld [vmem:[#allocation2 + $0xf2] sm:$0xff] }
 0x140   : > { %v1368_v36 = vpop.f32.mrf.mxu1  ;;  %v1199_v57 = vadd.f32 %v7396_v30, %v8779_v23  ;;  %v2792_v23 = vpack.c.bf16 %v2769_v42, %v2768_v3 }
 0x141   : > { %v8873_v37 = vadd.f32 %v1368_v36, %v1189_v17  ;;  %v2766_v17 = vld [vmem:[#allocation2 + $0xda] sm:$0xff]  ;;  %v1094_v28 = vpop.f32.mrf.mxu0 }
 0x142   : > { %v7425_v32 = vpop.f32.mrf.mxu1  ;;  %v1197_v45 = vadd.f32 %v1094_v28, %v8782_v31  ;;  %v2791_v36 = vpack.c.bf16 %v2767_v25, %v2766_v17  ;;  %v2771_v17 = vld [vmem:[#allocation2 + $0x112] sm:$0xff]  ;;  %v2773_v28 = vld [vmem:[#allocation2 + $0x12a] sm:$0xff] }
 0x143   : > { %v8876_v21 = vadd.f32 %v7425_v32, %v1192_v63  ;;  %v7397_v35 = vpop.f32.mrf.mxu0 }
 0x144   : > { %v8881_v12 = vpop.f32.mrf.mxu1  ;;  %v1200_v29 = vadd.f32 %v7397_v35, %v8784_v51 }
 0x145   : > { %v1097_v52 = vpop.f32.mrf.mxu0  ;;  %7615 = vmatmul.mubr.msk.bf16.gmra.mxu0 %vm257_vm0, %v2791_v36 }
 0x146   : > { %v7428_v0 = vpop.f32.mrf.mxu1  ;;  %v8895_v30 = vadd.f32 %v1097_v52, %v8788_v1  ;;  %7618 = vmatprep.mubr.msk.bf16.mxu0 %vm257_vm0, %v2792_v23 }
 0x147   : > { %v8886_v63 = vadd.f32 %v7428_v0, %v1195_v56  ;;  %v7400_v56 = vpop.f32.mrf.mxu0  ;;  %v2772_v0 = vld [vmem:[#allocation2 + $0x122] sm:$0xff] }
 0x148   : > { %v1384_v49 = vpop.f32.mrf.mxu1  ;;  %v1203_v31 = vadd.f32 %v7400_v56, %v8793_v27  ;;  %v2794_v27 = vpack.c.bf16 %v2773_v28, %v2772_v0 }
 0x149   : > { %v8889_v58 = vadd.f32 %v1384_v49, %v1193_v15  ;;  %v2770_v15 = vld [vmem:[#allocation2 + $0x10a] sm:$0xff]  ;;  %v1110_v25 = vpop.f32.mrf.mxu0 }
 0x14a   : > { %v7429_v32 = vpop.f32.mrf.mxu1  ;;  %v1201_v1 = vadd.f32 %v1110_v25, %v8796_v47  ;;  %v2793_v49 = vpack.c.bf16 %v2771_v17, %v2770_v15  ;;  %v2775_v15 = vld [vmem:[#allocation2 + $0x142] sm:$0xff]  ;;  %v2777_v25 = vld [vmem:[#allocation2 + $0x15a] sm:$0xff] }
 0x14b   : > { %v8892_v55 = vadd.f32 %v7429_v32, %v1196_v18  ;;  %v7401_v42 = vpop.f32.mrf.mxu0 }
 0x14c   : > { %v8897_v11 = vpop.f32.mrf.mxu1  ;;  %v1204_v36 = vadd.f32 %v7401_v42, %v8800_v4 }
 0x14d   : > { %v1113_v23 = vpop.f32.mrf.mxu0  ;;  %7619 = vmatmul.mubr.msk.bf16.gmra.mxu0 %vm257_vm0, %v2793_v49 }
 0x14e   : > { %v7432_v51 = vpop.f32.mrf.mxu1  ;;  %v8911_v56 = vadd.f32 %v1113_v23, %v8804_v41  ;;  %7622 = vmatprep.mubr.msk.bf16.mxu0 %vm257_vm0, %v2794_v27 }
 0x14f   : > { %v8902_v18 = vadd.f32 %v7432_v51, %v1199_v57  ;;  %v7404_v57 = vpop.f32.mrf.mxu0  ;;  %v2776_v51 = vld [vmem:[#allocation2 + $0x152] sm:$0xff] }
 0x150   : > { %v1400_v3 = vpop.f32.mrf.mxu1  ;;  %v1207_v47 = vadd.f32 %v7404_v57, %v8808_v26  ;;  %v2796_v26 = vpack.c.bf16 %v2777_v25, %v2776_v51 }
 0x151   : > { %v8905_v35 = vadd.f32 %v1400_v3, %v1197_v45  ;;  %v2774_v45 = vld [vmem:[#allocation2 + $0x13a] sm:$0xff]  ;;  %v1126_v17 = vpop.f32.mrf.mxu0 }
 0x152   : > { %v7433_v32 = vpop.f32.mrf.mxu1  ;;  %v1205_v41 = vadd.f32 %v1126_v17, %v8811_v39  ;;  %v2795_v3 = vpack.c.bf16 %v2775_v15, %v2774_v45 }
 0x153   : > { %v8908_v52 = vadd.f32 %v7433_v32, %v1200_v29  ;;  %v7405_v28 = vpop.f32.mrf.mxu0 }
 0x154   : > { %v8913_v10 = vpop.f32.mrf.mxu1  ;;  %v1208_v49 = vadd.f32 %v7405_v28, %v8815_v20 }
 0x155   : > { %v8924_v27 = vpop.f32.mrf.mxu0  ;;  %7623 = vmatmul.mubr.msk.bf16.gmra.mxu0 %vm257_vm0, %v2795_v3 }
 0x156   : > { %v7436_v4 = vpop.f32.mrf.mxu1  ;;  %11345 = vst [vmem:[#allocation44_spill] sm:$0xff] %v8924_v27  ;;  %7626 = vmatprep.mubr.msk.bf16.mxu0 %vm257_vm0, %v2796_v26 }
 0x157   : > { %v8918_v29 = vadd.f32 %v7436_v4, %v1203_v31  ;;  %v7408_v9 = vpop.f32.mrf.mxu0  ;;  %v2778_v31 = vld [vmem:[#allocation2 + $0x16a] sm:$0xff] }
 0x158   : > { %v1416_v0 = vpop.f32.mrf.mxu1  ;;  %v1211_v39 = vadd.f32 %v7408_v9, %v8824_v59 }
 0x159   : > { %v8921_v42 = vadd.f32 %v1416_v0, %v1201_v1  ;;  %v2779_v1 = vld [vmem:[#allocation2 + $0x172] sm:$0xff]  ;;  %v1142_v15 = vpop.f32.mrf.mxu0 }
 0x15a   : > { %v7437_v32 = vpop.f32.mrf.mxu1  ;;  %v1209_v4 = vadd.f32 %v1142_v15, %v8827_v34  ;;  %v2797_v51 = vpack.c.bf16 %v2779_v1, %v2778_v31  ;;  %v2782_v34 = vld [vmem:[#allocation2 + $0x19a] sm:$0xff] }
 0x15b   : > { %v8926_v23 = vadd.f32 %v7437_v32, %v1204_v36  ;;  %v7409_v36 = vpop.f32.mrf.mxu0 }
 0x15c   : > { %v8928_v57 = vpop.f32.mrf.mxu1  ;;  %v1212_v0 = vadd.f32 %v7409_v36, %v8831_v53 }
 0x15d   : > { %v8939_v3 = vpop.f32.mrf.mxu0  ;;  %7627 = vmatmul.mubr.msk.bf16.gmra.mxu0 %vm257_vm0, %v2797_v51 }
 0x15e   : > { %v7440_v45 = vpop.f32.mrf.mxu1  ;;  %11346 = vst [vmem:[#allocation45_spill] sm:$0xff] %v8939_v3  ;;  %7630 = vmatprep.mubr.msk.bf16.mxu0 %vm257_vm0, %v8735_v2 }
 0x15f   : > { %v8933_v20 = vadd.f32 %v7440_v45, %v1207_v47  ;;  %v7412_v26 = vpop.f32.mrf.mxu0 }
 0x160   : > { %v1432_v17 = vpop.f32.mrf.mxu1  ;;  %v1215_v47 = vadd.f32 %v7412_v26, %v8838_v38 }
 0x161   : > { %v8936_v25 = vadd.f32 %v1432_v17, %v1205_v41  ;;  %v2783_v41 = vld [vmem:[#allocation2 + $0x1a2] sm:$0xff]  ;;  %v1158_v31 = vpop.f32.mrf.mxu0 }
 0x162   : > { %v7441_v28 = vpop.f32.mrf.mxu1  ;;  %v1213_v1 = vadd.f32 %v1158_v31, %v8842_v62  ;;  %v2799_v15 = vpack.c.bf16 %v2783_v41, %v2782_v34 }
 0x163   : > { %v8941_v9 = vadd.f32 %v7441_v28, %v1208_v49  ;;  %v7413_v45 = vpop.f32.mrf.mxu0 }
 0x164   : > { %v8943_v59 = vpop.f32.mrf.mxu1  ;;  %v1216_v36 = vadd.f32 %v7413_v45, %v8846_v61 }
 0x165   : > { %11347 = vst [vmem:[#allocation46_spill] sm:$0xff] %v8943_v59  ;;  %v8955_v38 = vpop.f32.mrf.mxu0  ;;  %7631 = vmatmul.mubr.msk.bf16.gmra.mxu0 %vm257_vm0, %v2799_v15 }
 0x166   : > { %v7444_v32 = vpop.f32.mrf.mxu1  ;;  %11348 = vst [vmem:[#allocation47_spill] sm:$0xff] %v8955_v38 }
 0x167   : > { %v8949_v53 = vadd.f32 %v7444_v32, %v1211_v39  ;;  %v7416_v26 = vpop.f32.mrf.mxu0 }
 0x168   : > { %v1448_v49 = vpop.f32.mrf.mxu1  ;;  %v1219_v39 = vadd.f32 %v7416_v26, %v8854_v40 }
 0x169   : > { %v8952_v17 = vadd.f32 %v1448_v49, %v1209_v4  ;;  %v1174_v32 = vpop.f32.mrf.mxu0 }
 0x16a   : > { %v7445_v51 = vpop.f32.mrf.mxu1  ;;  %v1217_v4 = vadd.f32 %v1174_v32, %v8857_v43 }
 0x16b   : > { %v8957_v28 = vadd.f32 %v7445_v51, %v1212_v0  ;;  %v7417_v61 = vpop.f32.mrf.mxu0 }
 0x16c   : > { %v8959_v2 = vpop.f32.mrf.mxu1  ;;  %v1220_v0 = vadd.f32 %v7417_v61, %v8860_v14 }
 0x16d   : > { %11349 = vst [vmem:[#allocation48_spill] sm:$0xff] %v8959_v2  ;;  %v8969_v45 = vpop.f32.mrf.mxu0 }
 0x16e   : > { %v7448_v62 = vpop.f32.mrf.mxu1  ;;  %11350 = vst [vmem:[#allocation49_spill] sm:$0xff] %v8969_v45 }
 0x16f   : > { %v8963_v31 = vadd.f32 %v7448_v62, %v1215_v47  ;;  %v7460_v40 = vpop.f32.mrf.mxu0 }
 0x170   : > { %v1464_v34 = vpop.f32.mrf.mxu1  ;;  %v1803_v26 = vadd.f32 %v7460_v40, %v8870_v33 }
 0x171   : > { %v8966_v41 = vadd.f32 %v1464_v34, %v1213_v1  ;;  %v1674_v62 = vpop.f32.mrf.mxu0 }
 0x172   : > { %v7449_v49 = vpop.f32.mrf.mxu1  ;;  %v1801_v43 = vadd.f32 %v1674_v62, %v8873_v37 }
 0x173   : > { %v8971_v51 = vadd.f32 %v7449_v49, %v1216_v36  ;;  %v7461_v32 = vpop.f32.mrf.mxu0 }
 0x174   : > { %v8973_v15 = vpop.f32.mrf.mxu1  ;;  %v1804_v14 = vadd.f32 %v7461_v32, %v8876_v21 }
 0x175   : > { %11351 = vst [vmem:[#allocation50_spill] sm:$0xff] %v8973_v15  ;;  %v8982_v36 = vpop.f32.mrf.mxu0 }
 0x176   : > { %v7452_v47 = vpop.f32.mrf.mxu1 }
 0x177   : > { %v8976_v6 = vadd.f32 %v7452_v47, %v1219_v39  ;;  %v7464_v33 = vpop.f32.mrf.mxu0 }
 0x178   : > { %v1480_v1 = vpop.f32.mrf.mxu1  ;;  %v1807_v40 = vadd.f32 %v7464_v33, %v8886_v63 }
 0x179   : > { %v8979_v34 = vadd.f32 %v1480_v1, %v1217_v4  ;;  %v1690_v47 = vpop.f32.mrf.mxu0 }
 0x17a   : > { %v7453_v61 = vpop.f32.mrf.mxu1  ;;  %v8992_v37 = vadd.f32 %v1690_v47, %v8889_v58 }
 0x17b   : > { %v8984_v49 = vadd.f32 %v7453_v61, %v1220_v0  ;;  %v7465_v62 = vpop.f32.mrf.mxu0 }
 0x17c   : > { %v8986_v5 = vpop.f32.mrf.mxu1  ;;  %v1808_v1 = vadd.f32 %v7465_v62, %v8892_v55 }
 0x17d   : > { %11352 = vst [vmem:[#allocation51_spill] sm:$0xff] %v8986_v5  ;;  %v8997_v32 = vpop.f32.mrf.mxu0 }
 0x17e   : > { %v7496_v39 = vpop.f32.mrf.mxu1 }
 0x17f   : > { %v8989_v8 = vadd.f32 %v7496_v39, %v1803_v26  ;;  %v7468_v63 = vpop.f32.mrf.mxu0 }
 0x180   : > { %v1980_v4 = vpop.f32.mrf.mxu1  ;;  %v1811_v26 = vadd.f32 %v7468_v63, %v8902_v18 }
 0x181   : > { %v8994_v21 = vadd.f32 %v1980_v4, %v1801_v43  ;;  %v1706_v39 = vpop.f32.mrf.mxu0 }
 0x182   : > { %v7497_v0 = vpop.f32.mrf.mxu1  ;;  %v9007_v47 = vadd.f32 %v1706_v39, %v8905_v35 }
 0x183   : > { %v8999_v61 = vadd.f32 %v7497_v0, %v1804_v14  ;;  %v7469_v55 = vpop.f32.mrf.mxu0 }
 0x184   : > { %v9001_v7 = vpop.f32.mrf.mxu1  ;;  %v1812_v4 = vadd.f32 %v7469_v55, %v8908_v52 }
 0x185   : > { %v9012_v14 = vpop.f32.mrf.mxu0 }
 0x186   : > { %v7500_v33 = vpop.f32.mrf.mxu1 }
 0x187   : > { %v9004_v58 = vadd.f32 %v7500_v33, %v1807_v40  ;;  %v7472_v18 = vpop.f32.mrf.mxu0 }
 0x188   : > { %v9009_v43 = vpop.f32.mrf.mxu1  ;;  %v1815_v63 = vadd.f32 %v7472_v18, %v8918_v29 }
 0x189   : > { %v1722_v33 = vpop.f32.mrf.mxu0 }
 0x18a   : > { %v7501_v62 = vpop.f32.mrf.mxu1  ;;  %v9022_v35 = vadd.f32 %v1722_v33, %v8921_v42 }
 0x18b   : > { %v9014_v0 = vadd.f32 %v7501_v62, %v1808_v1  ;;  %v7473_v52 = vpop.f32.mrf.mxu0 }
 0x18c   : > { %v9016_v54 = vpop.f32.mrf.mxu1  ;;  %v1816_v55 = vadd.f32 %v7473_v52, %v8926_v23 }
 0x18d   : > { %v9027_v1 = vpop.f32.mrf.mxu0 }
 0x18e   : > { %v7504_v40 = vpop.f32.mrf.mxu1 }
 0x18f   : > { %v9019_v5 = vadd.f32 %v7504_v40, %v1811_v26  ;;  %v7476_v29 = vpop.f32.mrf.mxu0 }
 0x190   : > { %v9024_v39 = vpop.f32.mrf.mxu1  ;;  %v1819_v18 = vadd.f32 %v7476_v29, %v8933_v20 }
 0x191   : > { %v1738_v40 = vpop.f32.mrf.mxu0 }
 0x192   : > { %v7505_v45 = vpop.f32.mrf.mxu1  ;;  %v9037_v42 = vadd.f32 %v1738_v40, %v8936_v25 }
 0x193   : > { %v9029_v62 = vadd.f32 %v7505_v45, %v1812_v4  ;;  %v7477_v23 = vpop.f32.mrf.mxu0 }
 0x194   : > { %v9031_v13 = vpop.f32.mrf.mxu1  ;;  %11353 = vst [vmem:[#allocation52_spill] sm:$0xff] %v9037_v42  ;;  %v1820_v52 = vadd.f32 %v7477_v23, %v8941_v9 }
 0x195   : > { %v9042_v45 = vpop.f32.mrf.mxu0 }
 0x196   : > { %v7508_v26 = vpop.f32.mrf.mxu1  ;;  %11354 = vst [vmem:[#allocation53_spill] sm:$0xff] %v9042_v45 }
 0x197   : > { %v9034_v24 = vadd.f32 %v7508_v26, %v1815_v63  ;;  %v7480_v20 = vpop.f32.mrf.mxu0 }
 0x198   : > { %v9039_v33 = vpop.f32.mrf.mxu1  ;;  %v1823_v29 = vadd.f32 %v7480_v20, %v8949_v53 }
 0x199   : > { %v1754_v26 = vpop.f32.mrf.mxu0 }
 0x19a   : > { %v7509_v15 = vpop.f32.mrf.mxu1  ;;  %v9052_v25 = vadd.f32 %v1754_v26, %v8952_v17 }
 0x19b   : > { %v9044_v4 = vadd.f32 %v7509_v15, %v1816_v55  ;;  %v7481_v9 = vpop.f32.mrf.mxu0 }
 0x19c   : > { %v9046_v38 = vpop.f32.mrf.mxu1  ;;  %11356 = vst [vmem:[#allocation55_spill] sm:$0xff] %v9052_v25  ;;  %v1824_v23 = vadd.f32 %v7481_v9, %v8957_v28 }
 0x19d   : > { %11355 = vst [vmem:[#allocation54_spill] sm:$0xff] %v9046_v38  ;;  %v9057_v15 = vpop.f32.mrf.mxu0 }
 0x19e   : > { %v7512_v63 = vpop.f32.mrf.mxu1  ;;  %11358 = vst [vmem:[#allocation57_spill] sm:$0xff] %v9057_v15 }
 0x19f   : > { %v9049_v46 = vadd.f32 %v7512_v63, %v1819_v18  ;;  %v7484_v53 = vpop.f32.mrf.mxu0 }
 0x1a0   : > { %v9054_v40 = vpop.f32.mrf.mxu1  ;;  %v1827_v20 = vadd.f32 %v7484_v53, %v8963_v31 }
 0x1a1   : > { %11357 = vst [vmem:[#allocation56_spill] sm:$0xff] %v9054_v40  ;;  %v1770_v63 = vpop.f32.mrf.mxu0 }
 0x1a2   : > { %v7513_v48 = vpop.f32.mrf.mxu1  ;;  %v9067_v17 = vadd.f32 %v1770_v63, %v8966_v41 }
 0x1a3   : > { %v9059_v55 = vadd.f32 %v7513_v48, %v1820_v52  ;;  %v7485_v28 = vpop.f32.mrf.mxu0 }
 0x1a4   : > { %v9061_v2 = vpop.f32.mrf.mxu1  ;;  %11360 = vst [vmem:[#allocation59_spill] sm:$0xff] %v9067_v17  ;;  %v1828_v9 = vadd.f32 %v7485_v28, %v8971_v51 }
 0x1a5   : > { %11359 = vst [vmem:[#allocation58_spill] sm:$0xff] %v9061_v2  ;;  %v9072_v48 = vpop.f32.mrf.mxu0 }
 0x1a6   : > { %v7516_v18 = vpop.f32.mrf.mxu1  ;;  %11362 = vst [vmem:[#allocation61_spill] sm:$0xff] %v9072_v48 }
 0x1a7   : > { %v9064_v3 = vadd.f32 %v7516_v18, %v1823_v29  ;;  %v7488_v31 = vpop.f32.mrf.mxu0 }
 0x1a8   : > { %v9069_v26 = vpop.f32.mrf.mxu1  ;;  %v1831_v53 = vadd.f32 %v7488_v31, %v8976_v6 }
 0x1a9   : > { %11361 = vst [vmem:[#allocation60_spill] sm:$0xff] %v9069_v26  ;;  %v1786_v18 = vpop.f32.mrf.mxu0 }
 0x1aa   : > { %v7517_v15 = vpop.f32.mrf.mxu1  ;;  %v9082_v41 = vadd.f32 %v1786_v18, %v8979_v34 }
 0x1ab   : > { %v9074_v52 = vadd.f32 %v7517_v15, %v1824_v23  ;;  %v7489_v51 = vpop.f32.mrf.mxu0 }
 0x1ac   : > { %v9076_v25 = vpop.f32.mrf.mxu1  ;;  %11364 = vst [vmem:[#allocation63_spill] sm:$0xff] %v9082_v41  ;;  %v1832_v28 = vadd.f32 %v7489_v51, %v8984_v49 }
 0x1ad   : > { %11363 = vst [vmem:[#allocation62_spill] sm:$0xff] %v9076_v25  ;;  %v9087_v23 = vpop.f32.mrf.mxu0 }
 0x1ae   : > { %v7520_v29 = vpop.f32.mrf.mxu1  ;;  %11366 = vst [vmem:[#allocation65_spill] sm:$0xff] %v9087_v23 }
 0x1af   : > { %v9079_v2 = vadd.f32 %v7520_v29, %v1827_v20  ;;  %v7532_v6 = vpop.f32.mrf.mxu0 }
 0x1b0   : > { %v9084_v63 = vpop.f32.mrf.mxu1  ;;  %v9094_v31 = vadd.f32 %v7532_v6, %v8989_v8 }
 0x1b1   : > { %11365 = vst [vmem:[#allocation64_spill] sm:$0xff] %v9084_v63  ;;  %v2287_v29 = vpop.f32.mrf.mxu0 }
 0x1b2   : > { %v7521_v48 = vpop.f32.mrf.mxu1  ;;  %v9097_v18 = vadd.f32 %v2287_v29, %v8994_v21 }
 0x1b3   : > { %v9089_v15 = vadd.f32 %v7521_v48, %v1828_v9  ;;  %v7533_v49 = vpop.f32.mrf.mxu0 }
 0x1b4   : > { %v9091_v17 = vpop.f32.mrf.mxu1  ;;  %v9102_v51 = vadd.f32 %v7533_v49, %v8999_v61 }
 0x1b5   : > { %11367 = vst [vmem:[#allocation66_spill] sm:$0xff] %v9091_v17  ;;  %v9104_v48 = vpop.f32.mrf.mxu0 }
 0x1b6   : > { %v7524_v20 = vpop.f32.mrf.mxu1 }
 0x1b7   : > { %v2137_v34 = vadd.f32 %v7524_v20, %v1831_v53  ;;  %v7536_v8 = vpop.f32.mrf.mxu0 }
 0x1b8   : > { %v9099_v41 = vpop.f32.mrf.mxu1  ;;  %v9109_v6 = vadd.f32 %v7536_v8, %v9004_v58 }
 0x1b9   : > { %11368 = vst [vmem:[#allocation67_spill] sm:$0xff] %v9099_v41  ;;  %v9113_v21 = vpop.f32.mrf.mxu0 }
 0x1ba   : > { %v7525_v9 = vpop.f32.mrf.mxu1 }
 0x1bb   : > { %v2138_v23 = vadd.f32 %v7525_v9, %v1832_v28  ;;  %v7537_v29 = vpop.f32.mrf.mxu0 }
 0x1bc   : > { %v9106_v17 = vpop.f32.mrf.mxu1  ;;  %v9116_v41 = vadd.f32 %v7537_v29, %v9014_v0 }
 0x1bd   : > { %11369 = vst [vmem:[#allocation68_spill] sm:$0xff] %v9106_v17  ;;  %v9120_v49 = vpop.f32.mrf.mxu0 }
 0x1be   : > { %v9111_v53 = vpop.f32.mrf.mxu1 }
 0x1bf   : > { %v7540_v9 = vpop.f32.mrf.mxu0 }
 0x1c0   : > { %v2593_v20 = vpop.f32.mrf.mxu1  ;;  %v9125_v17 = vadd.f32 %v7540_v9, %v9019_v5 }
 0x1c1   : > { %v9129_v8 = vpop.f32.mrf.mxu0 }
 0x1c2   : > { %v9118_v61 = vpop.f32.mrf.mxu1 }
 0x1c3   : > { %v7541_v25 = vpop.f32.mrf.mxu0 }
 0x1c4   : > { %v9122_v28 = vpop.f32.mrf.mxu1  ;;  %v9134_v0 = vadd.f32 %v7541_v25, %v9029_v62 }
 0x1c5   : > { %v9138_v26 = vpop.f32.mrf.mxu0 }
 0x1c6   : > { %v9127_v58 = vpop.f32.mrf.mxu1 }
 0x1c7   : > { %v7544_v44 = vpop.f32.mrf.mxu0 }
 0x1c8   : > { %v9131_v63 = vpop.f32.mrf.mxu1  ;;  %v9141_v60 = vadd.f32 %v7544_v44, %v9034_v24 }
 0x1c9   : > { %v9145_v9 = vpop.f32.mrf.mxu0 }
 0x1ca   : > { %v9136_v29 = vpop.f32.mrf.mxu1  ;;  %11370 = vst [vmem:[#allocation69_spill] sm:$0xff] %v9141_v60 }
 0x1cb   : > { %v7545_v45 = vpop.f32.mrf.mxu0 }
 0x1cc   : > { %v9143_v5 = vpop.f32.mrf.mxu1  ;;  %v9148_v40 = vadd.f32 %v7545_v45, %v9044_v4 }
 0x1cd   : > { %v9152_v62 = vpop.f32.mrf.mxu0 }
 0x1ce   : > { %11371 = vst [vmem:[#allocation70_spill] sm:$0xff] %v9148_v40  ;;  %v9150_v42 = vpop.f32.mrf.mxu1  ;;  %11372 = vst [vmem:[#allocation71_spill] sm:$0xff] %v9152_v62 }
 0x1cf   : > { %v7548_v25 = vpop.f32.mrf.mxu0 }
 0x1d0   : > { %v9155_v59 = vadd.f32 %v7548_v25, %v9049_v46  ;;  %v9157_v27 = vpop.f32.mrf.mxu1 }
 0x1d1   : > { %v9159_v44 = vpop.f32.mrf.mxu0 }
 0x1d2   : > { %11373 = vst [vmem:[#allocation72_spill] sm:$0xff] %v9155_v59  ;;  %11374 = vst [vmem:[#allocation73_spill] sm:$0xff] %v9159_v44  ;;  %v9164_v38 = vpop.f32.mrf.mxu1 }
 0x1d3   : > { %v7549_v24 = vpop.f32.mrf.mxu0 }
 0x1d4   : > { %v9162_v60 = vadd.f32 %v7549_v24, %v9059_v55  ;;  %v9171_v62 = vpop.f32.mrf.mxu1 }
 0x1d5   : > { %v9166_v45 = vpop.f32.mrf.mxu0 }
 0x1d6   : > { %11375 = vst [vmem:[#allocation74_spill] sm:$0xff] %v9162_v60  ;;  %11376 = vst [vmem:[#allocation75_spill] sm:$0xff] %v9166_v45  ;;  %v9178_v44 = vpop.f32.mrf.mxu1 }
 0x1d7   : > { %v7552_v4 = vpop.f32.mrf.mxu0  ;;  %11380 = vst [vmem:[#allocation79_spill] sm:$0xff] %v9178_v44 }
 0x1d8   : > { %v9169_v40 = vadd.f32 %v7552_v4, %v9064_v3  ;;  %v9185_v45 = vpop.f32.mrf.mxu1 }
 0x1d9   : > { %v9173_v46 = vpop.f32.mrf.mxu0 }
 0x1da   : > { %11377 = vst [vmem:[#allocation76_spill] sm:$0xff] %v9169_v40  ;;  %11378 = vst [vmem:[#allocation77_spill] sm:$0xff] %v9173_v46  ;;  %v9192_v46 = vpop.f32.mrf.mxu1 }
 0x1db   : > { %v7553_v25 = vpop.f32.mrf.mxu0 }
 0x1dc   : > { %v9176_v59 = vadd.f32 %v7553_v25, %v9074_v52 }
 0x1dd   : > { %v9180_v55 = vpop.f32.mrf.mxu0 }
 0x1de   : > { %11379 = vst [vmem:[#allocation78_spill] sm:$0xff] %v9176_v59  ;;  %11381 = vst [vmem:[#allocation80_spill] sm:$0xff] %v9180_v55  ;;  %v9198_v55 = vpop.f32.mrf.mxu1 }
 0x1df   : > { %v7556_v24 = vpop.f32.mrf.mxu0 }
 0x1e0   : > { %v9183_v60 = vadd.f32 %v7556_v24, %v9079_v2  ;;  %v1496_v24 = vadd.f32 %v8881_v12, %v8863_v22  ;;  %v2722_v12 = vadd.f32 %v9111_v53, %v9094_v31  ;;  %v9231_v31 = vld [vmem:[%s11269_s2] ss:$0 sm:$0xff] }
 0x1e1   : > { %v9187_v3 = vpop.f32.mrf.mxu0 }
 0x1e2   : > { %11382 = vst [vmem:[#allocation81_spill] sm:$0xff] %v9183_v60  ;;  %11383 = vst [vmem:[#allocation82_spill] sm:$0xff] %v9187_v3  ;;  %v9206_v3 = vpop.f32.mrf.mxu1 }
 0x1e3   : > { %v7557_v4 = vpop.f32.mrf.mxu0 }
 0x1e4   : > { %v9190_v40 = vadd.f32 %v7557_v4, %v9089_v15  ;;  %v1802_v4 = vadd.f32 %v8982_v36, %v1496_v24  ;;  %v2111_v36 = vadd.f32 %v9009_v43, %v8992_v37 }
 0x1e5   : > { %v9194_v52 = vpop.f32.mrf.mxu0 }
 0x1e6   : > { %11384 = vst [vmem:[#allocation83_spill] sm:$0xff] %v9190_v40  ;;  %11385 = vst [vmem:[#allocation84_spill] sm:$0xff] %v9194_v52 }
 0x1e7   : > { %v7560_v25 = vpop.f32.mrf.mxu0 }
 0x1e8   : > { %v9196_v59 = vadd.f32 %v7560_v25, %v2137_v34  ;;  %v2108_v34 = vadd.f32 %v9001_v7, %v1802_v4  ;;  %v2720_v25 = vadd.f32 %v2593_v20, %v9097_v18  ;;  %v2723_v7 = vadd.f32 %v9118_v61, %v9102_v51 }
 0x1e9   : > { %v9200_v44 = vpop.f32.mrf.mxu0 }
 0x1ea   : > { %11386 = vst [vmem:[#allocation85_spill] sm:$0xff] %v9196_v59  ;;  %11387 = vst [vmem:[#allocation86_spill] sm:$0xff] %v9200_v44  ;;  %v9213_v59 = vpop.f32.mrf.mxu1  ;;  %v2415_v52 = vadd.f32 %v9104_v48, %v2108_v34 }
 0x1eb   : > { %v7561_v2 = vpop.f32.mrf.mxu0 }
 0x1ec   : > { %v9204_v60 = vadd.f32 %v7561_v2, %v2138_v23  ;;  %v1500_v23 = vadd.f32 %v8897_v11, %v8879_v16  ;;  %v2721_v18 = vadd.f32 %v9122_v28, %v2415_v52  ;;  %v9226_v48 = vpop.f32.mrf.mxu1  ;;  %v2418_v16 = vadd.f32 %v9113_v21, %v2111_v36 }
 0x1ed   : > { %v9208_v15 = vpop.f32.mrf.mxu0  ;;  %v2726_v21 = vadd.f32 %v9127_v58, %v9109_v6  ;;  %v2727_v6 = vadd.f32 %v9136_v29, %v9116_v41 }
 0x1ee   : > { %v1806_v24 = vadd.f32 %v8997_v32, %v1500_v23  ;;  %v2724_v32 = vadd.f32 %v9131_v63, %v2418_v16  ;;  %v9248_v52 = vpop.f32.mrf.mxu1 }
 0x1ef   : > { %v7604_v40 = vpop.f32.mrf.mxu0 }
 0x1f0   : > { %v3028_v20 = vadd.f32 %v7604_v40, %v2722_v12  ;;  %v2112_v53 = vadd.f32 %v9016_v54, %v1806_v24  ;;  %v1504_v12 = vadd.f32 %v8913_v10, %v8895_v30  ;;  %v9270_v10 = vpop.f32.mrf.mxu1 }
 0x1f1   : > { %v2899_v44 = vpop.f32.mrf.mxu0 }
 0x1f2   : > { %v3026_v22 = vadd.f32 %v2899_v44, %v2720_v25  ;;  %v9240_v61 = vadd.f32 %v9231_v31, %v3028_v20  ;;  %v2419_v44 = vadd.f32 %v9120_v49, %v2112_v53  ;;  %v2115_v49 = vadd.f32 %v9024_v39, %v9007_v47  ;;  %v9286_v53 = vpop.f32.mrf.mxu1 }
 0x1f3   : > { %v7605_v2 = vpop.f32.mrf.mxu0 }
 0x1f4   : > { %v9235_v37 = vadd.f32 %v9231_v31, %v3026_v22  ;;  %v3029_v43 = vadd.f32 %v7605_v2, %v2723_v7  ;;  %v2725_v23 = vadd.f32 %v9143_v5, %v2419_v44  ;;  %v3100_v2 = vsel %vm257_vm0, %v9240_v61, 0.0 }
 0x1f5   : > { %v2902_v11 = vpop.f32.mrf.mxu0  ;;  %v2422_v39 = vadd.f32 %v9129_v8, %v2115_v49 }
 0x1f6   : > { %v3027_v51 = vadd.f32 %v2902_v11, %v2721_v18  ;;  %v3097_v54 = vsel %vm257_vm0, %v9235_v37, 0.0  ;;  %v9253_v34 = vadd.f32 %v9231_v31, %v3029_v43  ;;  %v1810_v18 = vadd.f32 %v9012_v14, %v1504_v12 }
 0x1f7   : > { %v7608_v40 = vpop.f32.mrf.mxu0  ;;  %v2728_v16 = vadd.f32 %v9157_v27, %v2422_v39 }
 0x1f8   : > { %v9243_v28 = vadd.f32 %v9231_v31, %v3027_v51  ;;  %v3032_v36 = vadd.f32 %v7608_v40, %v2726_v21  ;;  %v3102_v41 = vsel %vm257_vm0, %v9253_v34, 0.0  ;;  %v2116_v20 = vadd.f32 %v9031_v13, %v1810_v18 }
 0x1f9   : > { %v2915_v4 = vpop.f32.mrf.mxu0  ;;  %v2730_v13 = vadd.f32 %v9150_v42, %v9125_v17 }
 0x1fa   : > { %v3098_v63 = vsel %vm257_vm0, %v9243_v28, 0.0  ;;  %v3030_v25 = vadd.f32 %v2915_v4, %v2724_v32  ;;  %v9278_v43 = vadd.f32 %v9231_v31, %v3032_v36  ;;  %v2423_v8 = vadd.f32 %v9138_v26, %v2116_v20  ;;  %v11391_v20 = vld [vmem:[#allocation69_spill] sm:$0xff] }
 0x1fb   : > { %v3099_v58 = vadd.f32 %v3098_v63, %v3097_v54  ;;  %v7609_v22 = vpop.f32.mrf.mxu0  ;;  %v1508_v4 = vadd.f32 %v8928_v57, %v8911_v56  ;;  %v2119_v26 = vadd.f32 %v9039_v33, %v9022_v35  ;;  %v2731_v54 = vadd.f32 %v9164_v38, %v9134_v0  ;;  %v9308_v56 = vpop.f32.mrf.mxu1 }
 0x1fc   : > { %v9267_v7 = vadd.f32 %v9231_v31, %v3030_v25  ;;  %v3033_v29 = vadd.f32 %v7609_v22, %v2727_v6  ;;  %v2729_v42 = vadd.f32 %v9171_v62, %v2423_v8  ;;  %v3108_v17 = vsel %vm257_vm0, %v9278_v43, 0.0  ;;  %v11388_v22 = vld [vmem:[#allocation54_spill] sm:$0xff] }
 0x1fd   : > { %v3101_v30 = vadd.f32 %v3100_v2, %v3099_v58  ;;  %v2918_v47 = vpop.f32.mrf.mxu0  ;;  %v1814_v6 = vadd.f32 %v9027_v1, %v1508_v4  ;;  %v2426_v33 = vadd.f32 %v9145_v9, %v2119_v26  ;;  %v856_v58 = vadd.f32 %v8817_v19, %v8798_v50  ;;  %v9327_v50 = vpop.f32.mrf.mxu1  ;;  %v11393_v8 = vld [vmem:[#allocation46_spill] sm:$0xff] }
 0x1fe   : > { %v3031_v5 = vadd.f32 %v2918_v47, %v2725_v23  ;;  %v3104_v14 = vsel %vm257_vm0, %v9267_v7, 0.0  ;;  %v9291_v27 = vadd.f32 %v9231_v31, %v3033_v29  ;;  %v11389_v47 = vld [vmem:[#allocation44_spill] sm:$0xff] }
 0x1ff   : > { %v3103_v24 = vadd.f32 %v3102_v41, %v3101_v30  ;;  %v7612_v11 = vpop.f32.mrf.mxu0  ;;  %v2120_v23 = vadd.f32 %v11388_v22, %v1814_v6  ;;  %v2732_v1 = vadd.f32 %v9185_v45, %v2426_v33  ;;  %v1206_v39 = vadd.f32 %v11389_v47, %v856_v58  ;;  %v11390_v41 = vld [vmem:[#allocation71_spill] sm:$0xff]  ;;  %v11399_v58 = vld [vmem:[#allocation38_spill] sm:$0xff]  ;;  %v11400_v22 = vld [vmem:[#allocation40_spill] sm:$0xff] }
 0x200   : > { %v9283_v51 = vadd.f32 %v9231_v31, %v3031_v5  ;;  %v3036_v12 = vadd.f32 %v7612_v11, %v2730_v13  ;;  %v3110_v38 = vsel %vm257_vm0, %v9291_v27, 0.0  ;;  %v11395_v13 = vld [vmem:[#allocation56_spill] sm:$0xff] }
 0x201   : > { %v3105_v40 = vadd.f32 %v3104_v14, %v3103_v24  ;;  %v2931_v32 = vpop.f32.mrf.mxu0  ;;  %v2427_v29 = vadd.f32 %v11390_v41, %v2120_v23  ;;  %v11392_v24 = vld [vmem:[#allocation79_spill] sm:$0xff]  ;;  %v872_v23 = vadd.f32 %v11400_v22, %v11399_v58  ;;  %v11410_v58 = vld [vmem:[#allocation77_spill] sm:$0xff] }
 0x202   : > { %v3106_v44 = vsel %vm257_vm0, %v9283_v51, 0.0  ;;  %v3034_v21 = vadd.f32 %v2931_v32, %v2728_v16  ;;  %v9318_v18 = vadd.f32 %v9231_v31, %v3036_v12  ;;  %v2734_v45 = vadd.f32 %v11392_v24, %v11391_v20  ;;  %v11394_v32 = vld [vmem:[#allocation52_spill] sm:$0xff]  ;;  %v11397_v12 = vld [vmem:[#allocation53_spill] sm:$0xff]  ;;  %v11403_v20 = vld [vmem:[#allocation75_spill] sm:$0xff] }
 0x203   : > { %v3107_v63 = vadd.f32 %v3106_v44, %v3105_v40  ;;  %v7613_v25 = vpop.f32.mrf.mxu0  ;;  %v1512_v40 = vadd.f32 %v11393_v8, %v1206_v39  ;;  %v2123_v44 = vadd.f32 %v11395_v13, %v11394_v32  ;;  %v11404_v8 = vld [vmem:[#allocation72_spill] sm:$0xff] }
 0x204   : > { %v9305_v49 = vadd.f32 %v9231_v31, %v3034_v21  ;;  %v3037_v0 = vadd.f32 %v7613_v25, %v2731_v54  ;;  %v11396_v21 = vld [vmem:[#allocation70_spill] sm:$0xff]  ;;  %v3116_v25 = vsel %vm257_vm0, %v9318_v18, 0.0 }
 0x205   : > { %v3109_v57 = vadd.f32 %v3108_v17, %v3107_v63  ;;  %v2934_v35 = vpop.f32.mrf.mxu0  ;;  %v2735_v4 = vadd.f32 %v9192_v46, %v11396_v21  ;;  %v2733_v63 = vadd.f32 %v9198_v55, %v2427_v29  ;;  %v1818_v6 = vadd.f32 %v11397_v12, %v1512_v40 }
 0x206   : > { %v3035_v62 = vadd.f32 %v2934_v35, %v2729_v42  ;;  %v3112_v9 = vsel %vm257_vm0, %v9305_v49, 0.0  ;;  %v9332_v11 = vadd.f32 %v9231_v31, %v3037_v0  ;;  %v2738_v40 = vadd.f32 %v9206_v3, %v11404_v8 }
 0x207   : > { %v3111_v2 = vadd.f32 %v3110_v38, %v3109_v57  ;;  %v7616_v36 = vpop.f32.mrf.mxu0  ;;  %v9348_v57 = vpop.f32.mrf.mxu1  ;;  %v11398_v38 = vld [vmem:[#allocation73_spill] sm:$0xff] }
 0x208   : > { %v9323_v30 = vadd.f32 %v9231_v31, %v3035_v62  ;;  %v3040_v42 = vadd.f32 %v7616_v36, %v2734_v45  ;;  %v2430_v0 = vadd.f32 %v11398_v38, %v2123_v44  ;;  %v3118_v46 = vsel %vm257_vm0, %v9332_v11, 0.0  ;;  %v11405_v44 = vld [vmem:[#allocation48_spill] sm:$0xff]  ;;  %v11409_v38 = vld [vmem:[#allocation57_spill] sm:$0xff] }
 0x209   : > { %v3113_v19 = vadd.f32 %v3112_v9, %v3111_v2  ;;  %v2947_v5 = vpop.f32.mrf.mxu0  ;;  %v11401_v2 = vld [vmem:[#allocation58_spill] sm:$0xff]  ;;  %v2689_v45 = vpop.f32.mrf.mxu1 }
 0x20a   : > { %v3114_v16 = vsel %vm257_vm0, %v9323_v30, 0.0  ;;  %v3038_v14 = vadd.f32 %v2947_v5, %v2732_v1  ;;  %v2124_v36 = vadd.f32 %v11401_v2, %v1818_v6  ;;  %v2736_v47 = vadd.f32 %v9213_v59, %v2430_v0 }
 0x20b   : > { %v3115_v26 = vadd.f32 %v3114_v16, %v3113_v19  ;;  %v7617_v54 = vpop.f32.mrf.mxu0  ;;  %v9358_v39 = vadd.f32 %v9231_v31, %v3040_v42  ;;  %v11402_v19 = vld [vmem:[#allocation45_spill] sm:$0xff] }
 0x20c   : > { %v9345_v17 = vadd.f32 %v9231_v31, %v3038_v14  ;;  %v3041_v62 = vadd.f32 %v7617_v54, %v2735_v4  ;;  %v1210_v5 = vadd.f32 %v11402_v19, %v872_v23  ;;  %v2431_v24 = vadd.f32 %v11403_v20, %v2124_v36  ;;  %v11406_v4 = vld [vmem:[#allocation55_spill] sm:$0xff]  ;;  %v11412_v36 = vld [vmem:[#allocation42_spill] sm:$0xff] }
 0x20d   : > { %v3117_v35 = vadd.f32 %v3116_v25, %v3115_v26  ;;  %v2950_v33 = vpop.f32.mrf.mxu0  ;;  %v11407_v26 = vld [vmem:[#allocation60_spill] sm:$0xff]  ;;  %v3124_v3 = vsel %vm257_vm0, %v9358_v39, 0.0 }
 0x20e   : > { %v3039_v55 = vadd.f32 %v2950_v33, %v2733_v63  ;;  %v3120_v41 = vsel %vm257_vm0, %v9345_v17, 0.0  ;;  %v9370_v59 = vadd.f32 %v9231_v31, %v3041_v62  ;;  %v1516_v21 = vadd.f32 %v11405_v44, %v1210_v5  ;;  %v11408_v63 = vld [vmem:[#allocation74_spill] sm:$0xff] }
 0x20f   : > { %v3119_v1 = vadd.f32 %v3118_v46, %v3117_v35  ;;  %v7620_v9 = vpop.f32.mrf.mxu0  ;;  %v2127_v54 = vadd.f32 %v11407_v26, %v11406_v4  ;;  %v2739_v25 = vadd.f32 %v9226_v48, %v11408_v63  ;;  %v2737_v6 = vadd.f32 %v9248_v52, %v2431_v24  ;;  %v7593_v46 = vpop.f32.mrf.mxu1  ;;  %v11411_v52 = vld [vmem:[#allocation39_spill] sm:$0xff]  ;;  %v11416_v4 = vld [vmem:[#allocation76_spill] sm:$0xff] }
 0x210   : > { %v9363_v29 = vadd.f32 %v9231_v31, %v3039_v55  ;;  %v3044_v35 = vadd.f32 %v7620_v9, %v2738_v40  ;;  %v1822_v0 = vadd.f32 %v11409_v38, %v1516_v21  ;;  %v3126_v48 = vsel %vm257_vm0, %v9370_v59, 0.0  ;;  %v11415_v40 = vld [vmem:[#allocation80_spill] sm:$0xff] }
 0x211   : > { %v3121_v16 = vadd.f32 %v3120_v41, %v3119_v1  ;;  %v2963_v14 = vpop.f32.mrf.mxu0  ;;  %v2434_v22 = vadd.f32 %v11410_v58, %v2127_v54  ;;  %v888_v1 = vadd.f32 %v11412_v36, %v11411_v52  ;;  %v2742_v26 = vadd.f32 %v9270_v10, %v11416_v4 }
 0x212   : > { %v3122_v32 = vsel %vm257_vm0, %v9363_v29, 0.0  ;;  %v3042_v13 = vadd.f32 %v2963_v14, %v2736_v47  ;;  %v11413_v47 = vld [vmem:[#allocation62_spill] sm:$0xff]  ;;  %v9394_v20 = vadd.f32 %v9231_v31, %v3044_v35  ;;  %v11414_v14 = vld [vmem:[#allocation47_spill] sm:$0xff] }
 0x213   : > { %v3123_v42 = vadd.f32 %v3122_v32, %v3121_v16  ;;  %v7621_v12 = vpop.f32.mrf.mxu0  ;;  %v2128_v9 = vadd.f32 %v11413_v47, %v1822_v0  ;;  %v2740_v5 = vadd.f32 %v9286_v53, %v2434_v22  ;;  %v1214_v8 = vadd.f32 %v11414_v14, %v888_v1  ;;  %v11420_v35 = vld [vmem:[#allocation78_spill] sm:$0xff] }
 0x214   : > { %v9383_v33 = vadd.f32 %v9231_v31, %v3042_v13  ;;  %v3045_v23 = vadd.f32 %v7621_v12, %v2739_v25  ;;  %v2692_v13 = vpop.f32.mrf.mxu1  ;;  %v11417_v25 = vld [vmem:[#allocation50_spill] sm:$0xff]  ;;  %v11418_v12 = vld [vmem:[#allocation59_spill] sm:$0xff]  ;;  %v2743_v38 = vadd.f32 %v9308_v56, %v11420_v35  ;;  %v3132_v10 = vsel %vm257_vm0, %v9394_v20, 0.0 }
 0x215   : > { %v3125_v62 = vadd.f32 %v3124_v3, %v3123_v42  ;;  %v2966_v55 = vpop.f32.mrf.mxu0  ;;  %v2435_v32 = vadd.f32 %v11415_v40, %v2128_v9  ;;  %v1520_v42 = vadd.f32 %v11417_v25, %v1214_v8  ;;  %v11422_v1 = vld [vmem:[#allocation82_spill] sm:$0xff] }
 0x216   : > { %v3043_v2 = vadd.f32 %v2966_v55, %v2737_v6  ;;  %v3128_v24 = vsel %vm257_vm0, %v9383_v33, 0.0  ;;  %v9406_v53 = vadd.f32 %v9231_v31, %v3045_v23  ;;  %v11419_v6 = vld [vmem:[#allocation64_spill] sm:$0xff]  ;;  %v11425_v14 = vld [vmem:[#allocation66_spill] sm:$0xff] }
 0x217   : > { %v3127_v41 = vadd.f32 %v3126_v48, %v3125_v62  ;;  %v7624_v19 = vpop.f32.mrf.mxu0  ;;  %v2131_v3 = vadd.f32 %v11419_v6, %v11418_v12  ;;  %v2741_v55 = vadd.f32 %v9327_v50, %v2435_v32  ;;  %v11421_v48 = vld [vmem:[#allocation61_spill] sm:$0xff] }
 0x218   : > { %v9399_v16 = vadd.f32 %v9231_v31, %v3043_v2  ;;  %v3048_v58 = vadd.f32 %v7624_v19, %v2742_v26  ;;  %v1826_v23 = vadd.f32 %v11421_v48, %v1520_v42  ;;  %v7596_v2 = vpop.f32.mrf.mxu1  ;;  %v3134_v56 = vsel %vm257_vm0, %v9406_v53, 0.0  ;;  %v11423_v50 = vld [vmem:[#allocation41_spill] sm:$0xff] }
 0x219   : > { %v3129_v44 = vadd.f32 %v3128_v24, %v3127_v41  ;;  %v2979_v21 = vpop.f32.mrf.mxu0  ;;  %v2438_v47 = vadd.f32 %v11422_v1, %v2131_v3  ;;  %v11426_v26 = vld [vmem:[#allocation49_spill] sm:$0xff] }
 0x21a   : > { %v3130_v54 = vsel %vm257_vm0, %v9399_v16, 0.0  ;;  %v3046_v63 = vadd.f32 %v2979_v21, %v2740_v5  ;;  %v11424_v5 = vld [vmem:[#allocation43_spill] sm:$0xff]  ;;  %v2132_v19 = vadd.f32 %v11425_v14, %v1826_v23  ;;  %v2705_v42 = vpop.f32.mrf.mxu1  ;;  %v11428_v3 = vld [vmem:[#allocation81_spill] sm:$0xff] }
 0x21b   : > { %v3131_v0 = vadd.f32 %v3130_v54, %v3129_v44  ;;  %v7625_v62 = vpop.f32.mrf.mxu0  ;;  %v904_v24 = vadd.f32 %v11424_v5, %v11423_v50  ;;  %v2744_v32 = vadd.f32 %v2689_v45, %v2438_v47  ;;  %v9429_v44 = vadd.f32 %v9231_v31, %v3048_v58  ;;  %v11431_v58 = vld [vmem:[#allocation67_spill] sm:$0xff] }
 0x21c   : > { %v9419_v22 = vadd.f32 %v9231_v31, %v3046_v63  ;;  %v3049_v9 = vadd.f32 %v7625_v62, %v2743_v38  ;;  %v11427_v63 = vld [vmem:[#allocation84_spill] sm:$0xff]  ;;  %v2746_v35 = vadd.f32 %v9348_v57, %v11428_v3  ;;  %v11429_v62 = vld [vmem:[#allocation51_spill] sm:$0xff]  ;;  %v7597_v5 = vpop.f32.mrf.mxu1 }
 0x21d   : > { %v3133_v52 = vadd.f32 %v3132_v10, %v3131_v0  ;;  %v2982_v36 = vpop.f32.mrf.mxu0  ;;  %v1218_v54 = vadd.f32 %v11426_v26, %v904_v24  ;;  %v2439_v25 = vadd.f32 %v11427_v63, %v2132_v19  ;;  %v11430_v10 = vld [vmem:[#allocation63_spill] sm:$0xff]  ;;  %v3140_v57 = vsel %vm257_vm0, %v9429_v44, 0.0  ;;  %v11434_v19 = vld [vmem:[#allocation86_spill] sm:$0xff] }
 0x21e   : > { %v3047_v41 = vadd.f32 %v2982_v36, %v2741_v55  ;;  %v3136_v21 = vsel %vm257_vm0, %v9419_v22, 0.0  ;;  %v9441_v45 = vadd.f32 %v9231_v31, %v3049_v9  ;;  %v2135_v48 = vadd.f32 %v11431_v58, %v11430_v10  ;;  %v11432_v23 = vld [vmem:[#allocation83_spill] sm:$0xff] }
 0x21f   : > { %v3135_v8 = vadd.f32 %v3134_v56, %v3133_v52  ;;  %v7628_v40 = vpop.f32.mrf.mxu0  ;;  %v1524_v55 = vadd.f32 %v11429_v62, %v1218_v54  ;;  %v2747_v52 = vadd.f32 %v7593_v46, %v11432_v23  ;;  %v2745_v47 = vadd.f32 %v2692_v13, %v2439_v25  ;;  %v11435_v13 = vld [vmem:[#allocation68_spill] sm:$0xff]  ;;  %v11436_v62 = vld [vmem:[#allocation85_spill] sm:$0xff] }
 0x220   : > { %v9434_v4 = vadd.f32 %v9231_v31, %v3047_v41  ;;  %v3052_v56 = vadd.f32 %v7628_v40, %v2746_v35  ;;  %v11433_v41 = vld [vmem:[#allocation65_spill] sm:$0xff]  ;;  %v3142_v46 = vsel %vm257_vm0, %v9441_v45, 0.0  ;;  %v2708_v35 = vpop.f32.mrf.mxu1 }
 0x221   : > { %v3137_v12 = vadd.f32 %v3136_v21, %v3135_v8  ;;  %v2995_v6 = vpop.f32.mrf.mxu0  ;;  %v1830_v50 = vadd.f32 %v11433_v41, %v1524_v55  ;;  %v2442_v8 = vadd.f32 %v11434_v19, %v2135_v48  ;;  %v2750_v55 = vadd.f32 %v7596_v2, %v11436_v62  ;;  %v8018_v62 = vld [vmem:[%s11270_s3 + $0x10] sm:$0xff]  }
 0x222   : > { %v3138_v38 = vsel %vm257_vm0, %v9434_v4, 0.0  ;;  %v3050_v0 = vadd.f32 %v2995_v6, %v2744_v32  ;;  %v9460_v25 = vadd.f32 %v9231_v31, %v3052_v56  ;;  %v2751_v48 = vadd.f32 %v7597_v5, %v9204_v60 }
 0x223   : > { %v3139_v36 = vadd.f32 %v3138_v38, %v3137_v12  ;;  %v7629_v1 = vpop.f32.mrf.mxu0  ;;  %v2136_v26 = vadd.f32 %v11435_v13, %v1830_v50  ;;  %v2748_v40 = vadd.f32 %v2705_v42, %v2442_v8 }
 0x224   : > { %v9452_v9 = vadd.f32 %v9231_v31, %v3050_v0  ;;  %v3053_v32 = vadd.f32 %v7629_v1, %v2747_v52  ;;  %v3148_v1 = vsel %vm257_vm0, %v9460_v25, 0.0 }
 0x225   : > { %v3141_v24 = vadd.f32 %v3140_v57, %v3139_v36  ;;  %v2998_v14 = vpop.f32.mrf.mxu0  ;;  %v2443_v3 = vadd.f32 %v9208_v15, %v2136_v26 }
 0x226   : > { %v3051_v21 = vadd.f32 %v2998_v14, %v2745_v47  ;;  %v3144_v12 = vsel %vm257_vm0, %v9452_v9, 0.0  ;;  %v3092_v10 = vadd.f32 %v9231_v31, %v3053_v32 }
 0x227   : > { %v3143_v54 = vadd.f32 %v3142_v46, %v3141_v24  ;;  %v7632_v63 = vpop.f32.mrf.mxu0  ;;  %v2749_v36 = vadd.f32 %v2708_v35, %v2443_v3 }
 0x228   : > { %v9465_v6 = vadd.f32 %v9231_v31, %v3051_v21  ;;  %v3056_v15 = vadd.f32 %v7632_v63, %v2750_v55  ;;  %v3150_v2 = vsel %vm257_vm0, %v3092_v10, 0.0  ;;  %v8019_v55 = vld [vmem:[%s11270_s3 + $0x8] sm:$0xff]  }
 0x229   : > { %v3145_v38 = vadd.f32 %v3144_v12, %v3143_v54  ;;  %v3011_v0 = vpop.f32.mrf.mxu0  ;;  %7670 = vmatprep.subr.bf16.mxu0 %v8019_v55 }
 0x22a   : > { %v3146_v42 = vsel %vm257_vm0, %v9465_v6, 0.0  ;;  %v3054_v58 = vadd.f32 %v3011_v0, %v2748_v40  ;;  %v3095_v14 = vadd.f32 %v9231_v31, %v3056_v15  ;;  %7671 = vmatpush3.bf16.msra.mxu0 %v8019_v55 }
 0x22b   : > { %v3147_v23 = vadd.f32 %v3146_v42, %v3145_v38  ;;  %v7633_v52 = vpop.f32.mrf.mxu0 }
 0x22c   : > { %v3093_v47 = vadd.f32 %v9231_v31, %v3054_v58  ;;  %v3057_v41 = vadd.f32 %v7633_v52, %v2751_v48  ;;  %v3156_v21 = vsel %vm257_vm0, %v3095_v14, 0.0  ;;  %v9502_v58 = vld [vmem:[%s11270_s3 + $0x28] sm:$0xff]  }
 0x22d   : > { %v3149_v57 = vadd.f32 %v3148_v1, %v3147_v23  ;;  %v3014_v56 = vpop.f32.mrf.mxu0 }
 0x22e   : > { %v3055_v50 = vadd.f32 %v3014_v56, %v2749_v36  ;;  %v3152_v60 = vsel %vm257_vm0, %v3093_v47, 0.0  ;;  %v3096_v8 = vadd.f32 %v9231_v31, %v3057_v41 }
 0x22f   : > { %v3151_v24 = vadd.f32 %v3150_v2, %v3149_v57 }
 0x230   : > { %v3094_v5 = vadd.f32 %v9231_v31, %v3055_v50  ;;  %v3158_v26 = vsel %vm257_vm0, %v3096_v8, 0.0  ;;  %v8017_v31 = vld [vmem:[%s11270_s3 + $0x18] sm:$0xff]  }
 0x231   : > { %v3153_v19 = vadd.f32 %v3152_v60, %v3151_v24  ;;  %7634 = vmatprep.subr.bf16.mxu1 %v8017_v31 }
 0x232   : > { %v3154_v46 = vsel %vm257_vm0, %v3094_v5, 0.0  ;;  %7635 = vmatpush3.bf16.msra.mxu1 %v8017_v31 }
 0x233   : > { %v3155_v32 = vadd.f32 %v3154_v46, %v3153_v19  ;;  %7636 = vmatprep.subr.bf16.mxu1 %v8018_v62 }
 0x235   : > { %v3157_v13 = vadd.f32 %v3156_v21, %v3155_v32 }
 0x236   : > { %7637 = vmatpush3.bf16.msra.mxu1 %v8018_v62 }
 0x237   : > { %v3159_v54 = vadd.f32 %v3158_v26, %v3157_v13  ;;  %7706 = vmatprep.subr.bf16.mxu1 %v9502_v58 }
 0x239   : > { %v3160_v63 = vrot.slane %v3159_v54, 4 }
 0x23b   : > { %v3161_v40 = vadd.f32 %v3160_v63, %v3159_v54 }
 0x23d   : > { %v3162_v12 = vrot.slane %v3161_v40, 2 }
 0x23f   : > { %v3163_v3 = vadd.f32 %v3162_v12, %v3161_v40 }
 0x241   : > { %v3164_v35 = vrot.slane %v3163_v3, 1 }
 0x243   : > { %v3165_v38 = vadd.f32 %v3164_v35, %v3163_v3 }
 0x245   : > { %v9484_v0 = vmul.f32 0.00390625, %v3165_v38 }
 0x247   : > { %v9497_v42 = vsub.f32 %v9323_v30, %v9484_v0  ;;  %v9506_v48 = vsub.f32 %v9345_v17, %v9484_v0  ;;  %v9510_v23 = vsub.f32 %v9363_v29, %v9484_v0  ;;  %v9514_v52 = vsub.f32 %v9358_v39, %v9484_v0 }
 0x248   : > { %v9518_v30 = vsub.f32 %v9370_v59, %v9484_v0  ;;  %v9522_v36 = vsub.f32 %v9383_v33, %v9484_v0  ;;  %v9526_v17 = vsub.f32 %v9399_v16, %v9484_v0  ;;  %v9530_v29 = vsub.f32 %v9394_v20, %v9484_v0  ;;  %v8021_v59 = vld [vmem:[%s11270_s3] sm:$0xff]  }
 0x249   : > { %v9534_v39 = vsub.f32 %v9406_v53, %v9484_v0  ;;  %v9541_v33 = vsub.f32 %v9419_v22, %v9484_v0  ;;  %v9545_v16 = vsub.f32 %v9434_v4, %v9484_v0  ;;  %v9549_v20 = vsub.f32 %v9429_v44, %v9484_v0  ;;  %7672 = vmatprep.subr.bf16.mxu0 %v8021_v59 }
 0x24a   : > { %v9553_v53 = vsub.f32 %v9441_v45, %v9484_v0  ;;  %v9557_v1 = vsub.f32 %v9452_v9, %v9484_v0  ;;  %v9561_v22 = vsub.f32 %v9465_v6, %v9484_v0  ;;  %v9565_v4 = vsub.f32 %v9460_v25, %v9484_v0  ;;  %7673 = vmatpush3.bf16.msra.mxu0 %v8021_v59 }
 0x24b   : > { %v9568_v44 = vsub.f32 %v3092_v10, %v9484_v0  ;;  %v9572_v45 = vsub.f32 %v3093_v47, %v9484_v0  ;;  %v9575_v15 = vsub.f32 %v3094_v5, %v9484_v0  ;;  %v9578_v9 = vsub.f32 %v3095_v14, %v9484_v0 }
 0x24c   : > { %v9581_v6 = vsub.f32 %v3096_v8, %v9484_v0  ;;  %v9585_v25 = vsub.f32 %v9235_v37, %v9484_v0  ;;  %v9589_v10 = vsub.f32 %v9243_v28, %v9484_v0  ;;  %v9593_v47 = vsub.f32 %v9240_v61, %v9484_v0 }
 0x24d   : > { %v9597_v57 = vsub.f32 %v9253_v34, %v9484_v0  ;;  %v9605_v2 = vsub.f32 %v9267_v7, %v9484_v0  ;;  %v9611_v61 = vsub.f32 %v9283_v51, %v9484_v0  ;;  %v9619_v14 = vsub.f32 %v9278_v43, %v9484_v0 }
 0x24e   : > { %v3200_v56 = vmul.f32 %v9585_v25, %v9585_v25  ;;  %v3201_v37 = vmul.f32 %v9589_v10, %v9589_v10  ;;  %v3202_v28 = vmul.f32 %v9593_v47, %v9593_v47  ;;  %v9626_v51 = vsub.f32 %v9291_v27, %v9484_v0 }
 0x24f   : > { %v3203_v34 = vmul.f32 %v9597_v57, %v9597_v57  ;;  %v3204_v7 = vmul.f32 %v9605_v2, %v9605_v2  ;;  %v3205_v19 = vmul.f32 %v9611_v61, %v9611_v61  ;;  %v9633_v43 = vsub.f32 %v9305_v49, %v9484_v0 }
 0x250   : > { %v3232_v41 = vsel %vm257_vm0, %v3200_v56, 0.0  ;;  %v3233_v50 = vsel %vm257_vm0, %v3201_v37, 0.0  ;;  %v3235_v60 = vsel %vm257_vm0, %v3202_v28, 0.0  ;;  %v3206_v32 = vmul.f32 %v9619_v14, %v9619_v14 }
 0x251   : > { %v3234_v24 = vadd.f32 %v3233_v50, %v3232_v41  ;;  %v3237_v8 = vsel %vm257_vm0, %v3203_v34, 0.0  ;;  %v3239_v21 = vsel %vm257_vm0, %v3204_v7, 0.0  ;;  %v3207_v27 = vmul.f32 %v9626_v51, %v9626_v51 }
 0x252   : > { %v3241_v26 = vsel %vm257_vm0, %v3205_v19, 0.0  ;;  %v9643_v63 = vsub.f32 %v9318_v18, %v9484_v0  ;;  %v3208_v49 = vmul.f32 %v9633_v43, %v9633_v43  ;;  %v3243_v40 = vsel %vm257_vm0, %v3206_v32, 0.0 }
 0x253   : > { %v3236_v5 = vadd.f32 %v3235_v60, %v3234_v24  ;;  %v9650_v3 = vsub.f32 %v9332_v11, %v9484_v0  ;;  %v3209_v35 = vmul.f32 %v9497_v42, %v9497_v42  ;;  %v3245_v38 = vsel %vm257_vm0, %v3207_v27, 0.0 }
 0x254   : > { %v3210_v18 = vmul.f32 %v9643_v63, %v9643_v63  ;;  %v3247_v62 = vsel %vm257_vm0, %v3208_v49, 0.0  ;;  %v3212_v11 = vmul.f32 %v9506_v48, %v9506_v48  ;;  %v3213_v34 = vmul.f32 %v9510_v23, %v9510_v23 }
 0x255   : > { %v3238_v46 = vadd.f32 %v3237_v8, %v3236_v5  ;;  %v3211_v59 = vmul.f32 %v9650_v3, %v9650_v3  ;;  %v3249_v56 = vsel %vm257_vm0, %v3209_v35, 0.0  ;;  %v3214_v24 = vmul.f32 %v9514_v52, %v9514_v52 }
 0x256   : > { %v3251_v0 = vsel %vm257_vm0, %v3210_v18, 0.0  ;;  %v3255_v7 = vsel %vm257_vm0, %v3212_v11, 0.0  ;;  %v3215_v5 = vmul.f32 %v9518_v30, %v9518_v30  ;;  %v3257_v19 = vsel %vm257_vm0, %v3213_v34, 0.0 }
 0x257   : > { %v3240_v13 = vadd.f32 %v3239_v21, %v3238_v46  ;;  %v3253_v41 = vsel %vm257_vm0, %v3211_v59, 0.0  ;;  %v3216_v46 = vmul.f32 %v9522_v36, %v9522_v36  ;;  %v3259_v32 = vsel %vm257_vm0, %v3214_v24, 0.0 }
 0x258   : > { %v3261_v27 = vsel %vm257_vm0, %v3215_v5, 0.0 }
 0x259   : > { %v3242_v54 = vadd.f32 %v3241_v26, %v3240_v13  ;;  %v3217_v13 = vmul.f32 %v9526_v17, %v9526_v17  ;;  %v3263_v49 = vsel %vm257_vm0, %v3216_v46, 0.0  ;;  %v3226_v46 = vmul.f32 %v9565_v4, %v9565_v4 }
 0x25b   : > { %v3244_v12 = vadd.f32 %v3243_v40, %v3242_v54  ;;  %v3218_v54 = vmul.f32 %v9530_v29, %v9530_v29  ;;  %v3265_v35 = vsel %vm257_vm0, %v3217_v13, 0.0  ;;  %v3227_v13 = vmul.f32 %v9568_v44, %v9568_v44 }
 0x25d   : > { %v3246_v31 = vadd.f32 %v3245_v38, %v3244_v12  ;;  %v3219_v12 = vmul.f32 %v9534_v39, %v9534_v39  ;;  %v3267_v18 = vsel %vm257_vm0, %v3218_v54, 0.0  ;;  %v3228_v54 = vmul.f32 %v9572_v45, %v9572_v45 }
 0x25f   : > { %v3248_v55 = vadd.f32 %v3247_v62, %v3246_v31  ;;  %v3220_v31 = vmul.f32 %v9541_v33, %v9541_v33  ;;  %v3269_v59 = vsel %vm257_vm0, %v3219_v12, 0.0  ;;  %v3229_v12 = vmul.f32 %v9575_v15, %v9575_v15 }
 0x261   : > { %v3250_v37 = vadd.f32 %v3249_v56, %v3248_v55  ;;  %v3221_v55 = vmul.f32 %v9545_v16, %v9545_v16  ;;  %v3271_v11 = vsel %vm257_vm0, %v3220_v31, 0.0  ;;  %v3230_v31 = vmul.f32 %v9578_v9, %v9578_v9 }
 0x263   : > { %v3252_v28 = vadd.f32 %v3251_v0, %v3250_v37  ;;  %v3222_v37 = vmul.f32 %v9549_v20, %v9549_v20  ;;  %v3273_v34 = vsel %vm257_vm0, %v3221_v55, 0.0  ;;  %v3231_v55 = vmul.f32 %v9581_v6, %v9581_v6 }
 0x265   : > { %v3254_v50 = vadd.f32 %v3253_v41, %v3252_v28  ;;  %v3223_v28 = vmul.f32 %v9553_v53, %v9553_v53  ;;  %v3275_v24 = vsel %vm257_vm0, %v3222_v37, 0.0  ;;  %v3291_v37 = vsel %vm257_vm0, %v3230_v31, 0.0 }
 0x267   : > { %v3256_v60 = vadd.f32 %v3255_v7, %v3254_v50  ;;  %v3224_v50 = vmul.f32 %v9557_v1, %v9557_v1  ;;  %v3277_v5 = vsel %vm257_vm0, %v3223_v28, 0.0 }
 0x269   : > { %v3258_v8 = vadd.f32 %v3257_v19, %v3256_v60  ;;  %v3225_v60 = vmul.f32 %v9561_v22, %v9561_v22 }
 0x26b   : > { %v3260_v21 = vadd.f32 %v3259_v32, %v3258_v8  ;;  %v9706_v8 = vld [vmem:[%s11270_s3 + $0x38] sm:$0xff]   ;;  %v3279_v32 = vsel %vm257_vm0, %v3224_v50, 0.0 }
 0x26c   : > { %7742 = vmatprep.subr.bf16.mxu0 %v9706_v8 }
 0x26d   : > { %v3262_v26 = vadd.f32 %v3261_v27, %v3260_v21  ;;  %v3281_v27 = vsel %vm257_vm0, %v3225_v60, 0.0 }
 0x26f   : > { %v3264_v40 = vadd.f32 %v3263_v49, %v3262_v26  ;;  %v3283_v49 = vsel %vm257_vm0, %v3226_v46, 0.0 }
 0x271   : > { %v3266_v38 = vadd.f32 %v3265_v35, %v3264_v40  ;;  %v3285_v35 = vsel %vm257_vm0, %v3227_v13, 0.0 }
 0x273   : > { %v3268_v62 = vadd.f32 %v3267_v18, %v3266_v38  ;;  %v3287_v18 = vsel %vm257_vm0, %v3228_v54, 0.0 }
 0x275   : > { %v3270_v56 = vadd.f32 %v3269_v59, %v3268_v62  ;;  %v3289_v59 = vsel %vm257_vm0, %v3229_v12, 0.0 }
 0x277   : > { %v3272_v0 = vadd.f32 %v3271_v11, %v3270_v56 }
 0x279   : > { %v3274_v41 = vadd.f32 %v3273_v34, %v3272_v0  ;;  %v3293_v0 = vsel %vm257_vm0, %v3231_v55, 0.0 }
 0x27b   : > { %v3276_v7 = vadd.f32 %v3275_v24, %v3274_v41 }
 0x27d   : > { %v3278_v19 = vadd.f32 %v3277_v5, %v3276_v7 }
 0x27f   : > { %v3280_v21 = vadd.f32 %v3279_v32, %v3278_v19 }
 0x281   : > { %v3282_v26 = vadd.f32 %v3281_v27, %v3280_v21 }
 0x283   : > { %v3284_v40 = vadd.f32 %v3283_v49, %v3282_v26 }
 0x285   : > { %v3286_v38 = vadd.f32 %v3285_v35, %v3284_v40 }
 0x287   : > { %v3288_v62 = vadd.f32 %v3287_v18, %v3286_v38 }
 0x289   : > { %v3290_v56 = vadd.f32 %v3289_v59, %v3288_v62 }
 0x28b   : > { %v3292_v11 = vadd.f32 %v3291_v37, %v3290_v56 }
 0x28d   : > { %v3294_v28 = vadd.f32 %v3293_v0, %v3292_v11 }
 0x28f   : > { %v3295_v34 = vrot.slane %v3294_v28, 4 }
 0x291   : > { %v3296_v41 = vadd.f32 %v3295_v34, %v3294_v28 }
 0x293   : > { %v3297_v50 = vrot.slane %v3296_v41, 2 }
 0x295   : > { %v3298_v24 = vadd.f32 %v3297_v50, %v3296_v41 }
 0x297   : > { %v3299_v7 = vrot.slane %v3298_v24, 1 }
 0x299   : > { %v3300_v60 = vadd.f32 %v3299_v7, %v3298_v24 }
 0x29b   : > { %v3301_v5 = vmul.f32 0.00390625, %v3300_v60 }
 0x29d   : > { %v3302_v19 = vadd.f32 1e-05, %v3301_v5 }
 0x29f   : > { %8035 = vrsqrt.f32 %v3302_v19 }
 0x2ac   : > { %v8036_v46 = vpop.eup %8035 }
 0x2ad   : > { %v3333_v32 = vmul.f32 %v8036_v46, %v9575_v15  ;;  %v3304_v21 = vmul.f32 %v8036_v46, %v9585_v25  ;;  %v3305_v13 = vmul.f32 %v8036_v46, %v9589_v10  ;;  %v3306_v27 = vmul.f32 %v8036_v46, %v9593_v47 }
 0x2ae   : > { %v3307_v26 = vmul.f32 %v8036_v46, %v9597_v57  ;;  %v3308_v54 = vmul.f32 %v8036_v46, %v9605_v2  ;;  %v3309_v49 = vmul.f32 %v8036_v46, %v9611_v61  ;;  %v3310_v40 = vmul.f32 %v8036_v46, %v9619_v14 }
 0x2af   : > { %v3365_v12 = vmax.f32 %v3333_v32, 0.0  ;;  %v3311_v35 = vmul.f32 %v8036_v46, %v9626_v51  ;;  %v3312_v38 = vmul.f32 %v8036_v46, %v9633_v43  ;;  %v3313_v15 = vmul.f32 %v8036_v46, %v9497_v42 }
 0x2b0   : > { %v3314_v25 = vmul.f32 %v8036_v46, %v9643_v63  ;;  %v3315_v10 = vmul.f32 %v8036_v46, %v9650_v3  ;;  %v3316_v47 = vmul.f32 %v8036_v46, %v9506_v48  ;;  %v3317_v57 = vmul.f32 %v8036_v46, %v9510_v23 }
 0x2b1   : > { %3403 = vst.msk [vmem:[#allocation2 + $0x1a1] sm:$0xff] %vm257_vm0, %v3365_v12  ;;  %v3318_v2 = vmul.f32 %v8036_v46, %v9514_v52  ;;  %v9747_v61 = vmul.f32 %v8036_v46, %v9518_v30  ;;  %v9750_v14 = vmul.f32 %v8036_v46, %v9522_v36  ;;  %v9753_v42 = vmul.f32 %v8036_v46, %v9526_v17 }
 0x2b2   : > { %3397 = vst.msk [vmem:[#allocation2 + $0x171] sm:$0xff] %vm257_vm0, %v3365_v12  ;;  %v9757_v51 = vmul.f32 %v8036_v46, %v9530_v29  ;;  %v9760_v48 = vmul.f32 %v8036_v46, %v9534_v39  ;;  %v9763_v23 = vmul.f32 %v8036_v46, %v9541_v33  ;;  %v9766_v52 = vmul.f32 %v8036_v46, %v9545_v16 }
 0x2b3   : > { %v9769_v30 = vmul.f32 %v8036_v46, %v9549_v20  ;;  %v9772_v36 = vmul.f32 %v8036_v46, %v9553_v53  ;;  %v9775_v17 = vmul.f32 %v8036_v46, %v9557_v1  ;;  %v9778_v29 = vmul.f32 %v8036_v46, %v9561_v22 }
 0x2b4   : > { %v9781_v39 = vmul.f32 %v8036_v46, %v9565_v4  ;;  %v9784_v33 = vmul.f32 %v8036_v46, %v9568_v44  ;;  %v9787_v16 = vmul.f32 %v8036_v46, %v9572_v45  ;;  %v9790_v20 = vmul.f32 %v8036_v46, %v9578_v9 }
 0x2b5   : > { %v9793_v53 = vmul.f32 %v8036_v46, %v9581_v6  ;;  %v3336_v1 = vmax.f32 %v3304_v21, 0.0  ;;  %v3337_v43 = vmax.f32 %v3305_v13, 0.0  ;;  %v3338_v63 = vmax.f32 %v3306_v27, 0.0 }
 0x2b6   : > { %v3339_v22 = vmax.f32 %v3307_v26, 0.0  ;;  %v3340_v3 = vmax.f32 %v3308_v54, 0.0  ;;  %v3341_v31 = vmax.f32 %v3309_v49, 0.0  ;;  %v3342_v4 = vmax.f32 %v3310_v40, 0.0 }
 0x2b7   : > { %v3343_v18 = vmax.f32 %v3311_v35, 0.0  ;;  %v3344_v62 = vmax.f32 %v3312_v38, 0.0  ;;  %v3345_v44 = vmax.f32 %v3313_v15, 0.0  ;;  %v3346_v55 = vmax.f32 %v3314_v25, 0.0  ;;  %3400 = vst.msk [vmem:[#allocation2 + $0x1] sm:$0xff] %vm257_vm0, %v3338_v63  ;;  %3368 = vst.msk [vmem:[#allocation2 + $0x19] sm:$0xff] %vm257_vm0, %v3336_v1 }
 0x2b8   : > { %3369 = vst.msk [vmem:[#allocation2 + $0x21] sm:$0xff] %vm257_vm0, %v3337_v43  ;;  %3370 = vst.msk [vmem:[#allocation2 + $0x31] sm:$0xff] %vm257_vm0, %v3338_v63  ;;  %v3347_v45 = vmax.f32 %v3315_v10, 0.0  ;;  %v3348_v9 = vmax.f32 %v3316_v47, 0.0  ;;  %v3349_v6 = vmax.f32 %v3317_v57, 0.0  ;;  %v3350_v59 = vmax.f32 %v3318_v2, 0.0 }
 0x2b9   : > { %3401 = vst.msk [vmem:[#allocation2 + $0x9] sm:$0xff] %vm257_vm0, %v3339_v22  ;;  %3371 = vst.msk [vmem:[#allocation2 + $0x39] sm:$0xff] %vm257_vm0, %v3339_v22  ;;  %v3351_v56 = vmax.f32 %v9747_v61, 0.0  ;;  %v3352_v37 = vmax.f32 %v9750_v14, 0.0  ;;  %v3353_v11 = vmax.f32 %v9753_v42, 0.0  ;;  %v3354_v0 = vmax.f32 %v9757_v51, 0.0 }
 0x2ba   : > { %3372 = vst.msk [vmem:[#allocation2 + $0x49] sm:$0xff] %vm257_vm0, %v3340_v3  ;;  %3373 = vst.msk [vmem:[#allocation2 + $0x51] sm:$0xff] %vm257_vm0, %v3341_v31  ;;  %v3455_v28 = vld [vmem:[#allocation2 + $0x177] sm:$0x1]  ;;  %v3355_v34 = vmax.f32 %v9760_v48, 0.0  ;;  %v3356_v41 = vmax.f32 %v9763_v23, 0.0 }
 0x2bb   : > { %3374 = vst.msk [vmem:[#allocation2 + $0x61] sm:$0xff] %vm257_vm0, %v3342_v4  ;;  %3375 = vst.msk [vmem:[#allocation2 + $0x69] sm:$0xff] %vm257_vm0, %v3343_v18  ;;  %v3357_v50 = vmax.f32 %v9766_v52, 0.0  ;;  %v3358_v24 = vmax.f32 %v9769_v30, 0.0  ;;  %v3359_v7 = vmax.f32 %v9772_v36, 0.0  ;;  %v3360_v60 = vmax.f32 %v9775_v17, 0.0 }
 0x2bc   : > { %3376 = vst.msk [vmem:[#allocation2 + $0x79] sm:$0xff] %vm257_vm0, %v3344_v62  ;;  %3377 = vst.msk [vmem:[#allocation2 + $0x81] sm:$0xff] %vm257_vm0, %v3345_v44  ;;  %v3361_v5 = vmax.f32 %v9778_v29, 0.0  ;;  %v3362_v19 = vmax.f32 %v9781_v39, 0.0  ;;  %v3457_v46 = vld [vmem:[#allocation2 + $0x1a7] sm:$0x1] }
 0x2bd   : > { %3378 = vst.msk [vmem:[#allocation2 + $0x91] sm:$0xff] %vm257_vm0, %v3346_v55  ;;  %3379 = vst.msk [vmem:[#allocation2 + $0x99] sm:$0xff] %vm257_vm0, %v3347_v45  ;;  %v3363_v32 = vmax.f32 %v9784_v33, 0.0  ;;  %v3364_v21 = vmax.f32 %v9787_v16, 0.0  ;;  %v3366_v13 = vmax.f32 %v9790_v20, 0.0  ;;  %v3367_v27 = vmax.f32 %v9793_v53, 0.0 }
 0x2be   : > { %3380 = vst.msk [vmem:[#allocation2 + $0xa9] sm:$0xff] %vm257_vm0, %v3348_v9  ;;  %3381 = vst.msk [vmem:[#allocation2 + $0xb1] sm:$0xff] %vm257_vm0, %v3349_v6  ;;  %v3528_v26 = vld [vmem:[#allocation2 + $0x1] sm:$0xff]  ;;  %v3530_v54 = vld [vmem:[#allocation2 + $0x19] sm:$0xff] }
 0x2bf   : > { %3382 = vst.msk [vmem:[#allocation2 + $0xc1] sm:$0xff] %vm257_vm0, %v3350_v59  ;;  %3383 = vst.msk [vmem:[#allocation2 + $0xc9] sm:$0xff] %vm257_vm0, %v3351_v56  ;;  %v3531_v49 = vld [vmem:[#allocation2 + $0x21] sm:$0xff]  ;;  %v3532_v35 = vld [vmem:[#allocation2 + $0x31] sm:$0xff] }
 0x2c0   : > { %3473 = vst.msk [vmem:[#allocation2 + $0x179] sm:$0x1] %vm313_vm1, %v3455_v28  ;;  %3475 = vst.msk [vmem:[#allocation2 + $0x1a9] sm:$0x1] %vm313_vm1, %v3457_v46  ;;  %v3529_v40 = vld [vmem:[#allocation2 + $0x9] sm:$0xff]  ;;  %v9847_v12 = vpack.c.bf16 %v3531_v49, %v3530_v54  ;;  %v3533_v38 = vld [vmem:[#allocation2 + $0x39] sm:$0xff] }
 0x2c1   : > { %3384 = vst.msk [vmem:[#allocation2 + $0xd9] sm:$0xff] %vm257_vm0, %v3352_v37  ;;  %3385 = vst.msk [vmem:[#allocation2 + $0xe1] sm:$0xff] %vm257_vm0, %v3353_v11  ;;  %v3560_v15 = vpack.c.bf16 %v3529_v40, %v3528_v26  ;;  %v3404_v25 = vld [vmem:[#allocation2 + $0x2] sm:$0x1]  ;;  %v3405_v10 = vld [vmem:[#allocation2 + $0x1a] sm:$0x1]  ;;  %v9854_v57 = vpack.c.bf16 %v3533_v38, %v3532_v35 }
 0x2c2   : > { %3386 = vst.msk [vmem:[#allocation2 + $0xf1] sm:$0xff] %vm257_vm0, %v3354_v0  ;;  %3387 = vst.msk [vmem:[#allocation2 + $0xf9] sm:$0xff] %vm257_vm0, %v3355_v34  ;;  %v8022_v47 = vld [vmem:[%s11270_s3 + $0x20] sm:$0xff]   ;;  %v3406_v2 = vld [vmem:[#allocation2 + $0x32] sm:$0x1] }
 0x2c3   : > { %3388 = vst.msk [vmem:[#allocation2 + $0x109] sm:$0xff] %vm257_vm0, %v3356_v41  ;;  %3389 = vst.msk [vmem:[#allocation2 + $0x111] sm:$0xff] %vm257_vm0, %v3357_v50  ;;  %7638 = vmatprep.mubr.msk.bf16.mxu1 %vm257_vm0, %v3560_v15  ;;  %v3407_v61 = vld [vmem:[#allocation2 + $0x4a] sm:$0x1]  ;;  %v3408_v14 = vld [vmem:[#allocation2 + $0x62] sm:$0x1] }
 0x2c4   : > { %3390 = vst.msk [vmem:[#allocation2 + $0x121] sm:$0xff] %vm257_vm0, %v3358_v24  ;;  %3391 = vst.msk [vmem:[#allocation2 + $0x129] sm:$0xff] %vm257_vm0, %v3359_v7  ;;  %7639 = vmatmul.mubr.msk.bf16.vlgmr.msra.gmra.mxu1 %vm257_vm0, %v9847_v12  ;;  %v9867_v42 = vld [vmem:[%s11270_s3 + $0x48] sm:$0xff]   ;;  %v3535_v48 = vld [vmem:[#allocation2 + $0x51] sm:$0xff] }
 0x2c5   : > { %3392 = vst.msk [vmem:[#allocation2 + $0x139] sm:$0xff] %vm257_vm0, %v3360_v60  ;;  %3393 = vst.msk [vmem:[#allocation2 + $0x141] sm:$0xff] %vm257_vm0, %v3361_v5  ;;  %7707 = vmatpush3.bf16.msra.mxu1 %v9502_v58  ;;  %7642 = vmatprep.mubr.msk.bf16.mxu1 %vm257_vm0, %v9854_v57  ;;  %v3534_v51 = vld [vmem:[#allocation2 + $0x49] sm:$0xff]  ;;  %v3409_v23 = vld [vmem:[#allocation2 + $0x7a] sm:$0x1] }
 0x2c6   : > { %3394 = vst.msk [vmem:[#allocation2 + $0x151] sm:$0xff] %vm257_vm0, %v3362_v19  ;;  %3402 = vst.msk [vmem:[#allocation2 + $0x199] sm:$0xff] %vm257_vm0, %v3364_v21  ;;  %7708 = vmatprep.subr.bf16.mxu1 %v8022_v47  ;;  %v3536_v52 = vld [vmem:[#allocation2 + $0x61] sm:$0xff]  ;;  %v3537_v58 = vld [vmem:[#allocation2 + $0x69] sm:$0xff]  ;;  %v9871_v39 = vpack.c.bf16 %v3535_v48, %v3534_v51 }
 0x2c7   : > { %3395 = vst.msk [vmem:[#allocation2 + $0x159] sm:$0xff] %vm257_vm0, %v3363_v32  ;;  %3396 = vst.msk [vmem:[#allocation2 + $0x169] sm:$0xff] %vm257_vm0, %v3364_v21  ;;  %v3477_v36 = vld [vmem:[#allocation2 + $0x8] sm:$0xff]  ;;  %v3410_v17 = vld [vmem:[#allocation2 + $0x92] sm:$0x1]  ;;  %v9880_v1 = vpack.c.bf16 %v3537_v58, %v3536_v52 }
 0x2c8   : > { %3398 = vst.msk [vmem:[#allocation2 + $0x181] sm:$0xff] %vm257_vm0, %v3366_v13  ;;  %3399 = vst.msk [vmem:[#allocation2 + $0x189] sm:$0xff] %vm257_vm0, %v3367_v27  ;;  %v3479_v16 = vld [vmem:[#allocation2 + $0x20] sm:$0xff]  ;;  %v8025_v20 = vld [vmem:[%s11270_s3 + $0x30] sm:$0xff]  }
 0x2c9   : > { %3422 = vst.msk [vmem:[#allocation2] sm:$0x1] %vm313_vm1, %v3404_v25  ;;  %3423 = vst.msk [vmem:[#allocation2 + $0x18] sm:$0x1] %vm313_vm1, %v3405_v10  ;;  %7709 = vmatpush3.bf16.msra.mxu1 %v8022_v47  ;;  %v3481_v63 = vld [vmem:[#allocation2 + $0x38] sm:$0xff]  ;;  %v3539_v44 = vld [vmem:[#allocation2 + $0x81] sm:$0xff] }
 0x2ca   : > { %3424 = vst.msk [vmem:[#allocation2 + $0x30] sm:$0x1] %vm313_vm1, %v3406_v2  ;;  %3425 = vst.msk [vmem:[#allocation2 + $0x48] sm:$0x1] %vm313_vm1, %v3407_v61  ;;  %7778 = vmatprep.subr.bf16.mxu1 %v9867_v42  ;;  %v3411_v22 = vld [vmem:[#allocation2 + $0xaa] sm:$0x1] }
 0x2cb   : > { %3426 = vst.msk [vmem:[#allocation2 + $0x60] sm:$0x1] %vm313_vm1, %v3408_v14  ;;  %3427 = vst.msk [vmem:[#allocation2 + $0x78] sm:$0x1] %vm313_vm1, %v3409_v23  ;;  %v3412_v31 = vld [vmem:[#allocation2 + $0xc2] sm:$0x1] }
 0x2cc   : > { %3428 = vst.msk [vmem:[#allocation2 + $0x90] sm:$0x1] %vm313_vm1, %v3410_v17  ;;  %7643 = vmatmul.mubr.msk.bf16.gmra.mxu1 %vm257_vm0, %v9871_v39  ;;  %3429 = vst.msk [vmem:[#allocation2 + $0xa8] sm:$0x1] %vm313_vm1, %v3411_v22  ;;  %v3413_v4 = vld [vmem:[#allocation2 + $0xda] sm:$0x1] }
 0x2cd   : > { %7646 = vmatprep.mubr.msk.bf16.mxu1 %vm257_vm0, %v9880_v1  ;;  %3430 = vst.msk [vmem:[#allocation2 + $0xc0] sm:$0x1] %vm313_vm1, %v3412_v31  ;;  %v9899_v18 = vld [vmem:[%s11270_s3 + $0x58] sm:$0xff]   ;;  %3431 = vst.msk [vmem:[#allocation2 + $0xd8] sm:$0x1] %vm313_vm1, %v3413_v4  ;;  %v3485_v28 = vld [vmem:[#allocation2 + $0x68] sm:$0xff] }
 0x2ce   : > { %v3538_v62 = vld [vmem:[#allocation2 + $0x79] sm:$0xff]  ;;  %v3540_v55 = vld [vmem:[#allocation2 + $0x91] sm:$0xff]  ;;  %v3415_v37 = vld [vmem:[#allocation2 + $0x10a] sm:$0x1] }
 0x2cf   : > { %v3541_v9 = vld [vmem:[#allocation2 + $0x99] sm:$0xff]  ;;  %v3414_v6 = vld [vmem:[#allocation2 + $0xf2] sm:$0x1]  ;;  %v9903_v56 = vpack.c.bf16 %v3539_v44, %v3538_v62  ;;  %3433 = vst.msk [vmem:[#allocation2 + $0x108] sm:$0x1] %vm313_vm1, %v3415_v37  ;;  %v3542_v7 = vld [vmem:[#allocation2 + $0xa9] sm:$0xff] }
 0x2d0   : > { %v3476_v30 = vld [vmem:[#allocation2] sm:$0xff]  ;;  %v3478_v33 = vld [vmem:[#allocation2 + $0x18] sm:$0xff]  ;;  %3432 = vst.msk [vmem:[#allocation2 + $0xf0] sm:$0x1] %vm313_vm1, %v3414_v6  ;;  %v9907_v0 = vpack.c.bf16 %v3541_v9, %v3540_v55  ;;  %v3418_v24 = vld [vmem:[#allocation2 + $0x152] sm:$0x1] }
 0x2d1   : > { %v3508_v29 = vpack.c.bf16 %v3477_v36, %v3476_v30  ;;  %v9878_v53 = vpack.c.bf16 %v3479_v16, %v3478_v33  ;;  %v3480_v43 = vld [vmem:[#allocation2 + $0x30] sm:$0xff]  ;;  %v3482_v45 = vld [vmem:[#allocation2 + $0x48] sm:$0xff]  ;;  %v3416_v34 = vld [vmem:[#allocation2 + $0x122] sm:$0x1]  ;;  %3436 = vst.msk [vmem:[#allocation2 + $0x150] sm:$0x1] %vm313_vm1, %v3418_v24 }
 0x2d2   : > { %v9885_v3 = vpack.c.bf16 %v3481_v63, %v3480_v43  ;;  %v3484_v59 = vld [vmem:[#allocation2 + $0x60] sm:$0xff]  ;;  %3434 = vst.msk [vmem:[#allocation2 + $0x120] sm:$0x1] %vm313_vm1, %v3416_v34  ;;  %v3417_v50 = vld [vmem:[#allocation2 + $0x13a] sm:$0x1]  ;;  %v3543_v5 = vld [vmem:[#allocation2 + $0xb1] sm:$0xff] }
 0x2d3   : > { %7674 = vmatprep.mubr.msk.bf16.mxu0 %vm257_vm0, %v3508_v29  ;;  %v9913_v41 = vpack.c.bf16 %v3485_v28, %v3484_v59  ;;  %3435 = vst.msk [vmem:[#allocation2 + $0x138] sm:$0x1] %vm313_vm1, %v3417_v50  ;;  %v3440_v60 = vld [vmem:[#allocation2 + $0xf] sm:$0x1]  ;;  %v3544_v19 = vld [vmem:[#allocation2 + $0xc1] sm:$0xff]  ;;  %v3486_v32 = vld [vmem:[#allocation2 + $0x78] sm:$0xff]  ;;  %v9927_v49 = vpack.c.bf16 %v3543_v5, %v3542_v7 }
 0x2d4   : > { %7675 = vmatmul.mubr.msk.bf16.vlgmr.msra.gmra.mxu0 %vm257_vm0, %v9878_v53  ;;  %7647 = vmatmul.mubr.msk.bf16.gmra.mxu1 %vm257_vm0, %v9903_v56  ;;  %3458 = vst.msk [vmem:[#allocation2 + $0x11] sm:$0x1] %vm313_vm1, %v3440_v60  ;;  %v3419_v46 = vld [vmem:[#allocation2 + $0x16a] sm:$0x1]  ;;  %v3441_v13 = vld [vmem:[#allocation2 + $0x27] sm:$0x1] }
 0x2d5   : > { %7678 = vmatprep.mubr.msk.bf16.mxu0 %vm257_vm0, %v9885_v3  ;;  %7743 = vmatpush3.bf16.msra.mxu0 %v9706_v8  ;;  %v3483_v8 = vld [vmem:[#allocation2 + $0x50] sm:$0xff]  ;;  %3437 = vst.msk [vmem:[#allocation2 + $0x168] sm:$0x1] %vm313_vm1, %v3419_v46  ;;  %3459 = vst.msk [vmem:[#allocation2 + $0x29] sm:$0x1] %vm313_vm1, %v3441_v13  ;;  %v3487_v40 = vld [vmem:[#allocation2 + $0x80] sm:$0xff] }
 0x2d6   : > { %7744 = vmatprep.subr.bf16.mxu0 %v8025_v20  ;;  %v9905_v11 = vpack.c.bf16 %v3483_v8, %v3482_v45  ;;  %7650 = vmatprep.mubr.msk.bf16.mxu1 %vm257_vm0, %v9907_v0  ;;  %v3545_v21 = vld [vmem:[#allocation2 + $0xc9] sm:$0xff]  ;;  %v3442_v26 = vld [vmem:[#allocation2 + $0x3f] sm:$0x1]  ;;  %v3443_v54 = vld [vmem:[#allocation2 + $0x57] sm:$0x1]  ;;  %v9931_v38 = vpack.c.bf16 %v3487_v40, %v3486_v32 }
 0x2d7   : > { %v3488_v27 = vld [vmem:[#allocation2 + $0x90] sm:$0xff]  ;;  %3460 = vst.msk [vmem:[#allocation2 + $0x41] sm:$0x1] %vm313_vm1, %v3442_v26  ;;  %3461 = vst.msk [vmem:[#allocation2 + $0x59] sm:$0x1] %vm313_vm1, %v3443_v54  ;;  %v9933_v15 = vpack.c.bf16 %v3545_v21, %v3544_v19  ;;  %v3489_v25 = vld [vmem:[#allocation2 + $0x98] sm:$0xff] }
 0x2d8   : > { %v3444_v35 = vld [vmem:[#allocation2 + $0x6f] sm:$0x1]  ;;  %v3445_v10 = vld [vmem:[#allocation2 + $0x87] sm:$0x1]  ;;  %v9938_v47 = vpack.c.bf16 %v3489_v25, %v3488_v27  ;;  %v3446_v2 = vld [vmem:[#allocation2 + $0x9f] sm:$0x1] }
 0x2d9   : > { %7745 = vmatpush3.bf16.msra.mxu0 %v8025_v20  ;;  %3462 = vst.msk [vmem:[#allocation2 + $0x71] sm:$0x1] %vm313_vm1, %v3444_v35  ;;  %3463 = vst.msk [vmem:[#allocation2 + $0x89] sm:$0x1] %vm313_vm1, %v3445_v10  ;;  %v3447_v61 = vld [vmem:[#allocation2 + $0xb7] sm:$0x1] }
 0x2da   : > { %7814 = vmatprep.subr.bf16.mxu0 %v9899_v18  ;;  %3464 = vst.msk [vmem:[#allocation2 + $0xa1] sm:$0x1] %vm313_vm1, %v3446_v2  ;;  %v3546_v14 = vld [vmem:[#allocation2 + $0xd9] sm:$0xff]  ;;  %3465 = vst.msk [vmem:[#allocation2 + $0xb9] sm:$0x1] %vm313_vm1, %v3447_v61  ;;  %v3547_v48 = vld [vmem:[#allocation2 + $0xe1] sm:$0xff] }
 0x2db   : > { %v3448_v51 = vld [vmem:[#allocation2 + $0xcf] sm:$0x1]  ;;  %v3548_v23 = vld [vmem:[#allocation2 + $0xf1] sm:$0xff]  ;;  %v3449_v52 = vld [vmem:[#allocation2 + $0xe7] sm:$0x1]  ;;  %v9952_v29 = vpack.c.bf16 %v3547_v48, %v3546_v14 }
 0x2dc   : > { %7679 = vmatmul.mubr.msk.bf16.gmra.mxu0 %vm257_vm0, %v9905_v11  ;;  %7651 = vmatmul.mubr.msk.bf16.gmra.mxu1 %vm257_vm0, %v9927_v49  ;;  %3466 = vst.msk [vmem:[#allocation2 + $0xd1] sm:$0x1] %vm313_vm1, %v3448_v51  ;;  %v3490_v58 = vld [vmem:[#allocation2 + $0xa8] sm:$0xff]  ;;  %v3549_v30 = vld [vmem:[#allocation2 + $0xf9] sm:$0xff]  ;;  %3467 = vst.msk [vmem:[#allocation2 + $0xe9] sm:$0x1] %vm313_vm1, %v3449_v52 }
 0x2dd   : > { %7682 = vmatprep.mubr.msk.bf16.mxu0 %vm257_vm0, %v9913_v41  ;;  %7654 = vmatprep.mubr.msk.bf16.mxu1 %vm257_vm0, %v9933_v15  ;;  %v3450_v36 = vld [vmem:[#allocation2 + $0xff] sm:$0x1]  ;;  %v3492_v17 = vld [vmem:[#allocation2 + $0xc0] sm:$0xff]  ;;  %v3491_v33 = vld [vmem:[#allocation2 + $0xb0] sm:$0xff]  ;;  %v9956_v43 = vpack.c.bf16 %v3549_v30, %v3548_v23 }
 0x2de   : > { %3468 = vst.msk [vmem:[#allocation2 + $0x101] sm:$0x1] %vm313_vm1, %v3450_v36  ;;  %v3451_v16 = vld [vmem:[#allocation2 + $0x117] sm:$0x1]  ;;  %v9954_v20 = vpack.c.bf16 %v3491_v33, %v3490_v58  ;;  %v3493_v63 = vld [vmem:[#allocation2 + $0xc8] sm:$0xff]  ;;  %v3494_v9 = vld [vmem:[#allocation2 + $0xd8] sm:$0xff] }
 0x2df   : > { %3469 = vst.msk [vmem:[#allocation2 + $0x119] sm:$0x1] %vm313_vm1, %v3451_v16  ;;  %v3452_v22 = vld [vmem:[#allocation2 + $0x12f] sm:$0x1]  ;;  %v9961_v31 = vpack.c.bf16 %v3493_v63, %v3492_v17  ;;  %v3453_v4 = vld [vmem:[#allocation2 + $0x147] sm:$0x1] }
 0x2e0   : > { %3470 = vst.msk [vmem:[#allocation2 + $0x131] sm:$0x1] %vm313_vm1, %v3452_v22  ;;  %3471 = vst.msk [vmem:[#allocation2 + $0x149] sm:$0x1] %vm313_vm1, %v3453_v4  ;;  %v3454_v62 = vld [vmem:[#allocation2 + $0x15f] sm:$0x1] }
 0x2e1   : > { %3472 = vst.msk [vmem:[#allocation2 + $0x161] sm:$0x1] %vm313_vm1, %v3454_v62  ;;  %v3550_v44 = vld [vmem:[#allocation2 + $0x109] sm:$0xff]  ;;  %v3551_v55 = vld [vmem:[#allocation2 + $0x111] sm:$0xff]  ;;  %v3420_v45 = vld [vmem:[#allocation2 + $0x182] sm:$0x1] }
 0x2e2   : > { %v3552_v6 = vld [vmem:[#allocation2 + $0x121] sm:$0xff]  ;;  %v3553_v59 = vld [vmem:[#allocation2 + $0x129] sm:$0xff]  ;;  %3438 = vst.msk [vmem:[#allocation2 + $0x180] sm:$0x1] %vm313_vm1, %v3420_v45  ;;  %v9973_v28 = vpack.c.bf16 %v3551_v55, %v3550_v44  ;;  %v3497_v7 = vld [vmem:[#allocation2 + $0xf8] sm:$0xff] }
 0x2e3   : > { %v3496_v8 = vld [vmem:[#allocation2 + $0xf0] sm:$0xff]  ;;  %v3456_v37 = vld [vmem:[#allocation2 + $0x18f] sm:$0x1]  ;;  %v3495_v34 = vld [vmem:[#allocation2 + $0xe0] sm:$0xff]  ;;  %v9978_v24 = vpack.c.bf16 %v3553_v59, %v3552_v6 }
 0x2e4   : > { %7683 = vmatmul.mubr.msk.bf16.gmra.mxu0 %vm257_vm0, %v9931_v38  ;;  %7655 = vmatmul.mubr.msk.bf16.gmra.mxu1 %vm257_vm0, %v9952_v29  ;;  %3474 = vst.msk [vmem:[#allocation2 + $0x191] sm:$0x1] %vm313_vm1, %v3456_v37  ;;  %v9976_v50 = vpack.c.bf16 %v3495_v34, %v3494_v9  ;;  %v9982_v60 = vpack.c.bf16 %v3497_v7, %v3496_v8  ;;  %v3554_v5 = vld [vmem:[#allocation2 + $0x139] sm:$0xff]  ;;  %v3555_v19 = vld [vmem:[#allocation2 + $0x141] sm:$0xff]  ;;  %v3556_v32 = vld [vmem:[#allocation2 + $0x151] sm:$0xff] }
 0x2e5   : > { %7686 = vmatprep.mubr.msk.bf16.mxu0 %vm257_vm0, %v9938_v47  ;;  %7658 = vmatprep.mubr.msk.bf16.mxu1 %vm257_vm0, %v9956_v43  ;;  %v3498_v46 = vld [vmem:[#allocation2 + $0x108] sm:$0xff]  ;;  %v3557_v21 = vld [vmem:[#allocation2 + $0x159] sm:$0xff]  ;;  %v9990_v27 = vpack.c.bf16 %v3555_v19, %v3554_v5  ;;  %v3499_v26 = vld [vmem:[#allocation2 + $0x110] sm:$0xff] }
 0x2e6   : > { %v3500_v13 = vld [vmem:[#allocation2 + $0x120] sm:$0xff]  ;;  %v9992_v54 = vpack.c.bf16 %v3499_v26, %v3498_v46  ;;  %v9994_v40 = vpack.c.bf16 %v3557_v21, %v3556_v32  ;;  %v3501_v35 = vld [vmem:[#allocation2 + $0x128] sm:$0xff]  ;;  %v3421_v10 = vld [vmem:[#allocation2 + $0x19a] sm:$0x1] }
 0x2e7   : > { %v9998_v25 = vpack.c.bf16 %v3501_v35, %v3500_v13  ;;  %3439 = vst.msk [vmem:[#allocation2 + $0x198] sm:$0x1] %vm313_vm1, %v3421_v10  ;;  %v3558_v2 = vld [vmem:[#allocation2 + $0x169] sm:$0xff]  ;;  %v3559_v61 = vld [vmem:[#allocation2 + $0x171] sm:$0xff]  ;;  %v3503_v52 = vld [vmem:[#allocation2 + $0x140] sm:$0xff] }
 0x2e8   : > { %v3502_v14 = vld [vmem:[#allocation2 + $0x138] sm:$0xff]  ;;  %v4024_v51 = vld [vmem:[#allocation2 + $0xa] sm:$0xff]  ;;  %v10007_v23 = vpack.c.bf16 %v3559_v61, %v3558_v2  ;;  %v4023_v58 = vld [vmem:[#allocation2 + $0x2] sm:$0xff] }
 0x2e9   : > { %v3504_v48 = vld [vmem:[#allocation2 + $0x150] sm:$0xff]  ;;  %v10009_v30 = vpack.c.bf16 %v3503_v52, %v3502_v14  ;;  %v3505_v36 = vld [vmem:[#allocation2 + $0x158] sm:$0xff]  ;;  %v4055_v17 = vpack.c.bf16 %v4024_v51, %v4023_v58  ;;  %v4026_v16 = vld [vmem:[#allocation2 + $0x22] sm:$0xff] }
 0x2ea   : > { %v10013_v33 = vpack.c.bf16 %v3505_v36, %v3504_v48  ;;  %v3506_v63 = vld [vmem:[#allocation2 + $0x168] sm:$0xff]  ;;  %v4025_v22 = vld [vmem:[#allocation2 + $0x1a] sm:$0xff]  ;;  %v3507_v62 = vld [vmem:[#allocation2 + $0x170] sm:$0xff] }
 0x2eb   : > { %v4028_v4 = vld [vmem:[#allocation2 + $0x3a] sm:$0xff]  ;;  %v10020_v44 = vpack.c.bf16 %v4026_v16, %v4025_v22  ;;  %v10022_v55 = vpack.c.bf16 %v3507_v62, %v3506_v63  ;;  %v4027_v45 = vld [vmem:[#allocation2 + $0x32] sm:$0xff]  ;;  %v10041_v59 = vld [vmem:[%s11270_s3 + $0x68] sm:$0xff]  }
 0x2ec   : > { %7687 = vmatmul.mubr.msk.bf16.gmra.mxu0 %vm257_vm0, %v9954_v20  ;;  %7659 = vmatmul.mubr.msk.bf16.gmra.mxu1 %vm257_vm0, %v9973_v28  ;;  %v8026_v9 = vld [vmem:[%s11270_s3 + $0x40] sm:$0xff]   ;;  %v10029_v6 = vpack.c.bf16 %v4028_v4, %v4027_v45  ;;  %v4030_v8 = vld [vmem:[#allocation2 + $0x52] sm:$0xff]  ;;  %v4032_v37 = vld [vmem:[#allocation2 + $0x6a] sm:$0xff] }
 0x2ed   : > { %7690 = vmatprep.mubr.msk.bf16.mxu0 %vm257_vm0, %v9961_v31  ;;  %7662 = vmatprep.mubr.msk.bf16.mxu1 %vm257_vm0, %v9978_v24  ;;  %v4029_v34 = vld [vmem:[#allocation2 + $0x4a] sm:$0xff]  ;;  %v4031_v5 = vld [vmem:[#allocation2 + $0x62] sm:$0xff]  ;;  %v10063_v46 = vld [vmem:[%s11270_s3 + $0x78] sm:$0xff]  }
 0x2ee   : > { %v10043_v7 = vpack.c.bf16 %v4030_v8, %v4029_v34  ;;  %v4034_v19 = vld [vmem:[#allocation2 + $0x82] sm:$0xff]  ;;  %v4036_v32 = vld [vmem:[#allocation2 + $0x9a] sm:$0xff]  ;;  %v4035_v26 = vld [vmem:[#allocation2 + $0x92] sm:$0xff] }
 0x2ef   : > { %v4033_v21 = vld [vmem:[#allocation2 + $0x7a] sm:$0xff]  ;;  %v10067_v35 = vpack.c.bf16 %v4036_v32, %v4035_v26  ;;  %v4040_v10 = vld [vmem:[#allocation2 + $0xca] sm:$0xff]  ;;  %v4039_v14 = vld [vmem:[#allocation2 + $0xc2] sm:$0xff] }
 0x2f0   : > { %v10065_v13 = vpack.c.bf16 %v4034_v19, %v4033_v21  ;;  %v4037_v2 = vld [vmem:[#allocation2 + $0xaa] sm:$0xff]  ;;  %v10080_v51 = vpack.c.bf16 %v4040_v10, %v4039_v14  ;;  %v4042_v48 = vld [vmem:[#allocation2 + $0xe2] sm:$0xff]  ;;  %v4044_v52 = vld [vmem:[#allocation2 + $0xfa] sm:$0xff] }
 0x2f1   : > { %v4041_v58 = vld [vmem:[#allocation2 + $0xda] sm:$0xff]  ;;  %v4046_v63 = vld [vmem:[#allocation2 + $0x112] sm:$0xff]  ;;  %v4048_v22 = vld [vmem:[#allocation2 + $0x12a] sm:$0xff] }
 0x2f2   : > { %v10090_v36 = vpack.c.bf16 %v4042_v48, %v4041_v58  ;;  %v4045_v4 = vld [vmem:[#allocation2 + $0x10a] sm:$0xff]  ;;  %v4047_v45 = vld [vmem:[#allocation2 + $0x122] sm:$0xff]  ;;  %v4049_v34 = vld [vmem:[#allocation2 + $0x13a] sm:$0xff] }
 0x2f3   : > { %v4066_v62 = vpack.c.bf16 %v4046_v63, %v4045_v4  ;;  %v4050_v8 = vld [vmem:[#allocation2 + $0x142] sm:$0xff]  ;;  %v4054_v32 = vld [vmem:[#allocation2 + $0x172] sm:$0xff]  ;;  %v4053_v21 = vld [vmem:[#allocation2 + $0x16a] sm:$0xff] }
 0x2f4   : > { %7691 = vmatmul.mubr.msk.bf16.gmra.mxu0 %vm257_vm0, %v9976_v50  ;;  %7663 = vmatmul.mubr.msk.bf16.gmra.mxu1 %vm257_vm0, %v9990_v27  ;;  %v4070_v26 = vpack.c.bf16 %v4054_v32, %v4053_v21  ;;  %v4360_v10 = vld [vmem:[#allocation2 + $0x188] sm:$0xff]  ;;  %v8030_v14 = vld [vmem:[%s11270_s3 + $0x60] sm:$0xff]   ;;  %v5564_v32 = vld [vmem:[#allocation2 + $0xb1] sm:$0xff] }
 0x2f5   : > { %7694 = vmatprep.mubr.msk.bf16.mxu0 %vm257_vm0, %v9982_v60  ;;  %7666 = vmatprep.mubr.msk.bf16.mxu1 %vm257_vm0, %v9994_v40  ;;  %v5560_v58 = vld [vmem:[#allocation2 + $0x81] sm:$0xff] }
 0x2fc   : > { %7695 = vmatmul.mubr.msk.bf16.gmra.mxu0 %vm257_vm0, %v9992_v54  ;;  %7667 = vmatmul.mubr.msk.bf16.gmra.mxu1 %vm257_vm0, %v10007_v23 }
 0x2fd   : > { %7698 = vmatprep.mubr.msk.bf16.mxu0 %vm257_vm0, %v9998_v25  ;;  %7710 = vmatprep.mubr.msk.bf16.mxu1 %vm257_vm0, %v4055_v17  ;;  %v4043_v17 = vld [vmem:[#allocation2 + $0xf2] sm:$0xff] }
 0x2fe   : > { %v10092_v16 = vpack.c.bf16 %v4044_v52, %v4043_v17  ;;  %v5559_v52 = vld [vmem:[#allocation2 + $0x79] sm:$0xff] }
 0x2ff   : > { %v5562_v17 = vld [vmem:[#allocation2 + $0x99] sm:$0xff]  ;;  %v5588_v4 = vpack.c.bf16 %v5560_v58, %v5559_v52  ;;  %v5571_v52 = vld [vmem:[#allocation2 + $0x109] sm:$0xff]  ;;  %v5572_v58 = vld [vmem:[#allocation2 + $0x111] sm:$0xff] }
 0x304   : > { %7699 = vmatmul.mubr.msk.bf16.gmra.mxu0 %vm257_vm0, %v10009_v30  ;;  %7711 = vmatmul.mubr.msk.bf16.vlgmr.msra.gmra.mxu1 %vm257_vm0, %v10020_v44 }
 0x305   : > { %7702 = vmatprep.mubr.msk.bf16.mxu0 %vm257_vm0, %v10013_v33  ;;  %7779 = vmatpush3.bf16.msra.mxu1 %v9867_v42  ;;  %v10046_v42 = vpack.c.bf16 %v4032_v37, %v4031_v5  ;;  %v4052_v37 = vld [vmem:[#allocation2 + $0x15a] sm:$0xff]  ;;  %v4068_v5 = vpack.c.bf16 %v4050_v8, %v4049_v34 }
 0x306   : > { %7714 = vmatprep.mubr.msk.bf16.mxu1 %vm257_vm0, %v10029_v6  ;;  %7780 = vmatprep.subr.bf16.mxu1 %v8026_v9 }
 0x309   : > { %7781 = vmatpush3.bf16.msra.mxu1 %v8026_v9  ;;  %v4067_v9 = vpack.c.bf16 %v4048_v22, %v4047_v45 }
 0x30a   : > { %7850 = vmatprep.subr.bf16.mxu1 %v10041_v59 }
 0x30c   : > { %7703 = vmatmul.mubr.msk.bf16.gmra.mxu0 %vm257_vm0, %v10022_v55  ;;  %7715 = vmatmul.mubr.msk.bf16.gmra.mxu1 %vm257_vm0, %v10043_v7 }
 0x30d   : > { %7746 = vmatprep.mubr.msk.bf16.mxu0 %vm257_vm0, %v9878_v53  ;;  %v8029_v53 = vld [vmem:[%s11270_s3 + $0x50] sm:$0xff]   ;;  %7718 = vmatprep.mubr.msk.bf16.mxu1 %vm257_vm0, %v10046_v42 }
 0x314   : > { %7747 = vmatmul.mubr.msk.bf16.vlgmr.msra.gmra.mxu0 %vm257_vm0, %v9885_v3  ;;  %7719 = vmatmul.mubr.msk.bf16.gmra.mxu1 %vm257_vm0, %v10065_v13 }
 0x315   : > { %7750 = vmatprep.mubr.msk.bf16.mxu0 %vm257_vm0, %v9905_v11  ;;  %7815 = vmatpush3.bf16.msra.mxu0 %v9899_v18  ;;  %v4038_v18 = vld [vmem:[#allocation2 + $0xb2] sm:$0xff] }
 0x316   : > { %7816 = vmatprep.subr.bf16.mxu0 %v8029_v53  ;;  %7722 = vmatprep.mubr.msk.bf16.mxu1 %vm257_vm0, %v10067_v35  ;;  %v10078_v61 = vpack.c.bf16 %v4038_v18, %v4037_v2  ;;  %v4359_v18 = vld [vmem:[#allocation2 + $0x180] sm:$0xff] }
 0x317   : > { %v10121_v2 = vpack.c.bf16 %v4360_v10, %v4359_v18 }
 0x319   : > { %7817 = vmatpush3.bf16.msra.mxu0 %v8029_v53  ;;  %v4051_v53 = vld [vmem:[#allocation2 + $0x152] sm:$0xff] }
 0x31a   : > { %7886 = vmatprep.subr.bf16.mxu0 %v10063_v46  ;;  %v4069_v19 = vpack.c.bf16 %v4052_v37, %v4051_v53 }
 0x31c   : > { %7751 = vmatmul.mubr.msk.bf16.gmra.mxu0 %vm257_vm0, %v9913_v41  ;;  %7723 = vmatmul.mubr.msk.bf16.gmra.mxu1 %vm257_vm0, %v10078_v61 }
 0x31d   : > { %7754 = vmatprep.mubr.msk.bf16.mxu0 %vm257_vm0, %v9931_v38  ;;  %7726 = vmatprep.mubr.msk.bf16.mxu1 %vm257_vm0, %v10080_v51 }
 0x324   : > { %7755 = vmatmul.mubr.msk.bf16.gmra.mxu0 %vm257_vm0, %v9938_v47  ;;  %7727 = vmatmul.mubr.msk.bf16.gmra.mxu1 %vm257_vm0, %v10090_v36 }
 0x325   : > { %7758 = vmatprep.mubr.msk.bf16.mxu0 %vm257_vm0, %v9954_v20  ;;  %7730 = vmatprep.mubr.msk.bf16.mxu1 %vm257_vm0, %v10092_v16 }
 0x32c   : > { %7759 = vmatmul.mubr.msk.bf16.gmra.mxu0 %vm257_vm0, %v9961_v31  ;;  %7731 = vmatmul.mubr.msk.bf16.gmra.mxu1 %vm257_vm0, %v4066_v62 }
 0x32d   : > { %7762 = vmatprep.mubr.msk.bf16.mxu0 %vm257_vm0, %v9976_v50  ;;  %7734 = vmatprep.mubr.msk.bf16.mxu1 %vm257_vm0, %v4067_v9 }
 0x334   : > { %7763 = vmatmul.mubr.msk.bf16.gmra.mxu0 %vm257_vm0, %v9982_v60  ;;  %7735 = vmatmul.mubr.msk.bf16.gmra.mxu1 %vm257_vm0, %v4068_v5 }
 0x335   : > { %7766 = vmatprep.mubr.msk.bf16.mxu0 %vm257_vm0, %v9992_v54  ;;  %7738 = vmatprep.mubr.msk.bf16.mxu1 %vm257_vm0, %v4069_v19 }
 0x33c   : > { %7767 = vmatmul.mubr.msk.bf16.gmra.mxu0 %vm257_vm0, %v9998_v25  ;;  %7739 = vmatmul.mubr.msk.bf16.gmra.mxu1 %vm257_vm0, %v4070_v26 }
 0x33d   : > { %7770 = vmatprep.mubr.msk.bf16.mxu0 %vm257_vm0, %v10009_v30  ;;  %7782 = vmatprep.mubr.msk.bf16.mxu1 %vm257_vm0, %v9847_v12  ;;  %v8032_v12 = vld [vmem:[%s11270_s3 + $0x88] sm:$0xff]  }
 0x344   : > { %7771 = vmatmul.mubr.msk.bf16.gmra.mxu0 %vm257_vm0, %v10013_v33  ;;  %7783 = vmatmul.mubr.msk.bf16.vlgmr.msra.gmra.mxu1 %vm257_vm0, %v9854_v57  ;;  %v8033_v57 = vld [vmem:[%s11270_s3 + $0x70] sm:$0xff]  }
 0x345   : > { %7774 = vmatprep.mubr.msk.bf16.mxu0 %vm257_vm0, %v10022_v55  ;;  %7851 = vmatpush3.bf16.msra.mxu1 %v10041_v59  ;;  %v5558_v59 = vld [vmem:[#allocation2 + $0x69] sm:$0xff] }
 0x346   : > { %7786 = vmatprep.mubr.msk.bf16.mxu1 %vm257_vm0, %v9871_v39  ;;  %7852 = vmatprep.subr.bf16.mxu1 %v8030_v14  ;;  %v4665_v39 = vld [vmem:[#allocation2 + $0x181] sm:$0xff] }
 0x349   : > { %7853 = vmatpush3.bf16.msra.mxu1 %v8030_v14 }
 0x34a   : > { %7922 = vmatprep.subr.bf16.mxu1 %v8032_v12 }
 0x34c   : > { %7775 = vmatmul.mubr.msk.bf16.gmra.mxu0 %vm257_vm0, %v10121_v2  ;;  %7787 = vmatmul.mubr.msk.bf16.gmra.mxu1 %vm257_vm0, %v9880_v1  ;;  %v4666_v1 = vld [vmem:[#allocation2 + $0x189] sm:$0xff] }
 0x34d   : > { %7818 = vmatprep.mubr.msk.bf16.mxu0 %vm257_vm0, %v10020_v44  ;;  %7790 = vmatprep.mubr.msk.bf16.mxu1 %vm257_vm0, %v9903_v56  ;;  %v10187_v56 = vpack.c.bf16 %v4666_v1, %v4665_v39  ;;  %v5556_v44 = vld [vmem:[#allocation2 + $0x51] sm:$0xff] }
 0x354   : > { %7819 = vmatmul.mubr.msk.bf16.vlgmr.msra.gmra.mxu0 %vm257_vm0, %v10029_v6  ;;  %7791 = vmatmul.mubr.msk.bf16.gmra.mxu1 %vm257_vm0, %v9907_v0  ;;  %v4972_v0 = vld [vmem:[#allocation2 + $0x18a] sm:$0xff]  ;;  %v5557_v6 = vld [vmem:[#allocation2 + $0x61] sm:$0xff] }
 0x355   : > { %7822 = vmatprep.mubr.msk.bf16.mxu0 %vm257_vm0, %v10043_v7  ;;  %7887 = vmatpush3.bf16.msra.mxu0 %v10063_v46  ;;  %v5587_v46 = vpack.c.bf16 %v5558_v59, %v5557_v6 }
 0x356   : > { %7888 = vmatprep.subr.bf16.mxu0 %v8033_v57  ;;  %7794 = vmatprep.mubr.msk.bf16.mxu1 %vm257_vm0, %v9927_v49  ;;  %v5553_v49 = vld [vmem:[#allocation2 + $0x31] sm:$0xff] }
 0x359   : > { %7889 = vmatpush3.bf16.msra.mxu0 %v8033_v57 }
 0x35c   : > { %7823 = vmatmul.mubr.msk.bf16.gmra.mxu0 %vm257_vm0, %v10046_v42  ;;  %7795 = vmatmul.mubr.msk.bf16.gmra.mxu1 %vm257_vm0, %v9933_v15  ;;  %v5554_v15 = vld [vmem:[#allocation2 + $0x39] sm:$0xff] }
 0x35d   : > { %7826 = vmatprep.mubr.msk.bf16.mxu0 %vm257_vm0, %v10065_v13  ;;  %7798 = vmatprep.mubr.msk.bf16.mxu1 %vm257_vm0, %v9952_v29  ;;  %v4971_v29 = vld [vmem:[#allocation2 + $0x182] sm:$0xff] }
 0x364   : > { %7827 = vmatmul.mubr.msk.bf16.gmra.mxu0 %vm257_vm0, %v10067_v35  ;;  %7799 = vmatmul.mubr.msk.bf16.gmra.mxu1 %vm257_vm0, %v9956_v43  ;;  %v10195_v43 = vpack.c.bf16 %v4972_v0, %v4971_v29 }
 0x365   : > { %7830 = vmatprep.mubr.msk.bf16.mxu0 %vm257_vm0, %v10078_v61  ;;  %7802 = vmatprep.mubr.msk.bf16.mxu1 %vm257_vm0, %v9973_v28  ;;  %v8034_v28 = vld [vmem:[%s11270_s3 + $0x80] sm:$0xff]  }
 0x36c   : > { %7831 = vmatmul.mubr.msk.bf16.gmra.mxu0 %vm257_vm0, %v10080_v51  ;;  %7803 = vmatmul.mubr.msk.bf16.gmra.mxu1 %vm257_vm0, %v9978_v24 }
 0x36d   : > { %7834 = vmatprep.mubr.msk.bf16.mxu0 %vm257_vm0, %v10090_v36  ;;  %7806 = vmatprep.mubr.msk.bf16.mxu1 %vm257_vm0, %v9990_v27  ;;  %v5585_v27 = vpack.c.bf16 %v5554_v15, %v5553_v49 }
 0x374   : > { %7835 = vmatmul.mubr.msk.bf16.gmra.mxu0 %vm257_vm0, %v10092_v16  ;;  %7807 = vmatmul.mubr.msk.bf16.gmra.mxu1 %vm257_vm0, %v9994_v40 }
 0x375   : > { %7838 = vmatprep.mubr.msk.bf16.mxu0 %vm257_vm0, %v4066_v62  ;;  %7810 = vmatprep.mubr.msk.bf16.mxu1 %vm257_vm0, %v10007_v23  ;;  %v5555_v23 = vld [vmem:[#allocation2 + $0x49] sm:$0xff] }
 0x37c   : > { %7839 = vmatmul.mubr.msk.bf16.gmra.mxu0 %vm257_vm0, %v4067_v9  ;;  %7811 = vmatmul.mubr.msk.bf16.gmra.mxu1 %vm257_vm0, %v10187_v56 }
 0x37d   : > { %7842 = vmatprep.mubr.msk.bf16.mxu0 %vm257_vm0, %v4068_v5  ;;  %7854 = vmatprep.mubr.msk.bf16.mxu1 %vm257_vm0, %v9885_v3 }
 0x384   : > { %7843 = vmatmul.mubr.msk.bf16.gmra.mxu0 %vm257_vm0, %v4069_v19  ;;  %v7640_v24 = vpop.f32.mrf.mxu1  ;;  %7855 = vmatmul.mubr.msk.bf16.vlgmr.msra.gmra.mxu1 %vm257_vm0, %v9905_v11  ;;  %v5586_v11 = vpack.c.bf16 %v5556_v44, %v5555_v23  ;;  %v5563_v19 = vld [vmem:[#allocation2 + $0xa9] sm:$0xff] }
 0x385   : > { %7846 = vmatprep.mubr.msk.bf16.mxu0 %vm257_vm0, %v4070_v26  ;;  %7923 = vmatpush3.bf16.msra.mxu1 %v8032_v12  ;;  %v5566_v26 = vld [vmem:[#allocation2 + $0xc9] sm:$0xff]  ;;  %v5590_v12 = vpack.c.bf16 %v5564_v32, %v5563_v19 }
 0x386   : > { %7858 = vmatprep.mubr.msk.bf16.mxu1 %vm257_vm0, %v9913_v41  ;;  %v3675_v3 = vpop.f32.mrf.mxu1  ;;  %7924 = vmatprep.subr.bf16.mxu1 %v8034_v28 }
 0x388   : > { %v7641_v40 = vpop.f32.mrf.mxu1 }
 0x389   : > { %7925 = vmatpush3.bf16.msra.mxu1 %v8034_v28 }
 0x38a   : > { %v3678_v7 = vpop.f32.mrf.mxu1 }
 0x38c   : > { %7847 = vmatmul.mubr.msk.bf16.gmra.mxu0 %vm257_vm0, %v10195_v43  ;;  %v7644_v42 = vpop.f32.mrf.mxu1  ;;  %7859 = vmatmul.mubr.msk.bf16.gmra.mxu1 %vm257_vm0, %v9931_v38  ;;  %v5561_v38 = vld [vmem:[#allocation2 + $0x91] sm:$0xff] }
 0x38d   : > { %7890 = vmatprep.mubr.msk.bf16.mxu0 %vm257_vm0, %v5585_v27  ;;  %7862 = vmatprep.mubr.msk.bf16.mxu1 %vm257_vm0, %v9938_v47  ;;  %v5589_v45 = vpack.c.bf16 %v5562_v17, %v5561_v38  ;;  %v5568_v27 = vld [vmem:[#allocation2 + $0xe1] sm:$0xff]  ;;  %v5574_v38 = vld [vmem:[#allocation2 + $0x129] sm:$0xff] }
 0x38e   : > { %v3691_v35 = vpop.f32.mrf.mxu1 }
 0x390   : > { %v7645_v48 = vpop.f32.mrf.mxu1 }
 0x392   : > { %v3694_v63 = vpop.f32.mrf.mxu1 }
 0x394   : > { %v7676_v13 = vpop.f32.mrf.mxu0  ;;  %7891 = vmatmul.mubr.msk.bf16.vlgmr.msra.gmra.mxu0 %vm257_vm0, %v5586_v11  ;;  %v7648_v62 = vpop.f32.mrf.mxu1  ;;  %7863 = vmatmul.mubr.msk.bf16.gmra.mxu1 %vm257_vm0, %v9954_v20  ;;  %v5565_v20 = vld [vmem:[#allocation2 + $0xc1] sm:$0xff] }
 0x395   : > { %v10212_v41 = vadd.f32 %v7676_v13, %v7640_v24  ;;  %7894 = vmatprep.mubr.msk.bf16.mxu0 %vm257_vm0, %v5587_v46  ;;  %7866 = vmatprep.mubr.msk.bf16.mxu1 %vm257_vm0, %v9961_v31  ;;  %v5591_v39 = vpack.c.bf16 %v5566_v26, %v5565_v20  ;;  %v5567_v24 = vld [vmem:[#allocation2 + $0xd9] sm:$0xff]  ;;  %v5576_v20 = vld [vmem:[#allocation2 + $0x141] sm:$0xff] }
 0x396   : > { %v3896_v61 = vpop.f32.mrf.mxu0  ;;  %v3707_v37 = vpop.f32.mrf.mxu1  ;;  %v5592_v59 = vpack.c.bf16 %v5568_v27, %v5567_v24 }
 0x397   : > { %v10215_v51 = vadd.f32 %v3896_v61, %v3675_v3 }
 0x398   : > { %v7677_v36 = vpop.f32.mrf.mxu0  ;;  %v7649_v53 = vpop.f32.mrf.mxu1 }
 0x399   : > { %v10217_v16 = vadd.f32 %v7677_v36, %v7641_v40  ;;  %v5570_v40 = vld [vmem:[#allocation2 + $0xf9] sm:$0xff] }
 0x39a   : > { %v3899_v22 = vpop.f32.mrf.mxu0  ;;  %v3710_v10 = vpop.f32.mrf.mxu1 }
 0x39b   : > { %v10219_v47 = vadd.f32 %v3899_v22, %v3678_v7 }
 0x39c   : > { %v7680_v9 = vpop.f32.mrf.mxu0  ;;  %7895 = vmatmul.mubr.msk.bf16.gmra.mxu0 %vm257_vm0, %v5588_v4  ;;  %v7652_v57 = vpop.f32.mrf.mxu1  ;;  %7867 = vmatmul.mubr.msk.bf16.gmra.mxu1 %vm257_vm0, %v9976_v50  ;;  %v5569_v50 = vld [vmem:[#allocation2 + $0xf1] sm:$0xff]  ;;  %v5594_v4 = vpack.c.bf16 %v5572_v58, %v5571_v52 }
 0x39d   : > { %v10226_v8 = vadd.f32 %v7680_v9, %v7644_v42  ;;  %7898 = vmatprep.mubr.msk.bf16.mxu0 %vm257_vm0, %v5589_v45  ;;  %7870 = vmatprep.mubr.msk.bf16.mxu1 %vm257_vm0, %v9982_v60  ;;  %v5593_v11 = vpack.c.bf16 %v5570_v40, %v5569_v50 }
 0x39e   : > { %v3912_v34 = vpop.f32.mrf.mxu0  ;;  %v3723_v49 = vpop.f32.mrf.mxu1 }
 0x39f   : > { %v10229_v5 = vadd.f32 %v3912_v34, %v3691_v35 }
 0x3a0   : > { %v7681_v21 = vpop.f32.mrf.mxu0  ;;  %v7653_v28 = vpop.f32.mrf.mxu1 }
 0x3a1   : > { %v10231_v18 = vadd.f32 %v7681_v21, %v7645_v48  ;;  %v5575_v21 = vld [vmem:[#allocation2 + $0x139] sm:$0xff] }
 0x3a2   : > { %v3915_v14 = vpop.f32.mrf.mxu0  ;;  %v3726_v44 = vpop.f32.mrf.mxu1 }
 0x3a3   : > { %v10233_v31 = vadd.f32 %v3915_v14, %v3694_v63 }
 0x3a4   : > { %v7684_v1 = vpop.f32.mrf.mxu0  ;;  %7899 = vmatmul.mubr.msk.bf16.gmra.mxu0 %vm257_vm0, %v5590_v12  ;;  %v7656_v7 = vpop.f32.mrf.mxu1  ;;  %7871 = vmatmul.mubr.msk.bf16.gmra.mxu1 %vm257_vm0, %v9992_v54  ;;  %v5573_v54 = vld [vmem:[#allocation2 + $0x121] sm:$0xff] }
 0x3a5   : > { %v10240_v0 = vadd.f32 %v7684_v1, %v7648_v62  ;;  %7902 = vmatprep.mubr.msk.bf16.mxu0 %vm257_vm0, %v5591_v39  ;;  %7874 = vmatprep.mubr.msk.bf16.mxu1 %vm257_vm0, %v9998_v25  ;;  %v5595_v45 = vpack.c.bf16 %v5574_v38, %v5573_v54  ;;  %v5596_v39 = vpack.c.bf16 %v5576_v20, %v5575_v21  ;;  %v5861_v21 = vld [vmem:[#allocation2 + $0x4a] sm:$0xff] }
 0x3a6   : > { %v3928_v15 = vpop.f32.mrf.mxu0  ;;  %v3739_v13 = vpop.f32.mrf.mxu1 }
 0x3a7   : > { %v10243_v29 = vadd.f32 %v3928_v15, %v3707_v37 }
 0x3a8   : > { %v7685_v3 = vpop.f32.mrf.mxu0  ;;  %v7657_v48 = vpop.f32.mrf.mxu1 }
 0x3a9   : > { %v10245_v23 = vadd.f32 %v7685_v3, %v7649_v53  ;;  %v5277_v3 = vld [vmem:[#allocation2 + $0x198] sm:$0xff] }
 0x3aa   : > { %v3931_v6 = vpop.f32.mrf.mxu0  ;;  %v3742_v63 = vpop.f32.mrf.mxu1 }
 0x3ab   : > { %v10247_v60 = vadd.f32 %v3931_v6, %v3710_v10  ;;  %v5578_v10 = vld [vmem:[#allocation2 + $0x159] sm:$0xff]  ;;  %v5580_v6 = vld [vmem:[#allocation2 + $0x171] sm:$0xff] }
 0x3ac   : > { %v7688_v42 = vpop.f32.mrf.mxu0  ;;  %7903 = vmatmul.mubr.msk.bf16.gmra.mxu0 %vm257_vm0, %v5592_v59  ;;  %v7660_v62 = vpop.f32.mrf.mxu1  ;;  %7875 = vmatmul.mubr.msk.bf16.gmra.mxu1 %vm257_vm0, %v10009_v30  ;;  %v5577_v30 = vld [vmem:[#allocation2 + $0x151] sm:$0xff] }
 0x3ad   : > { %v10254_v46 = vadd.f32 %v7688_v42, %v7652_v57  ;;  %7906 = vmatprep.mubr.msk.bf16.mxu0 %vm257_vm0, %v5593_v11  ;;  %7878 = vmatprep.mubr.msk.bf16.mxu1 %vm257_vm0, %v10013_v33 }
 0x3ae   : > { %v3944_v35 = vpop.f32.mrf.mxu0  ;;  %v3755_v34 = vpop.f32.mrf.mxu1 }
 0x3af   : > { %v10257_v61 = vadd.f32 %v3944_v35, %v3723_v49  ;;  %v5597_v49 = vpack.c.bf16 %v5578_v10, %v5577_v30  ;;  %v5863_v10 = vld [vmem:[#allocation2 + $0x62] sm:$0xff] }
 0x3b0   : > { %v7689_v36 = vpop.f32.mrf.mxu0  ;;  %v7661_v32 = vpop.f32.mrf.mxu1 }
 0x3b1   : > { %v10259_v17 = vadd.f32 %v7689_v36, %v7653_v28 }
 0x3b2   : > { %v3947_v22 = vpop.f32.mrf.mxu0  ;;  %v3758_v12 = vpop.f32.mrf.mxu1 }
 0x3b3   : > { %v10261_v25 = vadd.f32 %v3947_v22, %v3726_v44  ;;  %v5579_v44 = vld [vmem:[#allocation2 + $0x169] sm:$0xff] }
 0x3b4   : > { %v7692_v9 = vpop.f32.mrf.mxu0  ;;  %7907 = vmatmul.mubr.msk.bf16.gmra.mxu0 %vm257_vm0, %v5594_v4  ;;  %v7664_v1 = vpop.f32.mrf.mxu1  ;;  %7879 = vmatmul.mubr.msk.bf16.gmra.mxu1 %vm257_vm0, %v10022_v55  ;;  %v5860_v55 = vld [vmem:[#allocation2 + $0x3a] sm:$0xff]  ;;  %v5862_v4 = vld [vmem:[#allocation2 + $0x52] sm:$0xff] }
 0x3b5   : > { %v10268_v37 = vadd.f32 %v7692_v9, %v7656_v7  ;;  %7910 = vmatprep.mubr.msk.bf16.mxu0 %vm257_vm0, %v5595_v45  ;;  %7882 = vmatprep.mubr.msk.bf16.mxu1 %vm257_vm0, %v10121_v2  ;;  %v5278_v7 = vld [vmem:[#allocation2 + $0x1a0] sm:$0xff]  ;;  %v5859_v2 = vld [vmem:[#allocation2 + $0x32] sm:$0xff]  ;;  %v5892_v30 = vpack.c.bf16 %v5862_v4, %v5861_v21  ;;  %v5872_v21 = vld [vmem:[#allocation2 + $0xca] sm:$0xff] }
 0x3b6   : > { %v3960_v53 = vpop.f32.mrf.mxu0  ;;  %v3771_v24 = vpop.f32.mrf.mxu1  ;;  %v5891_v52 = vpack.c.bf16 %v5860_v55, %v5859_v2  ;;  %v5583_v9 = vld [vmem:[#allocation2 + $0x199] sm:$0xff] }
 0x3b7   : > { %v10271_v19 = vadd.f32 %v3960_v53, %v3739_v13  ;;  %v5294_v13 = vpack.c.bf16 %v5278_v7, %v5277_v3  ;;  %v5864_v53 = vld [vmem:[#allocation2 + $0x6a] sm:$0xff] }
 0x3b8   : > { %v7693_v26 = vpop.f32.mrf.mxu0  ;;  %v7665_v40 = vpop.f32.mrf.mxu1 }
 0x3b9   : > { %v10273_v14 = vadd.f32 %v7693_v26, %v7657_v48  ;;  %v5598_v48 = vpack.c.bf16 %v5580_v6, %v5579_v44  ;;  %v5866_v44 = vld [vmem:[#allocation2 + $0x82] sm:$0xff] }
 0x3ba   : > { %v3963_v57 = vpop.f32.mrf.mxu0  ;;  %v3774_v42 = vpop.f32.mrf.mxu1 }
 0x3bb   : > { %v10275_v33 = vadd.f32 %v3963_v57, %v3742_v63 }
 0x3bc   : > { %v7696_v15 = vpop.f32.mrf.mxu0  ;;  %7911 = vmatmul.mubr.msk.bf16.gmra.mxu0 %vm257_vm0, %v5596_v39  ;;  %v7668_v36 = vpop.f32.mrf.mxu1  ;;  %7883 = vmatmul.mubr.msk.bf16.gmra.mxu1 %vm257_vm0, %v5294_v13  ;;  %v5893_v39 = vpack.c.bf16 %v5864_v53, %v5863_v10  ;;  %v5865_v13 = vld [vmem:[#allocation2 + $0x7a] sm:$0xff]  ;;  %v5870_v53 = vld [vmem:[#allocation2 + $0xb2] sm:$0xff]  ;;  %v5869_v10 = vld [vmem:[#allocation2 + $0xaa] sm:$0xff] }
 0x3bd   : > { %v10282_v28 = vadd.f32 %v7696_v15, %v7660_v62  ;;  %7914 = vmatprep.mubr.msk.bf16.mxu0 %vm257_vm0, %v5597_v49  ;;  %7926 = vmatprep.mubr.msk.bf16.mxu1 %vm257_vm0, %v5891_v52 }
 0x3be   : > { %v3976_v27 = vpop.f32.mrf.mxu0  ;;  %v3787_v63 = vpop.f32.mrf.mxu1 }
 0x3bf   : > { %v10285_v50 = vadd.f32 %v3976_v27, %v3755_v34  ;;  %v5584_v34 = vld [vmem:[#allocation2 + $0x1a1] sm:$0xff] }
 0x3c0   : > { %v7697_v59 = vpop.f32.mrf.mxu0  ;;  %v7669_v45 = vpop.f32.mrf.mxu1  ;;  %v5600_v57 = vpack.c.bf16 %v5584_v34, %v5583_v9 }
 0x3c1   : > { %v10287_v11 = vadd.f32 %v7697_v59, %v7661_v32  ;;  %v5868_v59 = vld [vmem:[#allocation2 + $0x9a] sm:$0xff] }
 0x3c2   : > { %v3979_v35 = vpop.f32.mrf.mxu0  ;;  %v3790_v26 = vpop.f32.mrf.mxu1 }
 0x3c3   : > { %v10289_v58 = vadd.f32 %v3979_v35, %v3758_v12  ;;  %v5894_v35 = vpack.c.bf16 %v5866_v44, %v5865_v13  ;;  %v5876_v13 = vld [vmem:[#allocation2 + $0xfa] sm:$0xff] }
 0x3c4   : > { %v7700_v54 = vpop.f32.mrf.mxu0  ;;  %7915 = vmatmul.mubr.msk.bf16.gmra.mxu0 %vm257_vm0, %v5598_v48  ;;  %7927 = vmatmul.mubr.msk.bf16.vlgmr.msra.gmra.mxu1 %vm257_vm0, %v5892_v30  ;;  %v5867_v48 = vld [vmem:[#allocation2 + $0x92] sm:$0xff] }
 0x3c5   : > { %v10294_v38 = vadd.f32 %v7700_v54, %v7664_v1  ;;  %7918 = vmatprep.mubr.msk.bf16.mxu0 %vm257_vm0, %v10187_v56  ;;  %v7712_v1 = vpop.f32.mrf.mxu1  ;;  %7930 = vmatprep.mubr.msk.bf16.mxu1 %vm257_vm0, %v5893_v39  ;;  %v5895_v54 = vpack.c.bf16 %v5868_v59, %v5867_v48  ;;  %v5871_v39 = vld [vmem:[#allocation2 + $0xc2] sm:$0xff]  ;;  %v5873_v48 = vld [vmem:[#allocation2 + $0xda] sm:$0xff] }
 0x3c6   : > { %v3992_v22 = vpop.f32.mrf.mxu0  ;;  %v4299_v15 = vadd.f32 %v7712_v1, %v10212_v41 }
 0x3c7   : > { %v10298_v62 = vadd.f32 %v3992_v22, %v3771_v24  ;;  %v4170_v27 = vpop.f32.mrf.mxu1 }
 0x3c8   : > { %v7701_v32 = vpop.f32.mrf.mxu0 }
 0x3c9   : > { %v10300_v20 = vadd.f32 %v7701_v32, %v7665_v40  ;;  %v4297_v40 = vadd.f32 %v4170_v27, %v10215_v51  ;;  %v7713_v55 = vpop.f32.mrf.mxu1 }
 0x3ca   : > { %v3995_v12 = vpop.f32.mrf.mxu0 }
 0x3cb   : > { %v10302_v56 = vadd.f32 %v3995_v12, %v3774_v42  ;;  %v4300_v42 = vadd.f32 %v7713_v55, %v10217_v16  ;;  %v4173_v2 = vpop.f32.mrf.mxu1 }
 0x3cc   : > { %v7704_v49 = vpop.f32.mrf.mxu0  ;;  %7919 = vmatmul.mubr.msk.bf16.gmra.mxu0 %vm257_vm0, %v5600_v57  ;;  %7931 = vmatmul.mubr.msk.bf16.gmra.mxu1 %vm257_vm0, %v5894_v35  ;;  %v5896_v57 = vpack.c.bf16 %v5870_v53, %v5869_v10  ;;  %v5880_v10 = vld [vmem:[#allocation2 + $0x12a] sm:$0xff] }
 0x3cd   : > { %v10308_v24 = vadd.f32 %v7704_v49, %v7668_v36  ;;  %v4298_v36 = vadd.f32 %v4173_v2, %v10219_v47  ;;  %v7716_v51 = vpop.f32.mrf.mxu1  ;;  %7934 = vmatprep.mubr.msk.bf16.mxu1 %vm257_vm0, %v5895_v54  ;;  %v5875_v54 = vld [vmem:[#allocation2 + $0xf2] sm:$0xff] }
 0x3ce   : > { %v4008_v3 = vpop.f32.mrf.mxu0 }
 0x3cf   : > { %v10311_v6 = vadd.f32 %v4008_v3, %v3787_v63  ;;  %v4303_v63 = vadd.f32 %v7716_v51, %v10226_v8 }
 0x3d0   : > { %v7705_v7 = vpop.f32.mrf.mxu0 }
 0x3d1   : > { %v10314_v41 = vadd.f32 %v7705_v7, %v7669_v45  ;;  %v4186_v45 = vpop.f32.mrf.mxu1  ;;  %v5874_v7 = vld [vmem:[#allocation2 + $0xe2] sm:$0xff] }
 0x3d2   : > { %v4011_v52 = vpop.f32.mrf.mxu0  ;;  %v4301_v9 = vadd.f32 %v4186_v45, %v10229_v5 }
 0x3d3   : > { %v10317_v22 = vadd.f32 %v4011_v52, %v3790_v26  ;;  %v7717_v47 = vpop.f32.mrf.mxu1 }
 0x3d4   : > { %v7748_v4 = vpop.f32.mrf.mxu0  ;;  %v4304_v26 = vadd.f32 %v7717_v47, %v10231_v18  ;;  %7935 = vmatmul.mubr.msk.bf16.gmra.mxu1 %vm257_vm0, %v5896_v57 }
 0x3d5   : > { %v10322_v16 = vadd.f32 %v7748_v4, %v4299_v15  ;;  %v4189_v8 = vpop.f32.mrf.mxu1  ;;  %v5897_v15 = vpack.c.bf16 %v5872_v21, %v5871_v39  ;;  %v5899_v4 = vpack.c.bf16 %v5876_v13, %v5875_v54  ;;  %v5877_v39 = vld [vmem:[#allocation2 + $0x10a] sm:$0xff]  ;;  %v5881_v54 = vld [vmem:[#allocation2 + $0x13a] sm:$0xff] }
 0x3d6   : > { %v4476_v34 = vpop.f32.mrf.mxu0  ;;  %v4302_v1 = vadd.f32 %v4189_v8, %v10233_v31 }
 0x3d7   : > { %v10325_v32 = vadd.f32 %v4476_v34, %v4297_v40  ;;  %v7720_v27 = vpop.f32.mrf.mxu1  ;;  %7938 = vmatprep.mubr.msk.bf16.mxu1 %vm257_vm0, %v5897_v15  ;;  %v5879_v15 = vld [vmem:[#allocation2 + $0x122] sm:$0xff] }
 0x3d8   : > { %v7749_v30 = vpop.f32.mrf.mxu0  ;;  %v4307_v3 = vadd.f32 %v7720_v27, %v10240_v0 }
 0x3d9   : > { %v10328_v12 = vadd.f32 %v7749_v30, %v4300_v42  ;;  %v4202_v44 = vpop.f32.mrf.mxu1 }
 0x3da   : > { %v4479_v49 = vpop.f32.mrf.mxu0  ;;  %v4305_v55 = vadd.f32 %v4202_v44, %v10243_v29 }
 0x3db   : > { %v10331_v5 = vadd.f32 %v4479_v49, %v4298_v36  ;;  %v7721_v42 = vpop.f32.mrf.mxu1  ;;  %v5898_v36 = vpack.c.bf16 %v5874_v7, %v5873_v48  ;;  %v5884_v48 = vld [vmem:[#allocation2 + $0x15a] sm:$0xff] }
 0x3dc   : > { %v7752_v40 = vpop.f32.mrf.mxu0  ;;  %v4308_v2 = vadd.f32 %v7721_v42, %v10245_v23 }
 0x3dd   : > { %v10336_v18 = vadd.f32 %v7752_v40, %v4303_v63  ;;  %v4205_v0 = vpop.f32.mrf.mxu1  ;;  %7939 = vmatmul.mubr.msk.bf16.gmra.mxu1 %vm257_vm0, %v5898_v36  ;;  %v5901_v40 = vpack.c.bf16 %v5880_v10, %v5879_v15 }
 0x3de   : > { %v4492_v59 = vpop.f32.mrf.mxu0  ;;  %v4306_v51 = vadd.f32 %v4205_v0, %v10247_v60  ;;  %7942 = vmatprep.mubr.msk.bf16.mxu1 %vm257_vm0, %v5899_v4  ;;  %v5883_v4 = vld [vmem:[#allocation2 + $0x152] sm:$0xff] }
 0x3df   : > { %v10339_v31 = vadd.f32 %v4492_v59, %v4301_v9  ;;  %v7724_v45 = vpop.f32.mrf.mxu1 }
 0x3e0   : > { %v7753_v35 = vpop.f32.mrf.mxu0  ;;  %v4311_v9 = vadd.f32 %v7724_v45, %v10254_v46 }
 0x3e1   : > { %v10342_v52 = vadd.f32 %v7753_v35, %v4304_v26  ;;  %v4218_v53 = vpop.f32.mrf.mxu1  ;;  %v5878_v26 = vld [vmem:[#allocation2 + $0x112] sm:$0xff] }
 0x3e2   : > { %v4495_v63 = vpop.f32.mrf.mxu0  ;;  %v4309_v47 = vadd.f32 %v4218_v53, %v10257_v61  ;;  %v5900_v49 = vpack.c.bf16 %v5878_v26, %v5877_v39 }
 0x3e3   : > { %v10345_v29 = vadd.f32 %v4495_v63, %v4302_v1  ;;  %v7725_v30 = vpop.f32.mrf.mxu1 }
 0x3e4   : > { %v7756_v34 = vpop.f32.mrf.mxu0  ;;  %v4312_v8 = vadd.f32 %v7725_v30, %v10259_v17 }
 0x3e5   : > { %v10350_v23 = vadd.f32 %v7756_v34, %v4307_v3  ;;  %v4221_v46 = vpop.f32.mrf.mxu1  ;;  %7943 = vmatmul.mubr.msk.bf16.gmra.mxu1 %vm257_vm0, %v5900_v49  ;;  %v5903_v34 = vpack.c.bf16 %v5884_v48, %v5883_v4  ;;  %v5885_v49 = vld [vmem:[#allocation2 + $0x16a] sm:$0xff] }
 0x3e6   : > { %v4508_v21 = vpop.f32.mrf.mxu0  ;;  %v4310_v27 = vadd.f32 %v4221_v46, %v10261_v25  ;;  %7946 = vmatprep.mubr.msk.bf16.mxu1 %vm257_vm0, %v5901_v40 }
 0x3e7   : > { %v10353_v60 = vadd.f32 %v4508_v21, %v4305_v55  ;;  %v7728_v44 = vpop.f32.mrf.mxu1 }
 0x3e8   : > { %v7757_v57 = vpop.f32.mrf.mxu0  ;;  %v4315_v55 = vadd.f32 %v7728_v44, %v10268_v37 }
 0x3e9   : > { %v10356_v1 = vadd.f32 %v7757_v57, %v4308_v2  ;;  %v4234_v7 = vpop.f32.mrf.mxu1  ;;  %v5882_v2 = vld [vmem:[#allocation2 + $0x142] sm:$0xff] }
 0x3ea   : > { %v4511_v3 = vpop.f32.mrf.mxu0  ;;  %v4313_v42 = vadd.f32 %v4234_v7, %v10271_v19  ;;  %v5902_v63 = vpack.c.bf16 %v5882_v2, %v5881_v54  ;;  %v5890_v2 = vld [vmem:[#allocation2 + $0x1a2] sm:$0xff] }
 0x3eb   : > { %v10359_v61 = vadd.f32 %v4511_v3, %v4306_v51  ;;  %v7729_v35 = vpop.f32.mrf.mxu1 }
 0x3ec   : > { %v7760_v59 = vpop.f32.mrf.mxu0  ;;  %v4316_v0 = vadd.f32 %v7729_v35, %v10273_v14 }
 0x3ed   : > { %v10364_v17 = vadd.f32 %v7760_v59, %v4311_v9  ;;  %v4237_v37 = vpop.f32.mrf.mxu1  ;;  %7947 = vmatmul.mubr.msk.bf16.gmra.mxu1 %vm257_vm0, %v5902_v63 }
 0x3ee   : > { %v4524_v13 = vpop.f32.mrf.mxu0  ;;  %v4314_v45 = vadd.f32 %v4237_v37, %v10275_v33  ;;  %7950 = vmatprep.mubr.msk.bf16.mxu1 %vm257_vm0, %v5903_v34 }
 0x3ef   : > { %v10367_v25 = vadd.f32 %v4524_v13, %v4309_v47  ;;  %v7732_v53 = vpop.f32.mrf.mxu1 }
 0x3f0   : > { %v7761_v36 = vpop.f32.mrf.mxu0  ;;  %v4319_v47 = vadd.f32 %v7732_v53, %v10282_v28 }
 0x3f1   : > { %v10370_v51 = vadd.f32 %v7761_v36, %v4312_v8  ;;  %v4250_v26 = vpop.f32.mrf.mxu1  ;;  %v5886_v8 = vld [vmem:[#allocation2 + $0x172] sm:$0xff]  ;;  %v5889_v36 = vld [vmem:[#allocation2 + $0x19a] sm:$0xff] }
 0x3f2   : > { %v4527_v9 = vpop.f32.mrf.mxu0  ;;  %v4317_v30 = vadd.f32 %v4250_v26, %v10285_v50  ;;  %v5906_v37 = vpack.c.bf16 %v5890_v2, %v5889_v36 }
 0x3f3   : > { %v10373_v19 = vadd.f32 %v4527_v9, %v4310_v27  ;;  %v7733_v57 = vpop.f32.mrf.mxu1  ;;  %v5904_v27 = vpack.c.bf16 %v5886_v8, %v5885_v49 }
 0x3f4   : > { %v7764_v21 = vpop.f32.mrf.mxu0  ;;  %v4320_v39 = vadd.f32 %v7733_v57, %v10287_v11 }
 0x3f5   : > { %v10378_v14 = vadd.f32 %v7764_v21, %v4315_v55  ;;  %v4253_v28 = vpop.f32.mrf.mxu1  ;;  %7951 = vmatmul.mubr.msk.bf16.gmra.mxu1 %vm257_vm0, %v5904_v27 }
 0x3f6   : > { %v4540_v10 = vpop.f32.mrf.mxu0  ;;  %v4318_v3 = vadd.f32 %v4253_v28, %v10289_v58  ;;  %7954 = vmatprep.mubr.msk.bf16.mxu1 %vm257_vm0, %v10195_v43 }
 0x3f7   : > { %v10381_v33 = vadd.f32 %v4540_v10, %v4313_v42  ;;  %v7736_v55 = vpop.f32.mrf.mxu1 }
 0x3f8   : > { %v7765_v46 = vpop.f32.mrf.mxu0  ;;  %v4323_v50 = vadd.f32 %v7736_v55, %v10294_v38 }
 0x3f9   : > { %v10384_v15 = vadd.f32 %v7765_v46, %v4316_v0  ;;  %v4266_v7 = vpop.f32.mrf.mxu1 }
 0x3fa   : > { %v4543_v40 = vpop.f32.mrf.mxu0  ;;  %v4321_v42 = vadd.f32 %v4266_v7, %v10298_v62 }
 0x3fb   : > { %v10387_v44 = vadd.f32 %v4543_v40, %v4314_v45  ;;  %v7737_v35 = vpop.f32.mrf.mxu1 }
 0x3fc   : > { %v7768_v59 = vpop.f32.mrf.mxu0  ;;  %v4324_v48 = vadd.f32 %v7737_v35, %v10300_v20 }
 0x3fd   : > { %v10393_v11 = vadd.f32 %v7768_v59, %v4319_v47  ;;  %v4269_v38 = vpop.f32.mrf.mxu1  ;;  %7955 = vmatmul.mubr.msk.bf16.gmra.mxu1 %vm257_vm0, %v5906_v37 }
 0x3fe   : > { %v4556_v13 = vpop.f32.mrf.mxu0  ;;  %v4322_v43 = vadd.f32 %v4269_v38, %v10302_v56 }
 0x3ff   : > { %v10396_v58 = vadd.f32 %v4556_v13, %v4317_v30  ;;  %v7740_v45 = vpop.f32.mrf.mxu1 }
 0x400   : > { %v7769_v0 = vpop.f32.mrf.mxu0  ;;  %v4327_v62 = vadd.f32 %v7740_v45, %v10308_v24 }
 0x401   : > { %v10399_v54 = vadd.f32 %v7769_v0, %v4320_v39  ;;  %v4282_v20 = vpop.f32.mrf.mxu1 }
 0x402   : > { %v4559_v63 = vpop.f32.mrf.mxu0  ;;  %v4325_v53 = vadd.f32 %v4282_v20, %v10311_v6 }
 0x403   : > { %v10402_v4 = vadd.f32 %v4559_v63, %v4318_v3  ;;  %v7741_v26 = vpop.f32.mrf.mxu1 }
 0x404   : > { %v7772_v9 = vpop.f32.mrf.mxu0  ;;  %v4328_v56 = vadd.f32 %v7741_v26, %v10314_v41 }
 0x405   : > { %v10406_v34 = vadd.f32 %v7772_v9, %v4323_v50  ;;  %v4285_v8 = vpop.f32.mrf.mxu1 }
 0x406   : > { %v4572_v47 = vpop.f32.mrf.mxu0  ;;  %v4326_v57 = vadd.f32 %v4285_v8, %v10317_v22 }
 0x407   : > { %v10409_v21 = vadd.f32 %v4572_v47, %v4321_v42  ;;  %v7784_v46 = vpop.f32.mrf.mxu1 }
 0x408   : > { %v7773_v30 = vpop.f32.mrf.mxu0  ;;  %v4911_v28 = vadd.f32 %v7784_v46, %v10322_v16 }
 0x409   : > { %v10412_v10 = vadd.f32 %v7773_v30, %v4324_v48  ;;  %v4782_v27 = vpop.f32.mrf.mxu1 }
 0x40a   : > { %v4575_v39 = vpop.f32.mrf.mxu0  ;;  %v4909_v40 = vadd.f32 %v4782_v27, %v10325_v32 }
 0x40b   : > { %v10415_v24 = vadd.f32 %v4575_v39, %v4322_v43  ;;  %v7785_v55 = vpop.f32.mrf.mxu1 }
 0x40c   : > { %v7776_v49 = vpop.f32.mrf.mxu0  ;;  %v4912_v59 = vadd.f32 %v7785_v55, %v10328_v12 }
 0x40d   : > { %v10418_v6 = vadd.f32 %v7776_v49, %v4327_v62  ;;  %v4785_v7 = vpop.f32.mrf.mxu1 }
 0x40e   : > { %v4588_v3 = vpop.f32.mrf.mxu0  ;;  %v10427_v13 = vadd.f32 %v4785_v7, %v10331_v5 }
 0x40f   : > { %v10421_v41 = vadd.f32 %v4588_v3, %v4325_v53  ;;  %v7788_v2 = vpop.f32.mrf.mxu1 }
 0x410   : > { %v7777_v50 = vpop.f32.mrf.mxu0  ;;  %v4915_v35 = vadd.f32 %v7788_v2, %v10336_v18 }
 0x411   : > { %v10424_v22 = vadd.f32 %v7777_v50, %v4328_v56  ;;  %v4798_v0 = vpop.f32.mrf.mxu1 }
 0x412   : > { %v4591_v42 = vpop.f32.mrf.mxu0  ;;  %v10435_v36 = vadd.f32 %v4798_v0, %v10339_v31 }
 0x413   : > { %v10429_v16 = vadd.f32 %v4591_v42, %v4326_v57  ;;  %v7789_v37 = vpop.f32.mrf.mxu1 }
 0x414   : > { %v7820_v48 = vpop.f32.mrf.mxu0  ;;  %v4916_v43 = vadd.f32 %v7789_v37, %v10342_v52 }
 0x415   : > { %v10432_v32 = vadd.f32 %v7820_v48, %v4911_v28  ;;  %v4801_v45 = vpop.f32.mrf.mxu1 }
 0x416   : > { %v5088_v12 = vpop.f32.mrf.mxu0  ;;  %v10443_v62 = vadd.f32 %v4801_v45, %v10345_v29 }
 0x417   : > { %v10437_v38 = vadd.f32 %v5088_v12, %v4909_v40  ;;  %v7792_v9 = vpop.f32.mrf.mxu1 }
 0x418   : > { %v7821_v5 = vpop.f32.mrf.mxu0  ;;  %v4919_v20 = vadd.f32 %v7792_v9, %v10350_v23 }
 0x419   : > { %v10440_v63 = vadd.f32 %v7821_v5, %v4912_v59  ;;  %v4814_v47 = vpop.f32.mrf.mxu1 }
 0x41a   : > { %v10445_v18 = vpop.f32.mrf.mxu0  ;;  %v10451_v26 = vadd.f32 %v4814_v47, %v10353_v60 }
 0x41b   : > { %v7793_v56 = vpop.f32.mrf.mxu1 }
 0x41c   : > { %v7824_v31 = vpop.f32.mrf.mxu0  ;;  %v4920_v30 = vadd.f32 %v7793_v56, %v10356_v1 }
 0x41d   : > { %v10448_v53 = vadd.f32 %v7824_v31, %v4915_v35  ;;  %v4817_v57 = vpop.f32.mrf.mxu1 }
 0x41e   : > { %v10453_v52 = vpop.f32.mrf.mxu0  ;;  %v10459_v39 = vadd.f32 %v4817_v57, %v10359_v61 }
 0x41f   : > { %v7796_v46 = vpop.f32.mrf.mxu1 }
 0x420   : > { %v7825_v8 = vpop.f32.mrf.mxu0  ;;  %v4923_v49 = vadd.f32 %v7796_v46, %v10364_v17 }
 0x421   : > { %v10456_v29 = vadd.f32 %v7825_v8, %v4916_v43  ;;  %v4830_v27 = vpop.f32.mrf.mxu1 }
 0x422   : > { %v10461_v23 = vpop.f32.mrf.mxu0  ;;  %v10467_v3 = vadd.f32 %v4830_v27, %v10367_v25 }
 0x423   : > { %v7797_v40 = vpop.f32.mrf.mxu1 }
 0x424   : > { %v7828_v28 = vpop.f32.mrf.mxu0  ;;  %v4924_v55 = vadd.f32 %v7797_v40, %v10370_v51 }
 0x425   : > { %v10464_v60 = vadd.f32 %v7828_v28, %v4919_v20  ;;  %v4833_v59 = vpop.f32.mrf.mxu1 }
 0x426   : > { %v10469_v1 = vpop.f32.mrf.mxu0  ;;  %v10475_v7 = vadd.f32 %v4833_v59, %v10373_v19 }
 0x427   : > { %v7800_v42 = vpop.f32.mrf.mxu1 }
 0x428   : > { %v7829_v50 = vpop.f32.mrf.mxu0  ;;  %v4927_v2 = vadd.f32 %v7800_v42, %v10378_v14 }
 0x429   : > { %v10472_v61 = vadd.f32 %v7829_v50, %v4920_v30  ;;  %v4846_v48 = vpop.f32.mrf.mxu1 }
 0x42a   : > { %v10477_v17 = vpop.f32.mrf.mxu0  ;;  %v10483_v0 = vadd.f32 %v4846_v48, %v10381_v33 }
 0x42b   : > { %v7801_v12 = vpop.f32.mrf.mxu1 }
 0x42c   : > { %v7832_v35 = vpop.f32.mrf.mxu0  ;;  %v4928_v37 = vadd.f32 %v7801_v12, %v10384_v15 }
 0x42d   : > { %v10480_v25 = vadd.f32 %v7832_v35, %v4923_v49  ;;  %v4849_v5 = vpop.f32.mrf.mxu1 }
 0x42e   : > { %v10485_v51 = vpop.f32.mrf.mxu0  ;;  %v10491_v45 = vadd.f32 %v4849_v5, %v10387_v44 }
 0x42f   : > { %v7804_v9 = vpop.f32.mrf.mxu1 }
 0x430   : > { %v7833_v43 = vpop.f32.mrf.mxu0  ;;  %v4931_v20 = vadd.f32 %v7804_v9, %v10393_v11 }
 0x431   : > { %v10488_v19 = vadd.f32 %v7833_v43, %v4924_v55  ;;  %v4862_v47 = vpop.f32.mrf.mxu1 }
 0x432   : > { %v10493_v14 = vpop.f32.mrf.mxu0  ;;  %v10499_v56 = vadd.f32 %v4862_v47, %v10396_v58 }
 0x433   : > { %v7805_v30 = vpop.f32.mrf.mxu1 }
 0x434   : > { %v7836_v31 = vpop.f32.mrf.mxu0  ;;  %11437 = vst [vmem:[#allocation54_spill] sm:$0xff] %v10499_v56  ;;  %v4932_v8 = vadd.f32 %v7805_v30, %v10399_v54 }
 0x435   : > { %v10496_v33 = vadd.f32 %v7836_v31, %v4927_v2  ;;  %v4865_v46 = vpop.f32.mrf.mxu1 }
 0x436   : > { %v10501_v15 = vpop.f32.mrf.mxu0  ;;  %v10507_v49 = vadd.f32 %v4865_v46, %v10402_v4 }
 0x437   : > { %v7808_v28 = vpop.f32.mrf.mxu1 }
 0x438   : > { %v7837_v57 = vpop.f32.mrf.mxu0  ;;  %11438 = vst [vmem:[#allocation44_spill] sm:$0xff] %v10507_v49  ;;  %v4935_v27 = vadd.f32 %v7808_v28, %v10406_v34 }
 0x439   : > { %v10504_v44 = vadd.f32 %v7837_v57, %v4928_v37  ;;  %v4878_v55 = vpop.f32.mrf.mxu1 }
 0x43a   : > { %v10509_v11 = vpop.f32.mrf.mxu0  ;;  %v10515_v50 = vadd.f32 %v4878_v55, %v10409_v21 }
 0x43b   : > { %v7809_v59 = vpop.f32.mrf.mxu1 }
 0x43c   : > { %v7840_v40 = vpop.f32.mrf.mxu0  ;;  %11439 = vst [vmem:[#allocation71_spill] sm:$0xff] %v10515_v50  ;;  %v4936_v42 = vadd.f32 %v7809_v59, %v10412_v10 }
 0x43d   : > { %v10512_v58 = vadd.f32 %v7840_v40, %v4931_v20  ;;  %v4881_v35 = vpop.f32.mrf.mxu1 }
 0x43e   : > { %v10517_v54 = vpop.f32.mrf.mxu0  ;;  %v10523_v48 = vadd.f32 %v4881_v35, %v10415_v24 }
 0x43f   : > { %11440 = vst [vmem:[#allocation69_spill] sm:$0xff] %v10517_v54  ;;  %v7812_v12 = vpop.f32.mrf.mxu1 }
 0x440   : > { %v7841_v2 = vpop.f32.mrf.mxu0  ;;  %11441 = vst [vmem:[#allocation79_spill] sm:$0xff] %v10523_v48  ;;  %v4939_v37 = vadd.f32 %v7812_v12, %v10418_v6 }
 0x441   : > { %v10520_v4 = vadd.f32 %v7841_v2, %v4932_v8  ;;  %v4894_v5 = vpop.f32.mrf.mxu1 }
 0x442   : > { %v10525_v34 = vpop.f32.mrf.mxu0  ;;  %v10531_v9 = vadd.f32 %v4894_v5, %v10421_v41 }
 0x443   : > { %11442 = vst [vmem:[#allocation46_spill] sm:$0xff] %v10525_v34  ;;  %v7813_v20 = vpop.f32.mrf.mxu1 }
 0x444   : > { %v7844_v43 = vpop.f32.mrf.mxu0  ;;  %11443 = vst [vmem:[#allocation52_spill] sm:$0xff] %v10531_v9  ;;  %v4940_v31 = vadd.f32 %v7813_v20, %v10424_v22 }
 0x445   : > { %v10528_v21 = vadd.f32 %v7844_v43, %v4935_v27  ;;  %v4897_v30 = vpop.f32.mrf.mxu1 }
 0x446   : > { %v10533_v10 = vpop.f32.mrf.mxu0  ;;  %v10539_v8 = vadd.f32 %v4897_v30, %v10429_v16 }
 0x447   : > { %11444 = vst [vmem:[#allocation56_spill] sm:$0xff] %v10533_v10  ;;  %v7856_v57 = vpop.f32.mrf.mxu1 }
 0x448   : > { %v7845_v47 = vpop.f32.mrf.mxu0  ;;  %11445 = vst [vmem:[#allocation70_spill] sm:$0xff] %v10539_v8  ;;  %v10544_v28 = vadd.f32 %v7856_v57, %v10432_v32 }
 0x449   : > { %v10536_v24 = vadd.f32 %v7845_v47, %v4936_v42  ;;  %v5394_v27 = vpop.f32.mrf.mxu1 }
 0x44a   : > { %v10541_v6 = vpop.f32.mrf.mxu0  ;;  %v10549_v22 = vadd.f32 %v5394_v27, %v10437_v38 }
 0x44b   : > { %11446 = vst [vmem:[#allocation53_spill] sm:$0xff] %v10541_v6  ;;  %v7857_v55 = vpop.f32.mrf.mxu1 }
 0x44c   : > { %v7848_v46 = vpop.f32.mrf.mxu0  ;;  %v10552_v42 = vadd.f32 %v7857_v55, %v10440_v63 }
 0x44d   : > { %v5245_v41 = vadd.f32 %v7848_v46, %v4939_v37  ;;  %v10554_v2 = vpop.f32.mrf.mxu1 }
 0x44e   : > { %v10546_v40 = vpop.f32.mrf.mxu0 }
 0x44f   : > { %11447 = vst [vmem:[#allocation73_spill] sm:$0xff] %v10546_v40  ;;  %v7860_v12 = vpop.f32.mrf.mxu1 }
 0x450   : > { %v7849_v59 = vpop.f32.mrf.mxu0  ;;  %v10559_v32 = vadd.f32 %v7860_v12, %v10448_v53 }
 0x451   : > { %v5246_v16 = vadd.f32 %v7849_v59, %v4940_v31  ;;  %v10563_v43 = vpop.f32.mrf.mxu1 }
 0x452   : > { %v10556_v35 = vpop.f32.mrf.mxu0 }
 0x453   : > { %11448 = vst [vmem:[#allocation38_spill] sm:$0xff] %v10556_v35  ;;  %v7861_v5 = vpop.f32.mrf.mxu1 }
 0x454   : > { %v10561_v37 = vpop.f32.mrf.mxu0  ;;  %v10566_v20 = vadd.f32 %v7861_v5, %v10456_v29 }
 0x455   : > { %v10568_v47 = vpop.f32.mrf.mxu1 }
 0x456   : > { %v5700_v38 = vpop.f32.mrf.mxu0 }
 0x457   : > { %v7864_v30 = vpop.f32.mrf.mxu1 }
 0x458   : > { %v7893_v63 = vpop.f32.mrf.mxu0  ;;  %v10571_v57 = vadd.f32 %v7864_v30, %v10464_v60 }
 0x459   : > { %v10575_v53 = vpop.f32.mrf.mxu1 }
 0x45a   : > { %v5703_v31 = vpop.f32.mrf.mxu0 }
 0x45b   : > { %v7865_v55 = vpop.f32.mrf.mxu1 }
 0x45c   : > { %v10573_v46 = vpop.f32.mrf.mxu0  ;;  %v10580_v59 = vadd.f32 %v7865_v55, %v10472_v61 }
 0x45d   : > { %v10584_v12 = vpop.f32.mrf.mxu1 }
 0x45e   : > { %v10577_v27 = vpop.f32.mrf.mxu0 }
 0x45f   : > { %v7868_v5 = vpop.f32.mrf.mxu1 }
 0x460   : > { %v10582_v29 = vpop.f32.mrf.mxu0  ;;  %v10587_v35 = vadd.f32 %v7868_v5, %v10480_v25 }
 0x461   : > { %v10591_v30 = vpop.f32.mrf.mxu1 }
 0x462   : > { %v10589_v60 = vpop.f32.mrf.mxu0 }
 0x463   : > { %v7869_v8 = vpop.f32.mrf.mxu1 }
 0x464   : > { %v10594_v40 = vadd.f32 %v7869_v8, %v10488_v19  ;;  %v10596_v9 = vpop.f32.mrf.mxu0 }
 0x465   : > { %v10598_v61 = vpop.f32.mrf.mxu1 }
 0x466   : > { %v10603_v48 = vpop.f32.mrf.mxu0 }
 0x467   : > { %v7872_v55 = vpop.f32.mrf.mxu1 }
 0x468   : > { %v10601_v6 = vadd.f32 %v7872_v55, %v10496_v33  ;;  %v10610_v50 = vpop.f32.mrf.mxu0 }
 0x469   : > { %v10605_v25 = vpop.f32.mrf.mxu1 }
 0x46a   : > { %11449 = vst [vmem:[#allocation40_spill] sm:$0xff] %v10601_v6  ;;  %v10617_v49 = vpop.f32.mrf.mxu0 }
 0x46b   : > { %v7873_v5 = vpop.f32.mrf.mxu1 }
 0x46c   : > { %v10608_v10 = vadd.f32 %v7873_v5, %v10504_v44  ;;  %v10624_v56 = vpop.f32.mrf.mxu0 }
 0x46d   : > { %v10612_v19 = vpop.f32.mrf.mxu1 }
 0x46e   : > { %11450 = vst [vmem:[#allocation58_spill] sm:$0xff] %v10608_v10  ;;  %11451 = vst [vmem:[#allocation45_spill] sm:$0xff] %v10612_v19  ;;  %v10631_v6 = vpop.f32.mrf.mxu0 }
 0x46f   : > { %v7876_v8 = vpop.f32.mrf.mxu1 }
 0x470   : > { %v10615_v34 = vadd.f32 %v7876_v8, %v10512_v58 }
 0x471   : > { %v10619_v33 = vpop.f32.mrf.mxu1 }
 0x472   : > { %11452 = vst [vmem:[#allocation75_spill] sm:$0xff] %v10615_v34  ;;  %11453 = vst [vmem:[#allocation72_spill] sm:$0xff] %v10619_v33  ;;  %v10638_v33 = vpop.f32.mrf.mxu0 }
 0x473   : > { %v7877_v55 = vpop.f32.mrf.mxu1 }
 0x474   : > { %v10622_v54 = vadd.f32 %v7877_v55, %v10520_v4 }
 0x475   : > { %v10626_v44 = vpop.f32.mrf.mxu1 }
 0x476   : > { %11454 = vst [vmem:[#allocation48_spill] sm:$0xff] %v10622_v54  ;;  %11455 = vst [vmem:[#allocation55_spill] sm:$0xff] %v10626_v44  ;;  %v10644_v44 = vpop.f32.mrf.mxu0 }
 0x477   : > { %v7880_v5 = vpop.f32.mrf.mxu1 }
 0x478   : > { %v10629_v10 = vadd.f32 %v7880_v5, %v10528_v21 }
 0x479   : > { %v10633_v58 = vpop.f32.mrf.mxu1 }
 0x47a   : > { %11456 = vst [vmem:[#allocation60_spill] sm:$0xff] %v10629_v10  ;;  %11457 = vst [vmem:[#allocation74_spill] sm:$0xff] %v10633_v58  ;;  %v10650_v10 = vpop.f32.mrf.mxu0 }
 0x47b   : > { %v7881_v8 = vpop.f32.mrf.mxu1  ;;  %11463 = vst [vmem:[#allocation47_spill] sm:$0xff] %v10650_v10 }
 0x47c   : > { %v10636_v34 = vadd.f32 %v7881_v8, %v10536_v24  ;;  %v5216_v8 = vadd.f32 %v10445_v18, %v10427_v13  ;;  %v10670_v18 = vld [vmem:[%s11271_s4] ss:$0 sm:$0xff] }
 0x47d   : > { %v10640_v4 = vpop.f32.mrf.mxu1 }
 0x47e   : > { %11458 = vst [vmem:[#allocation57_spill] sm:$0xff] %v10636_v34  ;;  %11459 = vst [vmem:[#allocation77_spill] sm:$0xff] %v10640_v4  ;;  %v5827_v34 = vadd.f32 %v5700_v38, %v10549_v22  ;;  %v10657_v4 = vpop.f32.mrf.mxu0 }
 0x47f   : > { %v7884_v55 = vpop.f32.mrf.mxu1 }
 0x480   : > { %v10642_v54 = vadd.f32 %v7884_v55, %v5245_v41  ;;  %v5522_v55 = vadd.f32 %v10554_v2, %v5216_v8  ;;  %v10665_v13 = vpop.f32.mrf.mxu0 }
 0x481   : > { %v10646_v19 = vpop.f32.mrf.mxu1 }
 0x482   : > { %11460 = vst [vmem:[#allocation39_spill] sm:$0xff] %v10642_v54  ;;  %11461 = vst [vmem:[#allocation42_spill] sm:$0xff] %v10646_v19  ;;  %v5829_v54 = vadd.f32 %v10561_v37, %v10544_v28  ;;  %v5828_v19 = vadd.f32 %v5703_v31, %v5522_v55  ;;  %v10688_v31 = vpop.f32.mrf.mxu0 }
 0x483   : > { %v7885_v21 = vpop.f32.mrf.mxu1 }
 0x484   : > { %v10648_v5 = vadd.f32 %v7885_v21, %v5246_v16  ;;  %v10707_v55 = vpop.f32.mrf.mxu0 }
 0x485   : > { %v10652_v58 = vpop.f32.mrf.mxu1 }
 0x486   : > { %11462 = vst [vmem:[#allocation62_spill] sm:$0xff] %v10648_v5  ;;  %11464 = vst [vmem:[#allocation80_spill] sm:$0xff] %v10652_v58  ;;  %v5219_v5 = vadd.f32 %v10453_v52, %v10435_v36  ;;  %v5830_v58 = vadd.f32 %v7893_v63, %v10552_v42  ;;  %v5220_v36 = vadd.f32 %v10461_v23, %v10443_v62 }
 0x487   : > { %v7928_v24 = vpop.f32.mrf.mxu1 }
 0x488   : > { %v6135_v10 = vadd.f32 %v7928_v24, %v5829_v54  ;;  %v5525_v2 = vadd.f32 %v10563_v43, %v5219_v5  ;;  %v5526_v63 = vadd.f32 %v10568_v47, %v5220_v36  ;;  %v5833_v43 = vadd.f32 %v10573_v46, %v10559_v32 }
 0x489   : > { %v6006_v41 = vpop.f32.mrf.mxu1  ;;  %v5834_v47 = vadd.f32 %v10582_v29, %v10566_v20 }
 0x48a   : > { %v6133_v16 = vadd.f32 %v6006_v41, %v5827_v34  ;;  %v5831_v54 = vadd.f32 %v10577_v27, %v5525_v2  ;;  %v10680_v42 = vadd.f32 %v10670_v18, %v6135_v10  ;;  %v5832_v5 = vadd.f32 %v10589_v60, %v5526_v63 }
 0x48b   : > { %v7929_v21 = vpop.f32.mrf.mxu1  ;;  %v5224_v60 = vadd.f32 %v10477_v17, %v10459_v39  ;;  %v5837_v39 = vadd.f32 %v10596_v9, %v10571_v57 }
 0x48c   : > { %v10674_v34 = vadd.f32 %v10670_v18, %v6133_v16  ;;  %v6136_v28 = vadd.f32 %v7929_v21, %v5830_v58  ;;  %v5223_v58 = vadd.f32 %v10469_v1, %v10451_v26  ;;  %v6207_v24 = vsel %vm257_vm0, %v10680_v42, 0.0 }
 0x48d   : > { %v6009_v22 = vpop.f32.mrf.mxu1 }
 0x48e   : > { %v6134_v37 = vadd.f32 %v6009_v22, %v5828_v19  ;;  %v6204_v62 = vsel %vm257_vm0, %v10674_v34, 0.0  ;;  %v10693_v23 = vadd.f32 %v10670_v18, %v6136_v28  ;;  %v5529_v26 = vadd.f32 %v10575_v53, %v5223_v58 }
 0x48f   : > { %v7932_v52 = vpop.f32.mrf.mxu1 }
 0x490   : > { %v10683_v38 = vadd.f32 %v10670_v18, %v6134_v37  ;;  %v6139_v8 = vadd.f32 %v7932_v52, %v5833_v43  ;;  %v6209_v1 = vsel %vm257_vm0, %v10693_v23, 0.0  ;;  %v5835_v28 = vadd.f32 %v10603_v48, %v5529_v26 }
 0x491   : > { %v6022_v19 = vpop.f32.mrf.mxu1  ;;  %v5530_v52 = vadd.f32 %v10584_v12, %v5224_v60  ;;  %v5838_v12 = vadd.f32 %v10610_v50, %v10580_v59 }
 0x492   : > { %v6205_v10 = vsel %vm257_vm0, %v10683_v38, 0.0  ;;  %v6137_v27 = vadd.f32 %v6022_v19, %v5831_v54  ;;  %v10716_v37 = vadd.f32 %v10670_v18, %v6139_v8  ;;  %v10724_v54 = vpop.f32.mrf.mxu0 }
 0x493   : > { %v6206_v32 = vadd.f32 %v6205_v10, %v6204_v62  ;;  %v7933_v46 = vpop.f32.mrf.mxu1  ;;  %v5227_v62 = vadd.f32 %v10485_v51, %v10467_v3  ;;  %v5836_v58 = vadd.f32 %v10617_v49, %v5530_v52  ;;  %v5228_v49 = vadd.f32 %v10493_v14, %v10475_v7 }
 0x494   : > { %v10705_v41 = vadd.f32 %v10670_v18, %v6137_v27  ;;  %v6140_v20 = vadd.f32 %v7933_v46, %v5834_v47  ;;  %v6215_v9 = vsel %vm257_vm0, %v10716_v37, 0.0  ;;  %v5841_v7 = vadd.f32 %v10624_v56, %v10587_v35 }
 0x495   : > { %v6208_v16 = vadd.f32 %v6207_v24, %v6206_v32  ;;  %v6025_v21 = vpop.f32.mrf.mxu1  ;;  %v10743_v32 = vpop.f32.mrf.mxu0  ;;  %v5533_v3 = vadd.f32 %v10591_v30, %v5227_v62 }
 0x496   : > { %v6138_v29 = vadd.f32 %v6025_v21, %v5832_v5  ;;  %v6211_v36 = vsel %vm257_vm0, %v10705_v41, 0.0  ;;  %v10729_v17 = vadd.f32 %v10670_v18, %v6140_v20 }
 0x497   : > { %v6210_v22 = vadd.f32 %v6209_v1, %v6208_v16  ;;  %v7936_v2 = vpop.f32.mrf.mxu1  ;;  %v5839_v16 = vadd.f32 %v10631_v6, %v5533_v3  ;;  %v5534_v1 = vadd.f32 %v10598_v61, %v5228_v49  ;;  %v10760_v20 = vpop.f32.mrf.mxu0  ;;  %v5842_v61 = vadd.f32 %v10638_v33, %v10594_v40  ;;  %v11466_v3 = vld [vmem:[#allocation40_spill] sm:$0xff]  ;;  %v11469_v49 = vld [vmem:[#allocation69_spill] sm:$0xff] }
 0x498   : > { %v10721_v53 = vadd.f32 %v10670_v18, %v6138_v29  ;;  %v6143_v57 = vadd.f32 %v7936_v2, %v5837_v39  ;;  %v6217_v51 = vsel %vm257_vm0, %v10729_v17, 0.0  ;;  %v5231_v2 = vadd.f32 %v10501_v15, %v10483_v0 }
 0x499   : > { %v6212_v63 = vadd.f32 %v6211_v36, %v6210_v22  ;;  %v6038_v43 = vpop.f32.mrf.mxu1  ;;  %v5840_v52 = vadd.f32 %v10644_v44, %v5534_v1  ;;  %v5232_v44 = vadd.f32 %v10509_v11, %v10491_v45  ;;  %v11467_v45 = vld [vmem:[#allocation47_spill] sm:$0xff] }
 0x49a   : > { %v6213_v48 = vsel %vm257_vm0, %v10721_v53, 0.0  ;;  %v6141_v19 = vadd.f32 %v6038_v43, %v5835_v28  ;;  %v10752_v21 = vadd.f32 %v10670_v18, %v6143_v57  ;;  %v10779_v43 = vpop.f32.mrf.mxu0  ;;  %v5537_v0 = vadd.f32 %v10605_v25, %v5231_v2 }
 0x49b   : > { %v6214_v10 = vadd.f32 %v6213_v48, %v6212_v63  ;;  %v7937_v27 = vpop.f32.mrf.mxu1  ;;  %v5845_v11 = vadd.f32 %v11467_v45, %v11466_v3  ;;  %v11476_v45 = vld [vmem:[#allocation71_spill] sm:$0xff] }
 0x49c   : > { %v10741_v47 = vadd.f32 %v10670_v18, %v6141_v19  ;;  %v6144_v50 = vadd.f32 %v7937_v27, %v5838_v12  ;;  %v6223_v56 = vsel %vm257_vm0, %v10752_v21, 0.0  ;;  %v5843_v12 = vadd.f32 %v10657_v4, %v5537_v0  ;;  %v5796_v57 = vpop.f32.mrf.mxu0 }
 0x49d   : > { %v6216_v46 = vadd.f32 %v6215_v9, %v6214_v10  ;;  %v6041_v5 = vpop.f32.mrf.mxu1 }
 0x49e   : > { %v6142_v59 = vadd.f32 %v6041_v5, %v5836_v58  ;;  %v6219_v26 = vsel %vm257_vm0, %v10741_v47, 0.0  ;;  %v10765_v14 = vadd.f32 %v10670_v18, %v6144_v50  ;;  %v11465_v58 = vld [vmem:[#allocation45_spill] sm:$0xff] }
 0x49f   : > { %v6218_v24 = vadd.f32 %v6217_v51, %v6216_v46  ;;  %v7940_v8 = vpop.f32.mrf.mxu1  ;;  %v5538_v9 = vadd.f32 %v11465_v58, %v5232_v44 }
 0x4a0   : > { %v10757_v30 = vadd.f32 %v10670_v18, %v6142_v59  ;;  %v6147_v35 = vadd.f32 %v7940_v8, %v5841_v7  ;;  %v6225_v15 = vsel %vm257_vm0, %v10765_v14, 0.0  ;;  %v11468_v59 = vld [vmem:[#allocation54_spill] sm:$0xff] }
 0x4a1   : > { %v6220_v29 = vadd.f32 %v6219_v26, %v6218_v24  ;;  %v6054_v60 = vpop.f32.mrf.mxu1  ;;  %v5235_v24 = vadd.f32 %v11469_v49, %v11468_v59  ;;  %v11470_v8 = vld [vmem:[#allocation58_spill] sm:$0xff] }
 0x4a2   : > { %v6221_v6 = vsel %vm257_vm0, %v10757_v30, 0.0  ;;  %v6145_v22 = vadd.f32 %v6054_v60, %v5839_v16  ;;  %v10788_v10 = vadd.f32 %v10670_v18, %v6147_v35  ;;  %v5846_v16 = vadd.f32 %v10665_v13, %v11470_v8  ;;  %v11472_v35 = vld [vmem:[#allocation44_spill] sm:$0xff] }
 0x4a3   : > { %v6222_v28 = vadd.f32 %v6221_v6, %v6220_v29  ;;  %v7941_v36 = vpop.f32.mrf.mxu1  ;;  %v5844_v29 = vadd.f32 %v10688_v31, %v5538_v9  ;;  %v11475_v9 = vld [vmem:[#allocation75_spill] sm:$0xff] }
 0x4a4   : > { %v10777_v63 = vadd.f32 %v10670_v18, %v6145_v22  ;;  %v6148_v40 = vadd.f32 %v7941_v36, %v5842_v61  ;;  %v6231_v60 = vsel %vm257_vm0, %v10788_v10, 0.0  ;;  %v7917_v22 = vpop.f32.mrf.mxu0 }
 0x4a5   : > { %v6224_v39 = vadd.f32 %v6223_v56, %v6222_v28  ;;  %v6057_v48 = vpop.f32.mrf.mxu1  ;;  %v11471_v28 = vld [vmem:[#allocation72_spill] sm:$0xff] }
 0x4a6   : > { %v6146_v33 = vadd.f32 %v6057_v48, %v5840_v52  ;;  %v6227_v27 = vsel %vm257_vm0, %v10777_v63, 0.0  ;;  %v10799_v51 = vadd.f32 %v10670_v18, %v6148_v40  ;;  %v5541_v36 = vadd.f32 %v11471_v28, %v5235_v24 }
 0x4a7   : > { %v6226_v19 = vadd.f32 %v6225_v15, %v6224_v39  ;;  %v7944_v62 = vpop.f32.mrf.mxu1  ;;  %v11473_v39 = vld [vmem:[#allocation46_spill] sm:$0xff] }
 0x4a8   : > { %v10793_v25 = vadd.f32 %v10670_v18, %v6146_v33  ;;  %v6151_v7 = vadd.f32 %v7944_v62, %v5845_v11  ;;  %v6233_v52 = vsel %vm257_vm0, %v10799_v51, 0.0  ;;  %v5236_v31 = vadd.f32 %v11473_v39, %v11472_v35  ;;  %v11477_v11 = vld [vmem:[#allocation56_spill] sm:$0xff] }
 0x4a9   : > { %v6228_v46 = vadd.f32 %v6227_v27, %v6226_v19  ;;  %v6070_v5 = vpop.f32.mrf.mxu1  ;;  %v5847_v15 = vadd.f32 %v10724_v54, %v5541_v36  ;;  %v11474_v19 = vld [vmem:[#allocation55_spill] sm:$0xff] }
 0x4aa   : > { %v6229_v4 = vsel %vm257_vm0, %v10793_v25, 0.0  ;;  %v6149_v50 = vadd.f32 %v6070_v5, %v5843_v12  ;;  %v10820_v40 = vadd.f32 %v10670_v18, %v6151_v7  ;;  %v5542_v62 = vadd.f32 %v11474_v19, %v5236_v31  ;;  %v5799_v12 = vpop.f32.mrf.mxu0  ;;  %v11479_v7 = vld [vmem:[#allocation74_spill] sm:$0xff]  ;;  %v11480_v36 = vld [vmem:[#allocation79_spill] sm:$0xff] }
 0x4ab   : > { %v6230_v26 = vadd.f32 %v6229_v4, %v6228_v46  ;;  %v7945_v1 = vpop.f32.mrf.mxu1  ;;  %v5849_v46 = vadd.f32 %v10707_v55, %v11475_v9  ;;  %v5239_v4 = vadd.f32 %v11477_v11, %v11476_v45  ;;  %v11486_v11 = vld [vmem:[#allocation57_spill] sm:$0xff] }
 0x4ac   : > { %v10811_v6 = vadd.f32 %v10670_v18, %v6149_v50  ;;  %v6152_v13 = vadd.f32 %v7945_v1, %v5846_v16  ;;  %v11478_v50 = vld [vmem:[#allocation48_spill] sm:$0xff]  ;;  %v5848_v8 = vadd.f32 %v10760_v20, %v5542_v62  ;;  %v6239_v55 = vsel %vm257_vm0, %v10820_v40, 0.0  ;;  %v7920_v1 = vpop.f32.mrf.mxu0 }
 0x4ad   : > { %v6232_v2 = vadd.f32 %v6231_v60, %v6230_v26  ;;  %v6073_v61 = vpop.f32.mrf.mxu1  ;;  %v5850_v59 = vadd.f32 %v10743_v32, %v11478_v50 }
 0x4ae   : > { %v6150_v56 = vadd.f32 %v6073_v61, %v5844_v29  ;;  %v6235_v33 = vsel %vm257_vm0, %v10811_v6, 0.0  ;;  %v10831_v5 = vadd.f32 %v10670_v18, %v6152_v13 }
 0x4af   : > { %v6234_v48 = vadd.f32 %v6233_v52, %v6232_v2  ;;  %v7948_v0 = vpop.f32.mrf.mxu1  ;;  %v5545_v2 = vadd.f32 %v11479_v7, %v5239_v4  ;;  %v11481_v52 = vld [vmem:[#allocation53_spill] sm:$0xff]  ;;  %v5854_v4 = vadd.f32 %v7917_v22, %v11486_v11 }
 0x4b0   : > { %v10825_v44 = vadd.f32 %v10670_v18, %v6150_v56  ;;  %v6155_v16 = vadd.f32 %v7948_v0, %v5849_v46  ;;  %v6241_v61 = vsel %vm257_vm0, %v10831_v5, 0.0  ;;  %v5240_v20 = vadd.f32 %v11481_v52, %v11480_v36  ;;  %v11482_v0 = vld [vmem:[#allocation77_spill] sm:$0xff] }
 0x4b1   : > { %v6236_v27 = vadd.f32 %v6235_v33, %v6234_v48  ;;  %v6086_v58 = vpop.f32.mrf.mxu1  ;;  %v5851_v35 = vadd.f32 %v5796_v57, %v5545_v2  ;;  %v5812_v33 = vpop.f32.mrf.mxu0 }
 0x4b2   : > { %v6237_v54 = vsel %vm257_vm0, %v10825_v44, 0.0  ;;  %v6153_v3 = vadd.f32 %v6086_v58, %v5847_v15  ;;  %v10851_v39 = vadd.f32 %v10670_v18, %v6155_v16  ;;  %v5546_v15 = vadd.f32 %v11482_v0, %v5240_v20 }
 0x4b3   : > { %v6238_v49 = vadd.f32 %v6237_v54, %v6236_v27  ;;  %v7949_v24 = vpop.f32.mrf.mxu1  ;;  %v11483_v27 = vld [vmem:[#allocation60_spill] sm:$0xff] }
 0x4b4   : > { %v10843_v26 = vadd.f32 %v10670_v18, %v6153_v3  ;;  %v6156_v32 = vadd.f32 %v7949_v24, %v5850_v59  ;;  %v5853_v58 = vadd.f32 %v10779_v43, %v11483_v27  ;;  %v11484_v54 = vld [vmem:[#allocation52_spill] sm:$0xff]  ;;  %v11485_v3 = vld [vmem:[#allocation73_spill] sm:$0xff]  ;;  %v6247_v24 = vsel %vm257_vm0, %v10851_v39, 0.0  ;;  %v11491_v27 = vld [vmem:[#allocation39_spill] sm:$0xff] }
 0x4b5   : > { %v6240_v29 = vadd.f32 %v6239_v55, %v6238_v49  ;;  %v6089_v60 = vpop.f32.mrf.mxu1  ;;  %v5243_v45 = vadd.f32 %v11485_v3, %v11484_v54  ;;  %v5852_v49 = vadd.f32 %v5799_v12, %v5546_v15  ;;  %v7921_v55 = vpop.f32.mrf.mxu0 }
 0x4b6   : > { %v6154_v28 = vadd.f32 %v6089_v60, %v5848_v8  ;;  %v6243_v31 = vsel %vm257_vm0, %v10843_v26, 0.0  ;;  %v10862_v9 = vadd.f32 %v10670_v18, %v6156_v32  ;;  %v11487_v60 = vld [vmem:[#allocation42_spill] sm:$0xff] }
 0x4b7   : > { %v6242_v13 = vadd.f32 %v6241_v61, %v6240_v29  ;;  %v7952_v56 = vpop.f32.mrf.mxu1  ;;  %v5549_v7 = vadd.f32 %v11487_v60, %v5243_v45  ;;  %v11488_v32 = vld [vmem:[#allocation70_spill] sm:$0xff]  ;;  %v5815_v15 = vpop.f32.mrf.mxu0 }
 0x4b8   : > { %v10856_v48 = vadd.f32 %v10670_v18, %v6154_v28  ;;  %v6159_v8 = vadd.f32 %v7952_v56, %v5853_v58  ;;  %v6249_v2 = vsel %vm257_vm0, %v10862_v9, 0.0  ;;  %v11489_v28 = vld [vmem:[#allocation38_spill] sm:$0xff]  ;;  %v5857_v58 = vadd.f32 %v7920_v1, %v11491_v27 }
 0x4b9   : > { %v6244_v19 = vadd.f32 %v6243_v31, %v6242_v13  ;;  %v6102_v62 = vpop.f32.mrf.mxu1  ;;  %v5244_v12 = vadd.f32 %v11489_v28, %v11488_v32  ;;  %v5855_v20 = vadd.f32 %v5812_v33, %v5549_v7  ;;  %v11490_v31 = vld [vmem:[#allocation80_spill] sm:$0xff]  ;;  %v11492_v33 = vld [vmem:[#allocation62_spill] sm:$0xff] }
 0x4ba   : > { %v6245_v57 = vsel %vm257_vm0, %v10856_v48, 0.0  ;;  %v6157_v46 = vadd.f32 %v6102_v62, %v5851_v35  ;;  %v6198_v13 = vadd.f32 %v10670_v18, %v6159_v8  ;;  %v5858_v3 = vadd.f32 %v7921_v55, %v11492_v33 }
 0x4bb   : > { %v6246_v50 = vadd.f32 %v6245_v57, %v6244_v19  ;;  %v7953_v59 = vpop.f32.mrf.mxu1  ;;  %v5550_v0 = vadd.f32 %v11490_v31, %v5244_v12 }
 0x4bc   : > { %v10872_v43 = vadd.f32 %v10670_v18, %v6157_v46  ;;  %v6160_v61 = vadd.f32 %v7953_v59, %v5854_v4 }
 0x4bd   : > { %v6248_v16 = vadd.f32 %v6247_v24, %v6246_v50  ;;  %v6105_v29 = vpop.f32.mrf.mxu1  ;;  %v5856_v4 = vadd.f32 %v5815_v15, %v5550_v0  ;;  %v6255_v50 = vsel %vm257_vm0, %v6198_v13, 0.0 }
 0x4be   : > { %v6158_v22 = vadd.f32 %v6105_v29, %v5852_v49  ;;  %v6251_v56 = vsel %vm257_vm0, %v10872_v43, 0.0  ;;  %v6199_v57 = vadd.f32 %v10670_v18, %v6160_v61 }
 0x4bf   : > { %v6250_v36 = vadd.f32 %v6249_v2, %v6248_v16  ;;  %v7956_v52 = vpop.f32.mrf.mxu1 }
 0x4c0   : > { %v6197_v35 = vadd.f32 %v10670_v18, %v6158_v22  ;;  %v6163_v59 = vadd.f32 %v7956_v52, %v5857_v58  ;;  %v6257_v16 = vsel %vm257_vm0, %v6199_v57, 0.0 }
 0x4c1   : > { %v6252_v19 = vadd.f32 %v6251_v56, %v6250_v36  ;;  %v6118_v62 = vpop.f32.mrf.mxu1 }
 0x4c2   : > { %v6253_v46 = vsel %vm257_vm0, %v6197_v35, 0.0  ;;  %v6161_v54 = vadd.f32 %v6118_v62, %v5855_v20  ;;  %v6202_v7 = vadd.f32 %v10670_v18, %v6163_v59 }
 0x4c3   : > { %v6254_v45 = vadd.f32 %v6253_v46, %v6252_v19  ;;  %v7957_v11 = vpop.f32.mrf.mxu1 }
 0x4c4   : > { %v6200_v49 = vadd.f32 %v10670_v18, %v6161_v54  ;;  %v6164_v1 = vadd.f32 %v7957_v11, %v5858_v3  ;;  %v6263_v12 = vsel %vm257_vm0, %v6202_v7, 0.0 }
 0x4c5   : > { %v6256_v24 = vadd.f32 %v6255_v50, %v6254_v45  ;;  %v6121_v8 = vpop.f32.mrf.mxu1 }
 0x4c6   : > { %v6162_v29 = vadd.f32 %v6121_v8, %v5856_v4  ;;  %v6259_v2 = vsel %vm257_vm0, %v6200_v49, 0.0  ;;  %v6203_v22 = vadd.f32 %v10670_v18, %v6164_v1 }
 0x4c7   : > { %v6258_v60 = vadd.f32 %v6257_v16, %v6256_v24 }
 0x4c8   : > { %v6201_v55 = vadd.f32 %v10670_v18, %v6162_v29  ;;  %v6265_v52 = vsel %vm257_vm0, %v6203_v22, 0.0 }
 0x4c9   : > { %v6260_v61 = vadd.f32 %v6259_v2, %v6258_v60 }
 0x4ca   : > { %v6261_v32 = vsel %vm257_vm0, %v6201_v55, 0.0 }
 0x4cb   : > { %v6262_v28 = vadd.f32 %v6261_v32, %v6260_v61 }
 0x4cd   : > { %v6264_v36 = vadd.f32 %v6263_v12, %v6262_v28 }
 0x4cf   : > { %v6266_v20 = vadd.f32 %v6265_v52, %v6264_v36 }
 0x4d1   : > { %v6267_v56 = vrot.slane %v6266_v20, 4 }
 0x4d3   : > { %v6268_v31 = vadd.f32 %v6267_v56, %v6266_v20 }
 0x4d5   : > { %v6269_v0 = vrot.slane %v6268_v31, 2 }
 0x4d7   : > { %v6270_v15 = vadd.f32 %v6269_v0, %v6268_v31 }
 0x4d9   : > { %v6271_v19 = vrot.slane %v6270_v15, 1 }
 0x4db   : > { %v6272_v62 = vadd.f32 %v6271_v19, %v6270_v15 }
 0x4dd   : > { %v6273_v27 = vmul.f32 0.00390625, %v6272_v62 }
 0x4df   : > { %v10899_v58 = vsub.f32 %v10757_v30, %v6273_v27  ;;  %v10902_v18 = vsub.f32 %v10777_v63, %v6273_v27  ;;  %v10905_v46 = vsub.f32 %v10793_v25, %v6273_v27  ;;  %v10908_v54 = vsub.f32 %v10788_v10, %v6273_v27 }
 0x4e0   : > { %v10911_v33 = vsub.f32 %v10799_v51, %v6273_v27  ;;  %v10914_v3 = vsub.f32 %v10811_v6, %v6273_v27  ;;  %v10917_v45 = vsub.f32 %v10825_v44, %v6273_v27  ;;  %v10920_v30 = vsub.f32 %v10820_v40, %v6273_v27 }
 0x4e1   : > { %v10923_v63 = vsub.f32 %v10831_v5, %v6273_v27  ;;  %v10926_v25 = vsub.f32 %v10843_v26, %v6273_v27  ;;  %v10929_v10 = vsub.f32 %v10856_v48, %v6273_v27  ;;  %v10932_v51 = vsub.f32 %v10851_v39, %v6273_v27 }
 0x4e2   : > { %v10935_v6 = vsub.f32 %v10862_v9, %v6273_v27  ;;  %v10938_v44 = vsub.f32 %v10872_v43, %v6273_v27  ;;  %v10940_v40 = vsub.f32 %v6197_v35, %v6273_v27  ;;  %v10942_v11 = vsub.f32 %v6198_v13, %v6273_v27 }
 0x4e3   : > { %v10944_v5 = vsub.f32 %v6199_v57, %v6273_v27  ;;  %v10946_v26 = vsub.f32 %v6200_v49, %v6273_v27  ;;  %v10948_v4 = vsub.f32 %v6201_v55, %v6273_v27  ;;  %v10950_v48 = vsub.f32 %v6202_v7, %v6273_v27 }
 0x4e4   : > { %v10952_v39 = vsub.f32 %v6203_v22, %v6273_v27  ;;  %v10955_v9 = vsub.f32 %v10674_v34, %v6273_v27  ;;  %v10958_v43 = vsub.f32 %v10683_v38, %v6273_v27  ;;  %v10961_v35 = vsub.f32 %v10680_v42, %v6273_v27 }
 0x4e5   : > { %v10964_v13 = vsub.f32 %v10693_v23, %v6273_v27  ;;  %v10971_v59 = vsub.f32 %v10705_v41, %v6273_v27  ;;  %v10976_v38 = vsub.f32 %v10721_v53, %v6273_v27  ;;  %v10983_v8 = vsub.f32 %v10716_v37, %v6273_v27 }
 0x4e6   : > { %v6306_v57 = vmul.f32 %v10955_v9, %v10955_v9  ;;  %v6307_v50 = vmul.f32 %v10958_v43, %v10958_v43  ;;  %v6308_v34 = vmul.f32 %v10961_v35, %v10961_v35  ;;  %v10989_v53 = vsub.f32 %v10729_v17, %v6273_v27 }
 0x4e7   : > { %v6309_v42 = vmul.f32 %v10964_v13, %v10964_v13  ;;  %v6310_v41 = vmul.f32 %v10971_v59, %v10971_v59  ;;  %v6311_v29 = vmul.f32 %v10976_v38, %v10976_v38  ;;  %v10995_v2 = vsub.f32 %v10741_v47, %v6273_v27 }
 0x4e8   : > { %v6338_v23 = vsel %vm257_vm0, %v6306_v57, 0.0  ;;  %v6339_v49 = vsel %vm257_vm0, %v6307_v50, 0.0  ;;  %v6341_v16 = vsel %vm257_vm0, %v6308_v34, 0.0  ;;  %v6312_v37 = vmul.f32 %v10983_v8, %v10983_v8 }
 0x4e9   : > { %v6340_v24 = vadd.f32 %v6339_v49, %v6338_v23  ;;  %v6343_v60 = vsel %vm257_vm0, %v6309_v42, 0.0  ;;  %v6345_v55 = vsel %vm257_vm0, %v6310_v41, 0.0  ;;  %v6313_v22 = vmul.f32 %v10989_v53, %v10989_v53 }
 0x4ea   : > { %v6347_v17 = vsel %vm257_vm0, %v6311_v29, 0.0  ;;  %v11004_v28 = vsub.f32 %v10752_v21, %v6273_v27  ;;  %v6314_v12 = vmul.f32 %v10995_v2, %v10995_v2  ;;  %v6349_v47 = vsel %vm257_vm0, %v6312_v37, 0.0 }
 0x4eb   : > { %v6342_v1 = vadd.f32 %v6341_v16, %v6340_v24  ;;  %v11010_v52 = vsub.f32 %v10765_v14, %v6273_v27  ;;  %v6315_v20 = vmul.f32 %v10899_v58, %v10899_v58  ;;  %v6351_v56 = vsel %vm257_vm0, %v6313_v22, 0.0 }
 0x4ec   : > { %v6316_v0 = vmul.f32 %v11004_v28, %v11004_v28  ;;  %v6353_v21 = vsel %vm257_vm0, %v6314_v12, 0.0  ;;  %v6318_v14 = vmul.f32 %v10902_v18, %v10902_v18  ;;  %v6319_v34 = vmul.f32 %v10905_v46, %v10905_v46 }
 0x4ed   : > { %v6344_v7 = vadd.f32 %v6343_v60, %v6342_v1  ;;  %v6317_v19 = vmul.f32 %v11010_v52, %v11010_v52  ;;  %v6355_v62 = vsel %vm257_vm0, %v6315_v20, 0.0  ;;  %v6320_v49 = vmul.f32 %v10908_v54, %v10908_v54 }
 0x4ee   : > { %v6357_v27 = vsel %vm257_vm0, %v6316_v0, 0.0  ;;  %v6361_v24 = vsel %vm257_vm0, %v6318_v14, 0.0  ;;  %v6321_v16 = vmul.f32 %v10911_v33, %v10911_v33  ;;  %v6363_v1 = vsel %vm257_vm0, %v6319_v34, 0.0 }
 0x4ef   : > { %v6346_v61 = vadd.f32 %v6345_v55, %v6344_v7  ;;  %v6359_v42 = vsel %vm257_vm0, %v6317_v19, 0.0  ;;  %v6322_v60 = vmul.f32 %v10914_v3, %v10914_v3  ;;  %v6365_v7 = vsel %vm257_vm0, %v6320_v49, 0.0 }
 0x4f0   : > { %v6323_v55 = vmul.f32 %v10917_v45, %v10917_v45 }
 0x4f1   : > { %v6348_v32 = vadd.f32 %v6347_v17, %v6346_v61  ;;  %v6367_v61 = vsel %vm257_vm0, %v6321_v16, 0.0  ;;  %v6324_v17 = vmul.f32 %v10920_v30, %v10920_v30 }
 0x4f3   : > { %v6350_v36 = vadd.f32 %v6349_v47, %v6348_v32  ;;  %v6369_v32 = vsel %vm257_vm0, %v6322_v60, 0.0  ;;  %v6325_v47 = vmul.f32 %v10923_v63, %v10923_v63 }
 0x4f5   : > { %v6352_v31 = vadd.f32 %v6351_v56, %v6350_v36  ;;  %v6371_v36 = vsel %vm257_vm0, %v6323_v55, 0.0  ;;  %v6326_v56 = vmul.f32 %v10926_v25, %v10926_v25 }
 0x4f7   : > { %v6354_v15 = vadd.f32 %v6353_v21, %v6352_v31  ;;  %v6373_v31 = vsel %vm257_vm0, %v6324_v17, 0.0  ;;  %v6327_v21 = vmul.f32 %v10929_v10, %v10929_v10 }
 0x4f9   : > { %v6356_v57 = vadd.f32 %v6355_v62, %v6354_v15  ;;  %v6375_v15 = vsel %vm257_vm0, %v6325_v47, 0.0  ;;  %v6328_v62 = vmul.f32 %v10932_v51, %v10932_v51 }
 0x4fb   : > { %v6358_v50 = vadd.f32 %v6357_v27, %v6356_v57  ;;  %v6377_v57 = vsel %vm257_vm0, %v6326_v56, 0.0  ;;  %v6329_v27 = vmul.f32 %v10935_v6, %v10935_v6 }
 0x4fd   : > { %v6360_v23 = vadd.f32 %v6359_v42, %v6358_v50  ;;  %v6379_v50 = vsel %vm257_vm0, %v6327_v21, 0.0  ;;  %v6330_v42 = vmul.f32 %v10938_v44, %v10938_v44 }
 0x4ff   : > { %v6362_v41 = vadd.f32 %v6361_v24, %v6360_v23  ;;  %v6381_v23 = vsel %vm257_vm0, %v6328_v62, 0.0  ;;  %v6331_v24 = vmul.f32 %v10940_v40, %v10940_v40 }
 0x501   : > { %v6364_v29 = vadd.f32 %v6363_v1, %v6362_v41  ;;  %v6383_v41 = vsel %vm257_vm0, %v6329_v27, 0.0  ;;  %v6332_v1 = vmul.f32 %v10942_v11, %v10942_v11 }
 0x503   : > { %v6366_v37 = vadd.f32 %v6365_v7, %v6364_v29  ;;  %v6385_v29 = vsel %vm257_vm0, %v6330_v42, 0.0  ;;  %v6333_v7 = vmul.f32 %v10944_v5, %v10944_v5 }
 0x505   : > { %v6368_v22 = vadd.f32 %v6367_v61, %v6366_v37  ;;  %v6387_v37 = vsel %vm257_vm0, %v6331_v24, 0.0  ;;  %v6334_v61 = vmul.f32 %v10946_v26, %v10946_v26 }
 0x507   : > { %v6370_v12 = vadd.f32 %v6369_v32, %v6368_v22  ;;  %v6389_v22 = vsel %vm257_vm0, %v6332_v1, 0.0  ;;  %v6335_v32 = vmul.f32 %v10948_v4, %v10948_v4 }
 0x509   : > { %v6372_v20 = vadd.f32 %v6371_v36, %v6370_v12  ;;  %v6391_v12 = vsel %vm257_vm0, %v6333_v7, 0.0  ;;  %v6336_v36 = vmul.f32 %v10950_v48, %v10950_v48 }
 0x50b   : > { %v6374_v0 = vadd.f32 %v6373_v31, %v6372_v20  ;;  %v6393_v20 = vsel %vm257_vm0, %v6334_v61, 0.0  ;;  %v6337_v31 = vmul.f32 %v10952_v39, %v10952_v39 }
 0x50d   : > { %v6376_v19 = vadd.f32 %v6375_v15, %v6374_v0  ;;  %v6395_v0 = vsel %vm257_vm0, %v6335_v32, 0.0  ;;  %v6397_v15 = vsel %vm257_vm0, %v6336_v36, 0.0  ;;  %v6399_v62 = vsel %vm257_vm0, %v6337_v31, 0.0  ;;  %v11500_v31 = vld [vmem:[#allocation12_spill] sm:$0xff] }
 0x50f   : > { %v6378_v14 = vadd.f32 %v6377_v57, %v6376_v19 }
 0x511   : > { %v6380_v34 = vadd.f32 %v6379_v50, %v6378_v14 }
 0x513   : > { %v6382_v49 = vadd.f32 %v6381_v23, %v6380_v34 }
 0x515   : > { %v6384_v16 = vadd.f32 %v6383_v41, %v6382_v49 }
 0x517   : > { %v6386_v60 = vadd.f32 %v6385_v29, %v6384_v16 }
 0x519   : > { %v6388_v55 = vadd.f32 %v6387_v37, %v6386_v60 }
 0x51b   : > { %v6390_v17 = vadd.f32 %v6389_v22, %v6388_v55  ;;  %v11493_v22 = vld [vmem:[#allocation35_spill] sm:$0xff] }
 0x51d   : > { %v6392_v47 = vadd.f32 %v6391_v12, %v6390_v17 }
 0x51f   : > { %v6394_v56 = vadd.f32 %v6393_v20, %v6392_v47  ;;  %v11498_v20 = vld [vmem:[#allocation10_spill] sm:$0xff] }
 0x521   : > { %v6396_v21 = vadd.f32 %v6395_v0, %v6394_v56  ;;  %v11499_v56 = vld [vmem:[#allocation11_spill] sm:$0xff]  ;;  %v11501_v0 = vld [vmem:[#allocation13_spill] sm:$0xff] }
 0x523   : > { %v6398_v19 = vadd.f32 %v6397_v15, %v6396_v21  ;;  %v11502_v21 = vld [vmem:[#allocation14_spill] sm:$0xff] }
 0x525   : > { %v6400_v57 = vadd.f32 %v6399_v62, %v6398_v19  ;;  %v11503_v19 = vld [vmem:[#allocation15_spill] sm:$0xff] }
 0x527   : > { %v6401_v14 = vrot.slane %v6400_v57, 4 }
 0x529   : > { %v6402_v27 = vadd.f32 %v6401_v14, %v6400_v57  ;;  %v11504_v57 = vld [vmem:[#allocation16_spill] sm:$0xff] }
 0x52b   : > { %v6403_v50 = vrot.slane %v6402_v27, 2 }
 0x52d   : > { %v6404_v34 = vadd.f32 %v6403_v50, %v6402_v27  ;;  %v11505_v27 = vld [vmem:[#allocation17_spill] sm:$0xff] }
 0x52f   : > { %v6405_v42 = vrot.slane %v6404_v34, 1 }
 0x531   : > { %v6406_v23 = vadd.f32 %v6405_v42, %v6404_v34  ;;  %v11506_v34 = vld [vmem:[#allocation18_spill] sm:$0xff] }
 0x533   : > { %v6407_v49 = vmul.f32 0.00390625, %v6406_v23  ;;  %v11507_v23 = vld [vmem:[#allocation19_spill] sm:$0xff] }
 0x535   : > { %v6408_v24 = vadd.f32 1e-05, %v6407_v49 }
 0x537   : > { %8037 = vrsqrt.f32 %v6408_v24  ;;  %v11508_v24 = vld [vmem:[#allocation20_spill] sm:$0xff] }
 0x544   : > { %v8038_v41 = vpop.eup %8037 }
 0x545   : > { %v6439_v16 = vmul.f32 %v8038_v41, %v10948_v4  ;;  %v6410_v1 = vmul.f32 %v8038_v41, %v10955_v9  ;;  %v6411_v29 = vmul.f32 %v8038_v41, %v10958_v43  ;;  %v6412_v60 = vmul.f32 %v8038_v41, %v10961_v35 }
 0x546   : > { %v6413_v7 = vmul.f32 %v8038_v41, %v10964_v13  ;;  %v6414_v37 = vmul.f32 %v8038_v41, %v10971_v59  ;;  %v6415_v55 = vmul.f32 %v8038_v41, %v10976_v38  ;;  %v6416_v61 = vmul.f32 %v8038_v41, %v10983_v8 }
 0x547   : > { %v6471_v17 = vadd.f32 %v6439_v16, %v11493_v22  ;;  %v6417_v32 = vmul.f32 %v8038_v41, %v10989_v53  ;;  %v6418_v4 = vmul.f32 %v8038_v41, %v10995_v2  ;;  %v6419_v9 = vmul.f32 %v8038_v41, %v10899_v58  ;;  %v11509_v16 = vld [vmem:[#allocation21_spill] sm:$0xff] }
 0x548   : > { %v6420_v43 = vmul.f32 %v8038_v41, %v11004_v28  ;;  %v6421_v35 = vmul.f32 %v8038_v41, %v11010_v52  ;;  %v6422_v13 = vmul.f32 %v8038_v41, %v10902_v18  ;;  %v6423_v59 = vmul.f32 %v8038_v41, %v10905_v46  ;;  %v11513_v22 = vld [vmem:[#allocation25_spill] sm:$0xff] }
 0x549   : > { %6503 = vst.msk [vmem:[%s11102_s8 + $0xe8] sm:$0xff] %vm257_vm0, %v6471_v17  ;;  %v6424_v38 = vmul.f32 %v8038_v41, %v10908_v54  ;;  %v6425_v8 = vmul.f32 %v8038_v41, %v10911_v33  ;;  %v6426_v53 = vmul.f32 %v8038_v41, %v10914_v3  ;;  %v6427_v58 = vmul.f32 %v8038_v41, %v10917_v45 }
 0x54a   : > { %v6428_v2 = vmul.f32 %v8038_v41, %v10920_v30  ;;  %v6429_v28 = vmul.f32 %v8038_v41, %v10923_v63  ;;  %v6430_v18 = vmul.f32 %v8038_v41, %v10926_v25  ;;  %v6431_v46 = vmul.f32 %v8038_v41, %v10929_v10  ;;  %v11494_v10 = vld [vmem:[#allocation8_spill] sm:$0xff] }
 0x54b   : > { %v6432_v52 = vmul.f32 %v8038_v41, %v10932_v51  ;;  %v6433_v12 = vmul.f32 %v8038_v41, %v10935_v6  ;;  %v6434_v54 = vmul.f32 %v8038_v41, %v10938_v44  ;;  %v6435_v33 = vmul.f32 %v8038_v41, %v10940_v40  ;;  %v11495_v6 = vld [vmem:[#allocation9_spill] sm:$0xff]  ;;  %v11496_v44 = vld [vmem:[#allocation6_spill] sm:$0xff]  ;;  %v11497_v40 = vld [vmem:[#allocation7_spill] sm:$0xff] }
 0x54c   : > { %v6436_v3 = vmul.f32 %v8038_v41, %v10942_v11  ;;  %v6437_v45 = vmul.f32 %v8038_v41, %v10944_v5  ;;  %v6438_v30 = vmul.f32 %v8038_v41, %v10946_v26  ;;  %v6440_v63 = vmul.f32 %v8038_v41, %v10950_v48 }
 0x54d   : > { %v6441_v25 = vmul.f32 %v8038_v41, %v10952_v39  ;;  %v6442_v51 = vadd.f32 %v6410_v1, %v11494_v10  ;;  %v6443_v47 = vadd.f32 %v6411_v29, %v11495_v6  ;;  %v6444_v36 = vadd.f32 %v6412_v60, %v11496_v44  ;;  %v11510_v29 = vld [vmem:[#allocation22_spill] sm:$0xff]  ;;  %v11524_v10 = vld [vmem:[#allocation37_spill] sm:$0xff] }
 0x54e   : > { %v6445_v11 = vadd.f32 %v6413_v7, %v11497_v40  ;;  %v6446_v5 = vadd.f32 %v6414_v37, %v11498_v20  ;;  %v6447_v26 = vadd.f32 %v6415_v55, %v11499_v56  ;;  %v6448_v48 = vadd.f32 %v6416_v61, %v11500_v31  ;;  %v11511_v7 = vld [vmem:[#allocation23_spill] sm:$0xff]  ;;  %v11512_v55 = vld [vmem:[#allocation24_spill] sm:$0xff] }
 0x54f   : > { %v6449_v39 = vadd.f32 %v6417_v32, %v11501_v0  ;;  %v6450_v15 = vadd.f32 %v6418_v4, %v11502_v21  ;;  %v6451_v62 = vadd.f32 %v6419_v9, %v11503_v19  ;;  %v6452_v14 = vadd.f32 %v6420_v43, %v11504_v57  ;;  %6474 = vst.msk [vmem:[%s11102_s8] sm:$0xff] %vm257_vm0, %v6442_v51  ;;  %v11514_v32 = vld [vmem:[#allocation26_spill] sm:$0xff]  ;;  %v11515_v9 = vld [vmem:[#allocation27_spill] sm:$0xff] }
 0x550   : > { %6475 = vst.msk [vmem:[%s11102_s8 + $0x8] sm:$0xff] %vm257_vm0, %v6443_v47  ;;  %6476 = vst.msk [vmem:[%s11102_s8 + $0x10] sm:$0xff] %vm257_vm0, %v6444_v36  ;;  %v6453_v50 = vadd.f32 %v6421_v35, %v11505_v27  ;;  %v6454_v42 = vadd.f32 %v6422_v13, %v11506_v34  ;;  %v6455_v49 = vadd.f32 %v6423_v59, %v11507_v23  ;;  %v11516_v35 = vld [vmem:[#allocation28_spill] sm:$0xff]  ;;  %v11517_v59 = vld [vmem:[#allocation29_spill] sm:$0xff] }
 0x551   : > { %v6456_v41 = vadd.f32 %v6424_v38, %v11508_v24  ;;  %6477 = vst.msk [vmem:[%s11102_s8 + $0x18] sm:$0xff] %vm257_vm0, %v6445_v11  ;;  %6478 = vst.msk [vmem:[%s11102_s8 + $0x20] sm:$0xff] %vm257_vm0, %v6446_v5  ;;  %v6457_v1 = vadd.f32 %v6425_v8, %v11509_v16  ;;  %v6458_v60 = vadd.f32 %v6426_v53, %v11510_v29  ;;  %v11518_v8 = vld [vmem:[#allocation30_spill] sm:$0xff] }
 0x552   : > { %6479 = vst.msk [vmem:[%s11102_s8 + $0x28] sm:$0xff] %vm257_vm0, %v6447_v26  ;;  %6480 = vst.msk [vmem:[%s11102_s8 + $0x30] sm:$0xff] %vm257_vm0, %v6448_v48  ;;  %v6459_v37 = vadd.f32 %v6427_v58, %v11511_v7  ;;  %v6460_v61 = vadd.f32 %v6428_v2, %v11512_v55  ;;  %v6461_v17 = vadd.f32 %v6429_v28, %v11513_v22  ;;  %v11519_v58 = vld [vmem:[#allocation31_spill] sm:$0xff]  ;;  %v11520_v28 = vld [vmem:[#allocation32_spill] sm:$0xff] }
 0x553   : > { %6481 = vst.msk [vmem:[%s11102_s8 + $0x38] sm:$0xff] %vm257_vm0, %v6449_v39  ;;  %6482 = vst.msk [vmem:[%s11102_s8 + $0x40] sm:$0xff] %vm257_vm0, %v6450_v15  ;;  %v6462_v4 = vadd.f32 %v6430_v18, %v11514_v32  ;;  %v6463_v43 = vadd.f32 %v6431_v46, %v11515_v9  ;;  %v6464_v13 = vadd.f32 %v6432_v52, %v11516_v35  ;;  %v11521_v46 = vld [vmem:[#allocation33_spill] sm:$0xff] }
 0x554   : > { %6483 = vst.msk [vmem:[%s11102_s8 + $0x48] sm:$0xff] %vm257_vm0, %v6451_v62  ;;  %6484 = vst.msk [vmem:[%s11102_s8 + $0x50] sm:$0xff] %vm257_vm0, %v6452_v14  ;;  %v6465_v38 = vadd.f32 %v6433_v12, %v11517_v59  ;;  %v6466_v53 = vadd.f32 %v6434_v54, %v11518_v8  ;;  %v6467_v2 = vadd.f32 %v6435_v33, %v11519_v58  ;;  %v11522_v12 = vld [vmem:[#allocation34_spill] sm:$0xff]  ;;  %v11523_v33 = vld [vmem:[#allocation36_spill] sm:$0xff] }
 0x555   : > { %6485 = vst.msk [vmem:[%s11102_s8 + $0x58] sm:$0xff] %vm257_vm0, %v6453_v50  ;;  %6486 = vst.msk [vmem:[%s11102_s8 + $0x60] sm:$0xff] %vm257_vm0, %v6454_v42  ;;  %v6468_v18 = vadd.f32 %v6436_v3, %v11520_v28  ;;  %v6469_v52 = vadd.f32 %v6437_v45, %v11521_v46  ;;  %v6470_v54 = vadd.f32 %v6438_v30, %v11522_v12 }
 0x556   : > { %6487 = vst.msk [vmem:[%s11102_s8 + $0x68] sm:$0xff] %vm257_vm0, %v6455_v49  ;;  %6488 = vst.msk [vmem:[%s11102_s8 + $0x70] sm:$0xff] %vm257_vm0, %v6456_v41  ;;  %v6472_v3 = vadd.f32 %v6440_v63, %v11523_v33  ;;  %v6473_v51 = vadd.f32 %v6441_v25, %v11524_v10 }
 0x557   : > { %6489 = vst.msk [vmem:[%s11102_s8 + $0x78] sm:$0xff] %vm257_vm0, %v6457_v1  ;;  %6490 = vst.msk [vmem:[%s11102_s8 + $0x80] sm:$0xff] %vm257_vm0, %v6458_v60 }
 0x558   : > { %6491 = vst.msk [vmem:[%s11102_s8 + $0x88] sm:$0xff] %vm257_vm0, %v6459_v37  ;;  %6492 = vst.msk [vmem:[%s11102_s8 + $0x90] sm:$0xff] %vm257_vm0, %v6460_v61 }
 0x559   : > { %6493 = vst.msk [vmem:[%s11102_s8 + $0x98] sm:$0xff] %vm257_vm0, %v6461_v17  ;;  %6494 = vst.msk [vmem:[%s11102_s8 + $0xa0] sm:$0xff] %vm257_vm0, %v6462_v4 }
 0x55a   : > { %6495 = vst.msk [vmem:[%s11102_s8 + $0xa8] sm:$0xff] %vm257_vm0, %v6463_v43  ;;  %6496 = vst.msk [vmem:[%s11102_s8 + $0xb0] sm:$0xff] %vm257_vm0, %v6464_v13 }
 0x55b   : > { %6497 = vst.msk [vmem:[%s11102_s8 + $0xb8] sm:$0xff] %vm257_vm0, %v6465_v38  ;;  %6498 = vst.msk [vmem:[%s11102_s8 + $0xc0] sm:$0xff] %vm257_vm0, %v6466_v53 }
 0x55c   : > { %6499 = vst.msk [vmem:[%s11102_s8 + $0xc8] sm:$0xff] %vm257_vm0, %v6467_v2  ;;  %6500 = vst.msk [vmem:[%s11102_s8 + $0xd0] sm:$0xff] %vm257_vm0, %v6468_v18 }
 0x55d   : > { %6501 = vst.msk [vmem:[%s11102_s8 + $0xd8] sm:$0xff] %vm257_vm0, %v6469_v52  ;;  %6502 = vst.msk [vmem:[%s11102_s8 + $0xe0] sm:$0xff] %vm257_vm0, %v6470_v54 }
 0x55e   : > { %6504 = vst.msk [vmem:[%s11102_s8 + $0xf0] sm:$0xff] %vm257_vm0, %v6472_v3  ;;  %6505 = vst.msk [vmem:[%s11102_s8 + $0xf8] sm:$0xff] %vm257_vm0, %v6473_v51 }
 0x55f   : > { %8052 = shalt.err (!%p8049_p3)
}
 0x560   : > { %s8053_s23 = scalar_lea.hbm %s11193_s12, 4096  ;;  %s8057_s30 = scalar_lea.hbm %s11272_s5, 8192 }
 0x561   : > { %p8054_p4 = scmp.ne.s32.totalorder %s11193_s12, %s8053_s23  ;;  %p8058_p9 = scmp.lt.s32.totalorder %s11193_s12, %s11272_s5 }
 0x562   : > { %p8059_p10 = scmp.lt.s32.totalorder %s8057_s30, %s8053_s23 }
 0x563   : > { %p8055_p7 = pnand %p8054_p4, %p8172_p5 }
 0x564   : > { %p8060_p11 = por %p8059_p10, %p8058_p9 }
 0x565   : > { %p8056_p8 = pneg %p8055_p7 }
 0x567   : > { %p8061_p12 = pnand %p8060_p11, %p8056_p8 }
 0x569   : > { %8064 = shalt.err (!%p8061_p12)
}
 0x56a   : > { %s8102_s8 = smov 128   ;;  %s8103_s9 = smov 8  }
 0x56b   : > { %7958 = dma.vmem_to_hbm [thread:$0]  (%p8172_p5), %s11195_s10, 4096, %s11193_s12, %s11227_s13, %s8102_s8, %s8102_s8, %s8103_s9  }
 0x56c PF: > { %p7964_p13 = scmp.ge.s32.totalorder %s8099_s21, 2  ;;  %s6535_s22 = sand.u32 1, %s8087_s18  }
 0x56d   : > { %s6536_s11 = scalar_lea.sflag [#allocation4], %s6535_s22 }
 0x56e   : > { %p7961_p0 = pnand %p7964_p13, %p8176_p6 }
 0x570   : > { %p7962_p1 = pneg %p7961_p0 }
 0x572   : > { %8082 = dma.done.wait (%p7962_p1), %s6536_s11, 4096  }
 0x573   : > { %8084 = vsyncadd (%p7962_p1), %s6536_s11, 4294963200  ;;  %p15_p2 = scmp.ge.s32.totalorder %s8159_s24, 4   ;;  %s11525_s18 = smov %s8091_s19 }
 0x574   : > { %s11526_s19 = smov %s8095_s20  ;;  %s11527_s20 = smov %s8170_s27 }
 0x575   : > { %s11528_s21 = smov %s8159_s24  ;;  %17 = sbr.rel (!%p15_p2) target bundleno = 3 (0x3), region = 94 }
 0x57a   :  { %6541 = vsyncpa [#allocation4], 1 }
 0x57b   :  { %6543 = vsyncpa [#allocation4 + $0x1], 1 }

</bundles_post_ra>
